<compile_context>
chip_gen: v5e
topology: v5e:2x2
jax: 0.10.0
libtpu: 0.0.40
codegen_flags: <defaults>
</compile_context>

<pallas_src>
import math
import functools

import jax
import jax.numpy as jnp
from jax import lax
from jax.experimental import pallas as pl
from jax.experimental.pallas import tpu as pltpu


def _round_up(x: int, m: int) -> int:
    return ((x + m - 1) // m) * m


# ---------------------------------------------------------------------------
# Kernel 1: per-batch K/V projection + head-major relayout (runs once per
# batch element, NOT once per query tile).
# ---------------------------------------------------------------------------
def _kv_proj_kernel(y_ref, wk_ref, bk_ref, wv_ref, bv_ref, kh_ref, vh_ref, *,
                    n_heads: int, d_head: int):
    y = y_ref[0]                                   # (Skv_pad, Dc)  bf16
    skv_pad = y.shape[0]
    k = jnp.dot(y, wk_ref[...], preferred_element_type=jnp.float32) + bk_ref[...]
    v = jnp.dot(y, wv_ref[...], preferred_element_type=jnp.float32) + bv_ref[...]
    # One relayout per batch element to head-major (H, Skv_pad, d_head), bf16.
    kh_ref[0] = jnp.transpose(
        k.astype(kh_ref.dtype).reshape(skv_pad, n_heads, d_head), (1, 0, 2))
    vh_ref[0] = jnp.transpose(
        v.astype(vh_ref.dtype).reshape(skv_pad, n_heads, d_head), (1, 0, 2))


# ---------------------------------------------------------------------------
# Kernel 2: per (batch, query-tile) attention.
# ---------------------------------------------------------------------------
def _attention_kernel(x_ref, kh_ref, vh_ref, wq_ref, bq_ref, wo_ref, bo_ref,
                      o_ref, *, n_heads: int, d_head: int, skv_valid: int,
                      scale: float):
    cdt = kh_ref.dtype                 # bf16 MXU operand dtype
    x = x_ref[0]                       # (TQ, De)  bf16
    tq = x.shape[0]

    # Q projection (f32 accumulation); fold 1/sqrt(d_head) into q once.
    q = (jnp.dot(x, wq_ref[...], preferred_element_type=jnp.float32)
         + bq_ref[...]) * scale                                        # (TQ, De) f32
    qh = jnp.transpose(q.astype(cdt).reshape(tq, n_heads, d_head), (1, 0, 2))

    kh = kh_ref[0]                     # (H, Skv_pad, dh)  bf16 (precomputed)
    vh = vh_ref[0]

    # Scores for all heads at once (leading-batch einsum -> MXU, f32 acc).
    s = jnp.einsum("hqd,hkd->hqk", qh, kh,
                   preferred_element_type=jnp.float32)                 # (H, TQ, Skv_pad)
    skv_pad = s.shape[-1]
    if skv_pad != skv_valid:
        # Mask padded key columns (context was zero-padded to a lane multiple).
        col = lax.broadcasted_iota(jnp.int32, s.shape, 2)
        s = jnp.where(col < skv_valid, s, jnp.float32(-1e30))

    # Numerically-stable softmax over the context axis (f32 math).
    # NOTE: approx reciprocal => rows sum to ~1 (not exactly 1); acceptable here.
    m = jnp.max(s, axis=-1, keepdims=True)
    p = jnp.exp(s - m)
    p = p * pl.reciprocal(jnp.sum(p, axis=-1, keepdims=True), approx=True)

    oh = jnp.einsum("hqk,hkd->hqd", p.astype(cdt), vh,
                    preferred_element_type=jnp.float32)                # (H, TQ, dh) f32
    oh = oh.astype(cdt)

    # Output projection with head-major wo (H, dh, De): accumulate per-head
    # partial products in f32 -- avoids the (H,TQ,dh)->(TQ,H*dh) re-concat
    # relayout (XLU) entirely.  n_heads is small, so the static unroll is fine.
    out = jnp.dot(oh[0], wo_ref[0], preferred_element_type=jnp.float32)
    for h in range(1, n_heads):
        out = out + jnp.dot(oh[h], wo_ref[h], preferred_element_type=jnp.float32)
    out = out + bo_ref[...]

    # Single lane-dense (TQ, De) store.  If Sq % tq != 0 the trailing rows of
    # the last block were computed on uninitialized data (possible inf/NaN);
    # they are masked on writeback -- intentional, do not "fix".
    o_ref[0] = out.astype(o_ref.dtype)


def cross_attention(x, y, params, *, n_heads, q_tile=None,
                    compute_dtype=jnp.bfloat16):
    """x: (B, Sq, d_embed), y: (B, Skv, d_cross) -> (B, Sq, d_embed)."""
    B, Sq, De = x.shape
    _, Skv, Dc = y.shape
    assert De % n_heads == 0
    d_head = De // n_heads
    out_dtype = x.dtype

    # ---- hardware-dependent tuning ------------------------------------
    try:
        vmem_cap = pltpu.get_tpu_info().vmem_capacity_bytes
    except Exception:  # pragma: no cover - conservative fallback
        vmem_cap = 128 * 1024 * 1024
    if q_tile is None:
        # Larger query tiles on 128-MiB-VMEM parts (v5e/v6e); 256 on v7x.
        q_tile = 512 if vmem_cap >= 100 * 1024 * 1024 else 256
    vmem_limit = max(32 * 1024 * 1024,
                     min(64 * 1024 * 1024, vmem_cap - 16 * 1024 * 1024))

    # ---- parameter preprocessing (wrapper-side layout plumbing) --------
    # PyTorch Linear weight is (out, in); pre-transpose to (in, out).  All MXU
    # operands are bf16; biases stay f32 (added to the f32 accumulator).
    wq = params["wq"].T.astype(compute_dtype)                     # (De, De)
    wk = params["wk"].T.astype(compute_dtype)                     # (Dc, De)
    wv = params["wv"].T.astype(compute_dtype)                     # (Dc, De)
    wo = params["wo"].T.astype(compute_dtype).reshape(n_heads, d_head, De)
    bq = params["bq"].astype(jnp.float32).reshape(1, De)
    bk = params["bk"].astype(jnp.float32).reshape(1, De)
    bv = params["bv"].astype(jnp.float32).reshape(1, De)
    bo = params["bo"].astype(jnp.float32).reshape(1, De)

    x_c = x.astype(compute_dtype)
    # Pad the context length to a lane multiple (128) so the score / PV tiles
    # are lane-dense; padded key columns are masked inside the kernel.
    Skv_pad = _round_up(Skv, 128)
    y_c = y.astype(compute_dtype)
    if Skv_pad != Skv:
        y_c = jnp.pad(y_c, ((0, 0), (0, Skv_pad - Skv), (0, 0)))

    # Grid-invariant params: one resident VMEM copy, no pipeline double-buffer.
    vmem_res = pl.BlockSpec(memory_space=pltpu.MemorySpace.VMEM)

    # ---- kernel 1: K/V projection, once per batch element --------------
    kv_shape = (B, n_heads, Skv_pad, d_head)
    kh, vh = pl.pallas_call(
        functools.partial(_kv_proj_kernel, n_heads=n_heads, d_head=d_head),
        out_shape=(jax.ShapeDtypeStruct(kv_shape, compute_dtype),
                   jax.ShapeDtypeStruct(kv_shape, compute_dtype)),
        grid_spec=pltpu.PrefetchScalarGridSpec(
            num_scalar_prefetch=0,
            grid=(B,),
            in_specs=[
                pl.BlockSpec((1, Skv_pad, Dc), lambda b: (b, 0, 0)),
                vmem_res, vmem_res, vmem_res, vmem_res,
            ],
            out_specs=(
                pl.BlockSpec((1, n_heads, Skv_pad, d_head),
                             lambda b: (b, 0, 0, 0)),
                pl.BlockSpec((1, n_heads, Skv_pad, d_head),
                             lambda b: (b, 0, 0, 0)),
            ),
        ),
        compiler_params=pltpu.CompilerParams(
            dimension_semantics=("parallel",),
            vmem_limit_bytes=vmem_limit,
        ),
    )(y_c, wk, bk, wv, bv)

    # ---- kernel 2: attention over query-row tiles -----------------------
    tq = Sq if Sq <= q_tile else q_tile
    grid = (B, pl.cdiv(Sq, tq))

    kernel = functools.partial(_attention_kernel, n_heads=n_heads,
                               d_head=d_head, skv_valid=Skv,
                               scale=1.0 / math.sqrt(d_head))

    out = pl.pallas_call(
        kernel,
        out_shape=jax.ShapeDtypeStruct((B, Sq, De), out_dtype),
        grid_spec=pltpu.PrefetchScalarGridSpec(
            num_scalar_prefetch=0,
            grid=grid,
            in_specs=[
                pl.BlockSpec((1, tq, De), lambda b, qi: (b, qi, 0)),      # x tile
                pl.BlockSpec((1, n_heads, Skv_pad, d_head),
                             lambda b, qi: (b, 0, 0, 0)),                 # kh
                pl.BlockSpec((1, n_heads, Skv_pad, d_head),
                             lambda b, qi: (b, 0, 0, 0)),                 # vh
                vmem_res, vmem_res, vmem_res, vmem_res,                   # wq,bq,wo,bo
            ],
            out_specs=pl.BlockSpec((1, tq, De), lambda b, qi: (b, qi, 0)),
        ),
        compiler_params=pltpu.CompilerParams(
            dimension_semantics=("parallel", "parallel"),
            vmem_limit_bytes=vmem_limit,
        ),
    )(x_c, kh, vh, wq, bq, wo, bo)

    return out


def cross_attention_ref(x, y, params, *, n_heads):
    """Pure-JAX (f32) reference mirroring the PyTorch forward."""
    B, Sq, De = x.shape
    d_head = De // n_heads
    q = x @ params["wq"].T + params["bq"]
    k = y @ params["wk"].T + params["bk"]
    v = y @ params["wv"].T + params["bv"]
    q = q.reshape(B, -1, n_heads, d_head).transpose(0, 2, 1, 3)
    k = k.reshape(B, -1, n_heads, d_head).transpose(0, 2, 1, 3)
    v = v.reshape(B, -1, n_heads, d_head).transpose(0, 2, 1, 3)
    w = jnp.einsum("bhqd,bhkd->bhqk", q, k) / math.sqrt(d_head)
    w = jax.nn.softmax(w, axis=-1)
    o = jnp.einsum("bhqk,bhkd->bhqd", w, v)
    o = o.transpose(0, 2, 1, 3).reshape(B, Sq, De)
    return o @ params["wo"].T + params["bo"]


if __name__ == "__main__":
    # Small shapes consistent with the module's forward.
    B, Sq, Skv = 2, 16, 8
    n_heads, d_embed, d_cross = 4, 32, 48

    key = jax.random.PRNGKey(0)
    keys = jax.random.split(key, 10)

    x = jax.random.normal(keys[0], (B, Sq, d_embed), dtype=jnp.float32)
    y = jax.random.normal(keys[1], (B, Skv, d_cross), dtype=jnp.float32)

    # Deterministic parameter init (PyTorch Linear weight convention: (out, in)).
    params = {
        "wq": 0.1 * jax.random.normal(keys[2], (d_embed, d_embed), jnp.float32),
        "bq": 0.1 * jax.random.normal(keys[3], (d_embed,), jnp.float32),
        "wk": 0.1 * jax.random.normal(keys[4], (d_embed, d_cross), jnp.float32),
        "bk": 0.1 * jax.random.normal(keys[5], (d_embed,), jnp.float32),
        "wv": 0.1 * jax.random.normal(keys[6], (d_embed, d_cross), jnp.float32),
        "bv": 0.1 * jax.random.normal(keys[7], (d_embed,), jnp.float32),
        "wo": 0.1 * jax.random.normal(keys[8], (d_embed, d_embed), jnp.float32),
        "bo": 0.1 * jax.random.normal(keys[9], (d_embed,), jnp.float32),
    }

    out = cross_attention(x, y, params, n_heads=n_heads)
    out = jax.block_until_ready(out)

    ref = cross_attention_ref(x, y, params, n_heads=n_heads)
    assert out.shape == (B, Sq, d_embed)
    # Tolerance accounts for bf16 MXU operands (vs the f32 reference) and the
    # approximate EUP reciprocal used for softmax normalization.
    max_err = float(jnp.max(jnp.abs(out.astype(jnp.float32) - ref)))
    assert jnp.allclose(out.astype(jnp.float32), ref, rtol=5e-2, atol=5e-2), max_err

    print("KERNEL_OK")
</pallas_src>

<mosaic_0001>
module attributes {stable_mosaic.version = 11 : i64} {
  func.func @_kv_proj_kernel(%arg0: i32, %arg1: memref<1x128x48xbf16, #tpu.memory_space<vmem>>, %arg2: memref<48x32xbf16, #tpu.memory_space<vmem>>, %arg3: memref<1x32xf32, #tpu.memory_space<vmem>>, %arg4: memref<48x32xbf16, #tpu.memory_space<vmem>>, %arg5: memref<1x32xf32, #tpu.memory_space<vmem>>, %arg6: memref<1x4x128x8xbf16, #tpu.memory_space<vmem>>, %arg7: memref<1x4x128x8xbf16, #tpu.memory_space<vmem>>) attributes {dimension_semantics = [#tpu.dimension_semantics<parallel>], iteration_bounds = array<i64: 2>, scalar_prefetch = 0 : i64, scratch_operands = 0 : i64, tpu.core_type = #tpu.core_type<tc>, window_params = [{transform_indices = @transform_0, window_bounds = array<i64: 1, 128, 48>}, {pipeline_mode = #tpu.pipeline_mode<synchronous>, transform_indices = @transform_1, window_bounds = array<i64: 48, 32>}, {pipeline_mode = #tpu.pipeline_mode<synchronous>, transform_indices = @transform_2, window_bounds = array<i64: 1, 32>}, {pipeline_mode = #tpu.pipeline_mode<synchronous>, transform_indices = @transform_3, window_bounds = array<i64: 48, 32>}, {pipeline_mode = #tpu.pipeline_mode<synchronous>, transform_indices = @transform_4, window_bounds = array<i64: 1, 32>}, {transform_indices = @transform_5, window_bounds = array<i64: 1, 4, 128, 8>}, {transform_indices = @transform_6, window_bounds = array<i64: 1, 4, 128, 8>}]} {
    %c0 = arith.constant 0 : index
    %c0_0 = arith.constant 0 : index
    %c0_1 = arith.constant 0 : index
    %0 = vector.load %arg1[%c0, %c0_0, %c0_1] : memref<1x128x48xbf16, #tpu.memory_space<vmem>>, vector<1x128x48xbf16>
    %1 = vector.shape_cast %0 : vector<1x128x48xbf16> to vector<128x48xbf16>
    %c0_2 = arith.constant 0 : index
    %c0_3 = arith.constant 0 : index
    %2 = vector.load %arg2[%c0_2, %c0_3] : memref<48x32xbf16, #tpu.memory_space<vmem>>, vector<48x32xbf16>
    %cst = arith.constant dense<0.000000e+00> : vector<128x32xf32>
    %3 = tpu.matmul %1, %2, %cst {dimension_numbers = #tpu.dot_dimension_numbers<[1], [0], [0], [1], [0, 0, 1, 1], [], []>} : vector<128x48xbf16>, vector<48x32xbf16>, vector<128x32xf32> -> vector<128x32xf32>
    %c0_4 = arith.constant 0 : index
    %c0_5 = arith.constant 0 : index
    %4 = vector.load %arg3[%c0_4, %c0_5] : memref<1x32xf32, #tpu.memory_space<vmem>>, vector<1x32xf32>
    %5 = vector.broadcast %4 : vector<1x32xf32> to vector<128x32xf32>
    %6 = arith.addf %3, %5 : vector<128x32xf32>
    %c0_6 = arith.constant 0 : index
    %c0_7 = arith.constant 0 : index
    %7 = vector.load %arg4[%c0_6, %c0_7] : memref<48x32xbf16, #tpu.memory_space<vmem>>, vector<48x32xbf16>
    %cst_8 = arith.constant dense<0.000000e+00> : vector<128x32xf32>
    %8 = tpu.matmul %1, %7, %cst_8 {dimension_numbers = #tpu.dot_dimension_numbers<[1], [0], [0], [1], [0, 0, 1, 1], [], []>} : vector<128x48xbf16>, vector<48x32xbf16>, vector<128x32xf32> -> vector<128x32xf32>
    %c0_9 = arith.constant 0 : index
    %c0_10 = arith.constant 0 : index
    %9 = vector.load %arg5[%c0_9, %c0_10] : memref<1x32xf32, #tpu.memory_space<vmem>>, vector<1x32xf32>
    %10 = vector.broadcast %9 : vector<1x32xf32> to vector<128x32xf32>
    %11 = arith.addf %8, %10 : vector<128x32xf32>
    %12 = arith.truncf %6 : vector<128x32xf32> to vector<128x32xbf16>
    %13 = vector.shape_cast %12 : vector<128x32xbf16> to vector<128x4x8xbf16>
    %14 = tpu.transpose %13, [1, 0, 2] : vector<128x4x8xbf16> -> vector<4x128x8xbf16>
    %c0_11 = arith.constant 0 : index
    %c0_12 = arith.constant 0 : index
    %c0_13 = arith.constant 0 : index
    %c0_14 = arith.constant 0 : index
    %15 = vector.load %arg6[%c0_11, %c0_12, %c0_13, %c0_14] : memref<1x4x128x8xbf16, #tpu.memory_space<vmem>>, vector<1x4x128x8xbf16>
    %16 = vector.shape_cast %15 : vector<1x4x128x8xbf16> to vector<4x128x8xbf16>
    %17 = vector.shape_cast %14 : vector<4x128x8xbf16> to vector<1x4x128x8xbf16>
    tpu.vector_store %arg6[%c0_11, %c0_12, %c0_13, %c0_14], %17 {strides = array<i32>} : memref<1x4x128x8xbf16, #tpu.memory_space<vmem>>, vector<1x4x128x8xbf16>,
    %18 = arith.truncf %11 : vector<128x32xf32> to vector<128x32xbf16>
    %19 = vector.shape_cast %18 : vector<128x32xbf16> to vector<128x4x8xbf16>
    %20 = tpu.transpose %19, [1, 0, 2] : vector<128x4x8xbf16> -> vector<4x128x8xbf16>
    %c0_15 = arith.constant 0 : index
    %c0_16 = arith.constant 0 : index
    %c0_17 = arith.constant 0 : index
    %c0_18 = arith.constant 0 : index
    %21 = vector.load %arg7[%c0_15, %c0_16, %c0_17, %c0_18] : memref<1x4x128x8xbf16, #tpu.memory_space<vmem>>, vector<1x4x128x8xbf16>
    %22 = vector.shape_cast %21 : vector<1x4x128x8xbf16> to vector<4x128x8xbf16>
    %23 = vector.shape_cast %20 : vector<4x128x8xbf16> to vector<1x4x128x8xbf16>
    tpu.vector_store %arg7[%c0_15, %c0_16, %c0_17, %c0_18], %23 {strides = array<i32>} : memref<1x4x128x8xbf16, #tpu.memory_space<vmem>>, vector<1x4x128x8xbf16>,
    return
  }
  func.func @transform_0(%arg0: i32) -> (i32, i32, i32) {
    %c0_i32 = arith.constant 0 : i32
    %c0_i32_0 = arith.constant 0 : i32
    %c0_i32_1 = arith.constant 0 : i32
    return %arg0, %c0_i32, %c0_i32_0 : i32, i32, i32
  }
  func.func @transform_1(%arg0: i32) -> (i32, i32) {
    %c0_i32 = arith.constant 0 : i32
    %c0_i32_0 = arith.constant 0 : i32
    %c0_i32_1 = arith.constant 0 : i32
    return %c0_i32, %c0_i32_0 : i32, i32
  }
  func.func @transform_2(%arg0: i32) -> (i32, i32) {
    %c0_i32 = arith.constant 0 : i32
    %c0_i32_0 = arith.constant 0 : i32
    %c0_i32_1 = arith.constant 0 : i32
    return %c0_i32, %c0_i32_0 : i32, i32
  }
  func.func @transform_3(%arg0: i32) -> (i32, i32) {
    %c0_i32 = arith.constant 0 : i32
    %c0_i32_0 = arith.constant 0 : i32
    %c0_i32_1 = arith.constant 0 : i32
    return %c0_i32, %c0_i32_0 : i32, i32
  }
  func.func @transform_4(%arg0: i32) -> (i32, i32) {
    %c0_i32 = arith.constant 0 : i32
    %c0_i32_0 = arith.constant 0 : i32
    %c0_i32_1 = arith.constant 0 : i32
    return %c0_i32, %c0_i32_0 : i32, i32
  }
  func.func @transform_5(%arg0: i32) -> (i32, i32, i32, i32) {
    %c0_i32 = arith.constant 0 : i32
    %c0_i32_0 = arith.constant 0 : i32
    %c0_i32_1 = arith.constant 0 : i32
    %c0_i32_2 = arith.constant 0 : i32
    return %arg0, %c0_i32, %c0_i32_0, %c0_i32_1 : i32, i32, i32, i32
  }
  func.func @transform_6(%arg0: i32) -> (i32, i32, i32, i32) {
    %c0_i32 = arith.constant 0 : i32
    %c0_i32_0 = arith.constant 0 : i32
    %c0_i32_1 = arith.constant 0 : i32
    %c0_i32_2 = arith.constant 0 : i32
    return %arg0, %c0_i32, %c0_i32_0, %c0_i32_1 : i32, i32, i32, i32
  }
}

</mosaic_0001>

<bundles_post_ra>
// kernel: tpu_custom_call.1
= control target key start
LH: loop header
LB: loop body
LE: loop exit
PB: predicated region body
PF: predicated region fallthrough
CT: control target
= control target key end

     0   :  { %s4923_s21 = smov 0   ;;  %s7142_s0 = inlined_call_operand.vmem [shape: bf16[2,128,48], index: 0, kind: input, shape index: {}]   ;;  %s7143_s1 = inlined_call_operand.vmem [shape: bf16[48,32], index: 1, kind: input, shape index: {}]   ;;  %s7144_s2 = inlined_call_operand.vmem [shape: f32[1,32], index: 2, kind: input, shape index: {}]   ;;  %s7145_s3 = inlined_call_operand.vmem [shape: bf16[48,32], index: 3, kind: input, shape index: {}]   ;;  %s7146_s4 = inlined_call_operand.vmem [shape: f32[1,32], index: 4, kind: input, shape index: {}]   ;;  %s7147_s5 = inlined_call_operand.vmem [shape: bf16[2,4,128,8], index: 5, kind: output, shape index: {0}]   ;;  %s7148_s6 = inlined_call_operand.vmem [shape: bf16[2,4,128,8], index: 6, kind: output, shape index: {1}]  }
   0x1 LB: > { %s4751_s22 = sadd.s32 4294967295, %s4881_s21   ;;  %p4755_p0 = scmp.ge.s32.totalorder %s4881_s21, 1  ;;  %s4881_s21 = sphi %s4923_s21, %s17_s21  }
   0x2   : > { %p215_p1 = scmp.lt.s32.totalorder %s4881_s21, 3 }
   0x4   : > { %p216_p2 = pnand %p4755_p0, %p215_p1 }
   0x6   : > { %219 = sbr.rel (%p216_p2) target bundleno = 769 (0x301), region = 40 }
   0xb   : > { %v4849_v0 = vld [vmem:[%s7143_s1 + $0x10] sm:$0xff]  ;;  %p250_p3 = scmp.lt.s32.totalorder %s4751_s22, 1  ;;  %v4848_v2 = vld [vmem:[%s7143_s1 + $0x8] sm:$0xff]  ;;  %v4847_v4 = vld [vmem:[%s7143_s1] sm:$0xff]  ;;  %vm350_vm0 = vcmask 392192   ;;  %s4883_s19 = smov 104  }
   0xc   : > { %v4852_v1 = vld [vmem:[%s7145_s3 + $0x10] sm:$0xff]  ;;  %380 = vmatpush.bf16.msra.mxu0 %v4849_v0  ;;  %v4851_v3 = vld [vmem:[%s7145_s3 + $0x8] sm:$0xff]  ;;  %4853 = vmatpush.bf16.msra.mxu2 %v4849_v0  ;;  %v4850_v5 = vld [vmem:[%s7145_s3] sm:$0xff]  ;;  %s4884_s20 = smov 112   ;;  %s4885_s23 = smov 120   ;;  %vm832_vm1 = vcmask 1047556  }
   0xd   : > { %457 = vmatpush.bf16.msra.mxu1 %v4852_v1  ;;  %s7271_s22 = smov (!%p250_p3, %s4751_s22), 1  ;;  %4856 = vmatpush.bf16.msra.mxu3 %v4852_v1  ;;  %v4981_v13 = vld [vmem:[%s7144_s2] ss:$0 sm:$0xff]  ;;  %vm2518_vm2 = vcmask 60416  }
   0xe   : > { %s4836_s7 = sshll.u32 %s7271_s22, 6  ;;  %v4990_v17 = vld [vmem:[%s7146_s4] ss:$0 sm:$0xff]  ;;  %s4837_s24 = sshll.u32 %s7271_s22, 8 }
   0xf   : > { %s4955_s14 = scalar_lea.vmem %s7142_s0, %s4836_s7  ;;  %s5287_s27 = scalar_lea.vmem %s7147_s5, %s4837_s24 }
  0x10   : > { %381 = vmatpush.bf16.msra.mxu0 %v4848_v2  ;;  %4854 = vmatpush.bf16.msra.mxu2 %v4848_v2  ;;  %v4839_v6 = vld [vmem:[%s4955_s14] sm:$0xff]  ;;  %v4840_v8 = vld [vmem:[%s4955_s14 + $0x8] sm:$0xff]  ;;  %v4841_v10 = vld [vmem:[%s4955_s14 + $0x10] sm:$0xff]  ;;  %s6347_s8 = scalar_lea.vmem %s7148_s6, %s4837_s24 }
  0x11   : > { %458 = vmatpush.bf16.msra.mxu1 %v4851_v3  ;;  %4857 = vmatpush.bf16.msra.mxu3 %v4851_v3  ;;  %v4843_v7 = vld [vmem:[%s4955_s14 + $0x20] sm:$0xff]  ;;  %v4844_v9 = vld [vmem:[%s4955_s14 + $0x28] sm:$0xff]  ;;  %v4845_v11 = vld [vmem:[%s4955_s14 + $0x30] sm:$0xff] }
  0x12   : > { %v4842_v12 = vld [vmem:[%s4955_s14 + $0x18] sm:$0xff] }
  0x13   : > { %v4846_v14 = vld [vmem:[%s4955_s14 + $0x38] sm:$0xff] }
  0x14   : > { %382 = vmatpush.bf16.msra.mxu0 %v4847_v4  ;;  %4855 = vmatpush.bf16.msra.mxu2 %v4847_v4 }
  0x15   : > { %459 = vmatpush.bf16.msra.mxu1 %v4850_v5  ;;  %4858 = vmatpush.bf16.msra.mxu3 %v4850_v5 }
  0x17   : > { %4806 = vmatmul.msk.bf16.vlgmr.msra.gmra.mxu0 %vm350_vm0, %v4839_v6  ;;  %4810 = vmatmul.msk.bf16.vlgmr.msra.gmra.mxu2 %vm350_vm0, %v4843_v7 }
  0x18   : > { %4826 = vmatmul.msk.bf16.vlgmr.msra.gmra.mxu1 %vm350_vm0, %v4839_v6  ;;  %4830 = vmatmul.msk.bf16.vlgmr.msra.gmra.mxu3 %vm350_vm0, %v4843_v7 }
  0x27   : > { %4807 = vmatmul.msk.bf16.gmra.mxu0 %vm350_vm0, %v4840_v8  ;;  %4811 = vmatmul.msk.bf16.gmra.mxu2 %vm350_vm0, %v4844_v9 }
  0x28   : > { %4827 = vmatmul.msk.bf16.gmra.mxu1 %vm350_vm0, %v4840_v8  ;;  %4831 = vmatmul.msk.bf16.gmra.mxu3 %vm350_vm0, %v4844_v9 }
  0x37   : > { %4808 = vmatmul.msk.bf16.gmra.mxu0 %vm350_vm0, %v4841_v10  ;;  %4812 = vmatmul.msk.bf16.gmra.mxu2 %vm350_vm0, %v4845_v11 }
  0x38   : > { %4828 = vmatmul.msk.bf16.gmra.mxu1 %vm350_vm0, %v4841_v10  ;;  %4832 = vmatmul.msk.bf16.gmra.mxu3 %vm350_vm0, %v4845_v11 }
  0x47   : > { %4809 = vmatmul.msk.bf16.gmra.mxu0 %vm350_vm0, %v4842_v12  ;;  %4813 = vmatmul.msk.bf16.gmra.mxu2 %vm350_vm0, %v4846_v14 }
  0x48   : > { %4829 = vmatmul.msk.bf16.gmra.mxu1 %vm350_vm0, %v4842_v12  ;;  %4833 = vmatmul.msk.bf16.gmra.mxu3 %vm350_vm0, %v4846_v14 }
  0x94   : > { %v384_v15 = vpop.f32.mrf.mxu0 }
  0x95   : > { %v385_v16 = vadd.f32 %v4981_v13, %v384_v15  ;;  %v461_v19 = vpop.f32.mrf.mxu1 }
  0x96   : > { %v462_v20 = vadd.f32 %v4990_v17, %v461_v19  ;;  %v4886_v19 = vmov 1983009808  }
  0x97   : > { %v4992_v18 = vpack.c.bf16 %v385_v16, %v385_v16 }
  0x98   : > { %v5002_v23 = vpack.c.bf16 %v462_v20, %v462_v20  ;;  %v823_v20 = vunpack.c.l.s4 %v4886_v19 }
  0x99   : > { %597 = vrot.lane.b32.xlu2 %v4992_v18, %s4883_s19  ;;  %565 = vrot.lane.b32.xlu1 %v4992_v18, %s4884_s20  ;;  %v632_v15 = vshrl.u32 %v4992_v18, 16 }
  0x9a   : > { %533 = vrot.lane.b32.xlu0 %v4992_v18, %s4885_s23  ;;  %v404_v21 = vpop.f32.mrf.mxu2  ;;  %v2714_v16 = vshrl.u32 %v5002_v23, 16 }
  0x9b   : > { %v405_v22 = vadd.f32 %v4981_v13, %v404_v21  ;;  %v481_v25 = vpop.f32.mrf.mxu3 }
  0x9c   : > { %v482_v26 = vadd.f32 %v4990_v17, %v481_v25  ;;  %v386_v28 = vpop.f32.mrf.mxu0 }
  0x9d   : > { %v5004_v24 = vpack.c.bf16 %v405_v22, %v405_v22  ;;  %v463_v29 = vpop.f32.mrf.mxu1  ;;  %v387_v30 = vadd.f32 %v4981_v13, %v386_v28 }
  0x9e   : > { %v5013_v27 = vpack.c.bf16 %v482_v26, %v482_v26  ;;  %v464_v31 = vadd.f32 %v4990_v17, %v463_v29 }
  0x9f   : > { %v5023_v32 = vpack.c.bf16 %v387_v30, %v387_v30  ;;  %v728_v12 = vshrl.u32 %v5004_v24, 16 }
  0xa0   : > { %v5025_v33 = vpack.c.bf16 %v464_v31, %v464_v31  ;;  %v2810_v14 = vshrl.u32 %v5013_v27, 16 }
  0xa1   : > { %549 = vrot.lane.b32.xlu2 %v5004_v24, %s4885_s23  ;;  %2647 = vrot.lane.b32.xlu1 %v5002_v23, %s4884_s20  ;;  %v644_v22 = vshrl.u32 %v5023_v32, 16 }
  0xa2   : > { %2615 = vrot.lane.b32.xlu0 %v5002_v23, %s4885_s23  ;;  %v406_v34 = vpop.f32.mrf.mxu2  ;;  %v2726_v21 = vshrl.u32 %v5025_v33, 16 }
  0xa3   : > { %v407_v35 = vadd.f32 %v4981_v13, %v406_v34  ;;  %v483_v37 = vpop.f32.mrf.mxu3 }
  0xa4   : > { %v484_v38 = vadd.f32 %v4990_v17, %v483_v37  ;;  %v389_v41 = vpop.f32.mrf.mxu0 }
  0xa5   : > { %v5034_v36 = vpack.c.bf16 %v407_v35, %v407_v35  ;;  %v466_v39 = vpop.f32.mrf.mxu1  ;;  %v390_v42 = vadd.f32 %v4981_v13, %v389_v41 }
  0xa6   : > { %v5043_v40 = vpack.c.bf16 %v484_v38, %v484_v38  ;;  %v467_v43 = vadd.f32 %v4990_v17, %v466_v39 }
  0xa7   : > { %v5053_v44 = vpack.c.bf16 %v390_v42, %v390_v42 }
  0xa8   : > { %v5055_v45 = vpack.c.bf16 %v467_v43, %v467_v43  ;;  %v5157_v43 = vunpack.c.0.s8 %v823_v20 }
  0xa9   : > { %2631 = vrot.lane.b32.xlu2 %v5013_v27, %s4885_s23  ;;  %613 = vrot.lane.b32.xlu1 %v5004_v24, %s4883_s19 }
  0xaa   : > { %581 = vrot.lane.b32.xlu0 %v5004_v24, %s4884_s20  ;;  %v409_v46 = vpop.f32.mrf.mxu2  ;;  %v2738_v34 = vshrl.u32 %v5055_v45, 16 }
  0xab   : > { %v410_v47 = vadd.f32 %v4981_v13, %v409_v46  ;;  %v486_v49 = vpop.f32.mrf.mxu3 }
  0xac   : > { %v487_v50 = vadd.f32 %v4990_v17, %v486_v49  ;;  %v391_v52 = vpop.f32.mrf.mxu0 }
  0xad   : > { %v5064_v48 = vpack.c.bf16 %v410_v47, %v410_v47  ;;  %v392_v53 = vadd.f32 %v4981_v13, %v391_v52  ;;  %v468_v59 = vpop.f32.mrf.mxu1  ;;  %v4887_v52 = vmov 1934713408  }
  0xae   : > { %v5073_v51 = vpack.c.bf16 %v487_v50, %v487_v50  ;;  %v469_v61 = vadd.f32 %v4990_v17, %v468_v59 }
  0xaf   : > { %v5082_v54 = vpack.c.bf16 %v392_v53, %v392_v53  ;;  %v837_v53 = vunpack.c.l.s4 %v4887_v52 }
  0xb0   : > { %v5103_v0 = vpack.c.bf16 %v469_v61, %v469_v61 }
  0xb1   : > { %567 = vrot.lane.b32.xlu2 %v5023_v32, %s4884_s20  ;;  %2617 = vrot.lane.b32.xlu1 %v5025_v33, %s4885_s23 }
  0xb2   : > { %2663 = vrot.lane.b32.xlu0 %v5013_v27, %s4884_s20  ;;  %v411_v55 = vpop.f32.mrf.mxu2 }
  0xb3   : > { %v412_v56 = vadd.f32 %v4981_v13, %v411_v55  ;;  %v488_v58 = vpop.f32.mrf.mxu3 }
  0xb4   : > { %v489_v60 = vadd.f32 %v4990_v17, %v488_v58  ;;  %v394_v62 = vpop.f32.mrf.mxu0 }
  0xb5   : > { %v5091_v57 = vpack.c.bf16 %v412_v56, %v412_v56  ;;  %v395_v1 = vadd.f32 %v4981_v13, %v394_v62  ;;  %v471_v5 = vpop.f32.mrf.mxu1 }
  0xb6   : > { %v5101_v63 = vpack.c.bf16 %v489_v60, %v489_v60  ;;  %v472_v6 = vadd.f32 %v4990_v17, %v471_v5 }
  0xb7   : > { %v5112_v3 = vpack.c.bf16 %v395_v1, %v395_v1 }
  0xb8   : > { %v5131_v10 = vpack.c.bf16 %v472_v6, %v472_v6 }
  0xb9   : > { %2649 = vrot.lane.b32.xlu2 %v5025_v33, %s4884_s20  ;;  %583 = vrot.lane.b32.xlu1 %v5034_v36, %s4884_s20 }
  0xba   : > { %535 = vrot.lane.b32.xlu0 %v5023_v32, %s4885_s23  ;;  %v414_v8 = vpop.f32.mrf.mxu2 }
  0xbb   : > { %v491_v9 = vpop.f32.mrf.mxu3  ;;  %v415_v31 = vadd.f32 %v4981_v13, %v414_v8 }
  0xbc   : > { %v396_v11 = vpop.f32.mrf.mxu0 }
  0xbd   : > { %v397_v26 = vadd.f32 %v4981_v13, %v396_v11  ;;  %v473_v28 = vpop.f32.mrf.mxu1  ;;  %v5165_v61 = vpack.c.bf16 %v415_v31, %v415_v31 }
  0xbe   : > { %v474_v47 = vadd.f32 %v4990_v17, %v473_v28 }
  0xbf   : > { %v5163_v56 = vpack.c.bf16 %v397_v26, %v397_v26 }
  0xc1   : > { %615 = vrot.lane.b32.xlu2 %v5034_v36, %s4883_s19  ;;  %2665 = vrot.lane.b32.xlu1 %v5043_v40, %s4884_s20 }
  0xc2   : > { %599 = vrot.lane.b32.xlu0 %v5023_v32, %s4883_s19  ;;  %v416_v5 = vpop.f32.mrf.mxu2 }
  0xc3   : > { %v493_v20 = vpop.f32.mrf.mxu3  ;;  %v417_v52 = vadd.f32 %v4981_v13, %v416_v5 }
  0xc9   : > { %2619 = vrot.lane.b32.xlu2 %v5055_v45, %s4885_s23  ;;  %537 = vrot.lane.b32.xlu1 %v5053_v44, %s4885_s23 }
  0xca   : > { %551 = vrot.lane.b32.xlu0 %v5034_v36, %s4885_s23 }
  0xd1   : > { %585 = vrot.lane.b32.xlu2 %v5064_v48, %s4884_s20  ;;  %601 = vrot.lane.b32.xlu1 %v5053_v44, %s4883_s19 }
  0xd2   : > { %2633 = vrot.lane.b32.xlu0 %v5043_v40, %s4885_s23 }
  0xd9   : > { %2667 = vrot.lane.b32.xlu2 %v5073_v51, %s4884_s20  ;;  %553 = vrot.lane.b32.xlu1 %v5064_v48, %s4885_s23 }
  0xda   : > { %569 = vrot.lane.b32.xlu0 %v5053_v44, %s4884_s20 }
  0xe1   : > { %603 = vrot.lane.b32.xlu2 %v5082_v54, %s4883_s19  ;;  %2635 = vrot.lane.b32.xlu1 %v5073_v51, %s4885_s23 }
  0xe2   : > { %2651 = vrot.lane.b32.xlu0 %v5055_v45, %s4884_s20 }
  0xe9   : > { %555 = vrot.lane.b32.xlu2 %v5091_v57, %s4885_s23  ;;  %539 = vrot.lane.b32.xlu1 %v5082_v54, %s4885_s23 }
  0xea   : > { %617 = vrot.lane.b32.xlu0 %v5064_v48, %s4883_s19 }
  0xf1   : > { %2637 = vrot.lane.b32.xlu2 %v5101_v63, %s4885_s23  ;;  %571 = vrot.lane.b32.xlu1 %v5082_v54, %s4884_s20 }
  0xf2   : > { %2621 = vrot.lane.b32.xlu0 %v5103_v0, %s4885_s23 }
  0xf3   : > { %v598_v2 = vpop.permute.xlu2 %597 }
  0xf4   : > { %v639_v55 = vshrl.u32 %v598_v2, 16 }
  0xf9   : > { %541 = vrot.lane.b32.xlu2 %v5112_v3, %s4885_s23  ;;  %2653 = vrot.lane.b32.xlu1 %v5103_v0, %s4884_s20 }
  0xfa   : > { %587 = vrot.lane.b32.xlu0 %v5091_v57, %s4884_s20 }
  0xfb   : > { %v5120_v4 = vpop.permute.xlu2 %549 }
  0xfc   : > { %v729_v46 = vshrl.u32 %v5120_v4, 16  ;;  %v727_v6 = vpack.i.b16 %v5120_v4, %v5004_v24 }
  0xfe   : > { %v730_v26 = vpack.i.b16 %v729_v46, %v728_v12  ;;  %v494_v12 = vadd.f32 %v4990_v17, %v493_v20 }
 0x101   : > { %573 = vrot.lane.b32.xlu2 %v5112_v3, %s4884_s20  ;;  %619 = vrot.lane.b32.xlu1 %v5091_v57, %s4883_s19 }
 0x102   : > { %2669 = vrot.lane.b32.xlu0 %v5101_v63, %s4884_s20 }
 0x103   : > { %v5129_v7 = vpop.permute.xlu2 %2631 }
 0x104   : > { %v2811_v8 = vshrl.u32 %v5129_v7, 16  ;;  %v2809_v24 = vpack.i.b16 %v5129_v7, %v5013_v27  ;;  %v5193_v7 = vperm.slane %v730_v26, %v5157_v43 }
 0x106   : > { %v2812_v46 = vpack.i.b16 %v2811_v8, %v2810_v14  ;;  %v5210_v26 = vperm.slane %v2809_v24, %v5157_v43 }
 0x108   : > { %7178 = vst [vmem:[#allocation3_spill] sm:$0xff] %v5210_v26 }
 0x109   : > { %2655 = vrot.lane.b32.xlu2 %v5131_v10, %s4884_s20  ;;  %2623 = vrot.lane.b32.xlu1 %v5131_v10, %s4885_s23 }
 0x10a   : > { %605 = vrot.lane.b32.xlu0 %v5112_v3, %s4883_s19 }
 0x10b   : > { %v5161_v49 = vpop.permute.xlu2 %567  ;;  %v566_v50 = vpop.permute.xlu1 %565 }
 0x10c   : > { %v637_v58 = vpack.i.b16 %v598_v2, %v566_v50  ;;  %v638_v59 = vshrl.u32 %v566_v50, 16  ;;  %v534_v60 = vpop.permute.xlu0 %533  ;;  %v5172_v2 = vunpack.c.0.s8 %v837_v53 }
 0x10d   : > { %v631_v62 = vpack.i.b16 %v534_v60, %v4992_v18  ;;  %v633_v1 = vshrl.u32 %v534_v60, 16  ;;  %v492_v60 = vadd.f32 %v4990_v17, %v491_v9 }
 0x10e   : > { %v640_v11 = vpack.i.b16 %v639_v55, %v638_v59  ;;  %v830_v19 = vperm.slane %v637_v58, %v5157_v43 }
 0x10f   : > { %v634_v28 = vpack.i.b16 %v633_v1, %v632_v15  ;;  %v825_v31 = vperm.slane %v631_v62, %v5157_v43  ;;  %v5187_v15 = vperm.slane %v727_v6, %v5157_v43  ;;  %v5201_v6 = vpack.c.bf16 %v474_v47, %v474_v47 }
 0x110   : > { %v831_v50 = vrot.slane %v830_v19, 4  ;;  %v857_v18 = vperm.slane %v640_v11, %v5157_v43  ;;  %v5205_v11 = vpack.c.bf16 %v417_v52, %v417_v52  ;;  %v5217_v47 = vperm.slane %v2812_v46, %v5157_v43 }
 0x111   : > { %v834_v4 = vrot.slane %v825_v31, 4  ;;  %v852_v55 = vperm.slane %v634_v28, %v5157_v43  ;;  %621 = vrot.lane.b32.xlu2 %v5165_v61, %s4883_s19  ;;  %589 = vrot.lane.b32.xlu1 %v5165_v61, %s4884_s20  ;;  %v1250_v52 = vrot.slane %v5187_v15, 4 }
 0x112   : > { %v858_v53 = vrot.slane %v857_v18, 4  ;;  %v833_v9 = vsel %vm832_vm1, %v831_v50, %v825_v31  ;;  %557 = vrot.lane.b32.xlu0 %v5165_v61, %s4885_s23  ;;  %v5214_v31 = vpack.c.bf16 %v492_v60, %v492_v60  ;;  %7179 = vst [vmem:[#allocation4_spill] sm:$0xff] %v5217_v47 }
 0x113   : > { %v835_v58 = vsel %vm832_vm1, %v830_v19, %v834_v4  ;;  %v839_v59 = vperm.slane %v833_v9, %v5172_v2  ;;  %v860_v62 = vrot.slane %v852_v55, 4  ;;  %v5197_v1 = vpop.permute.xlu2 %2649  ;;  %v5199_v5 = vpop.permute.xlu1 %2647  ;;  %v5222_v9 = vpack.c.bf16 %v494_v12, %v494_v12 }
 0x114   : > { %7177 = vst [vmem:[#allocation2_spill] sm:$0xff] %v5197_v1  ;;  %v843_v14 = vperm.slane %v835_v58, %v5172_v2  ;;  %v859_v8 = vsel %vm832_vm1, %v858_v53, %v852_v55  ;;  %v5207_v20 = vpop.permute.xlu0 %2615  ;;  %v1276_v53 = vrot.slane %v5193_v7, 4 }
 0x115   : > { %v861_v19 = vsel %vm832_vm1, %v857_v18, %v860_v62  ;;  %v865_v28 = vperm.slane %v859_v8, %v5172_v2  ;;  %v844_v50 = vrot.slane %v839_v59, 4  ;;  %v2713_v46 = vpack.i.b16 %v5207_v20, %v5002_v23 }
 0x116   : > { %v846_v4 = vrot.slane %v843_v14, 4  ;;  %v869_v55 = vperm.slane %v861_v19, %v5172_v2  ;;  %v2715_v24 = vshrl.u32 %v5207_v20, 16 }
 0x117   : > { %v870_v58 = vrot.slane %v865_v28, 4  ;;  %v845_v42 = vsel %vm832_vm1, 0, %v844_v50 }
 0x118   : > { %v847_v18 = vsel %vm832_vm1, 0, %v846_v4  ;;  %v872_v60 = vrot.slane %v869_v55, 4  ;;  %v1654_v62 = vsel %vm832_vm1, %v846_v4, %v839_v59  ;;  %v399_v4 = vpop.f32.mrf.mxu0 }
 0x119   : > { %v1659_v8 = vrot.slane %v847_v18, 4  ;;  %543 = vrot.lane.b32.xlu2 %v5163_v56, %s4885_s23  ;;  %2671 = vrot.lane.b32.xlu1 %v5214_v31, %s4884_s20  ;;  %v871_v50 = vsel %vm832_vm1, 0, %v870_v58  ;;  %v5254_v58 = vperm.slane %v2713_v46, %v5157_v43 }
 0x11a   : > { %v873_v55 = vsel %vm832_vm1, 0, %v872_v60  ;;  %2639 = vrot.lane.b32.xlu0 %v5214_v31, %s4885_s23  ;;  %v1673_v30 = vsel %vm832_vm1, %v872_v60, %v865_v28 }
 0x11b   : > { %v1660_v12 = vsel %vm832_vm1, %v1659_v8, %v845_v42  ;;  %v1678_v37 = vrot.slane %v873_v55, 4  ;;  %v5244_v14 = vpop.permute.xlu2 %615  ;;  %v614_v19 = vpop.permute.xlu1 %613  ;;  %v1658_v8 = vperm.slane %v1654_v62, %v5157_v43 }
 0x11c   : > { %v1664_v41 = vperm.slane %v1660_v12, %v5157_v43  ;;  %v735_v39 = vshrl.u32 %v614_v19, 16  ;;  %v582_v38 = vpop.permute.xlu0 %581 }
 0x11d   : > { %v1679_v35 = vsel %vm832_vm1, %v1678_v37, %v871_v50  ;;  %v733_v59 = vpack.i.b16 %v614_v19, %v582_v38  ;;  %v734_v42 = vshrl.u32 %v582_v38, 16  ;;  %v1677_v38 = vperm.slane %v1673_v30, %v5157_v43 }
 0x11e   : > { %v1665_v55 = vrot.slane %v1664_v41, 4  ;;  %v1683_v29 = vperm.slane %v1679_v35, %v5157_v43 }
 0x11f   : > { %v736_v12 = vpack.i.b16 %v735_v39, %v734_v42  ;;  %v1247_v25 = vperm.slane %v733_v59, %v5157_v43 }
 0x120   : > { %v1666_v37 = vsel %vm832_vm1, %v1665_v55, %v1658_v8  ;;  %v1684_v60 = vrot.slane %v1683_v29, 4  ;;  %v2716_v29 = vpack.i.b16 %v2715_v24, %v2714_v16 }
 0x121   : > { %v1670_v35 = vperm.slane %v1666_v37, %v5172_v2  ;;  %v1248_v41 = vrot.slane %v1247_v25, 4  ;;  %v1251_v46 = vsel %vm832_vm1, %v1247_v25, %v1250_v52  ;;  %v1273_v39 = vperm.slane %v736_v12, %v5157_v43  ;;  %2625 = vrot.lane.b32.xlu2 %v5201_v6, %s4885_s23  ;;  %607 = vrot.lane.b32.xlu1 %v5163_v56, %s4883_s19 }
 0x122   : > { %v1685_v30 = vsel %vm832_vm1, %v1684_v60, %v1677_v38  ;;  %v1259_v50 = vperm.slane %v1251_v46, %v5172_v2  ;;  %575 = vrot.lane.b32.xlu0 %v5163_v56, %s4884_s20 }
 0x123   : > { %v1671_v25 = vrot.slane %v1670_v35, 4  ;;  %v1689_v52 = vperm.slane %v1685_v30, %v5172_v2  ;;  %v2266_v59 = vshrl.u32 %v1670_v35, 16  ;;  %v1249_v42 = vsel %vm832_vm1, %v1248_v41, %v5187_v15  ;;  %v2620_v8 = vpop.permute.xlu2 %2619  ;;  %v5280_v55 = vpop.permute.xlu1 %2617 }
 0x124   : > { %v1255_v16 = vperm.slane %v1249_v42, %v5172_v2  ;;  %v1262_v24 = vrot.slane %v1259_v50, 4  ;;  %v1274_v12 = vrot.slane %v1273_v39, 4  ;;  %v1277_v37 = vsel %vm832_vm1, %v1273_v39, %v1276_v53  ;;  %v5293_v38 = vpop.permute.xlu0 %2663 }
 0x125   : > { %7180 = vst [vmem:[#allocation5_spill] sm:$0xff] %v5293_v38  ;;  %v1672_v15 = vsel %vm832_vm1, 0, %v1671_v25  ;;  %v1690_v60 = vrot.slane %v1689_v52, 4  ;;  %v2264_v41 = vpack.i.b16 %v1689_v52, %v1670_v35  ;;  %v2267_v46 = vshrl.u32 %v1689_v52, 16  ;;  %v401_v25 = vpop.f32.mrf.mxu0 }
 0x126   : > { %v5297_v30 = vperm.slane %v2716_v29, %v5157_v43  ;;  %v1260_v20 = vrot.slane %v1255_v16, 4  ;;  %v1263_v42 = vsel %vm832_vm1, 0, %v1262_v24  ;;  %v1275_v50 = vsel %vm832_vm1, %v1274_v12, %v5193_v7 }
 0x127   : > { %v1691_v19 = vsel %vm832_vm1, 0, %v1690_v60  ;;  %v2268_v53 = vpack.i.b16 %v2267_v46, %v2266_v59  ;;  %2519 = vst.msk [vmem:[%s5287_s27] sm:$0xf] %vm2518_vm2, %v2264_v41  ;;  %v1281_v39 = vperm.slane %v1275_v50, %v5172_v2  ;;  %v1285_v35 = vperm.slane %v1277_v37, %v5172_v2 }
 0x128   : > { %v2272_v52 = vpack.i.b16 %v1691_v19, %v1672_v15  ;;  %v2274_v29 = vshrl.u32 %v1672_v15, 16  ;;  %v2275_v62 = vshrl.u32 %v1691_v19, 16  ;;  %v1261_v28 = vsel %vm832_vm1, 0, %v1260_v20 }
 0x129   : > { %2535 = vst.msk [vmem:[%s5287_s27 + $0x40] sm:$0xf] %vm2518_vm2, %v2268_v53  ;;  %v1286_v18 = vrot.slane %v1281_v39, 4  ;;  %v1288_v7 = vrot.slane %v1285_v35, 4  ;;  %v1963_v12 = vrot.slane %v1263_v42, 4  ;;  %591 = vrot.lane.b32.xlu2 %v5205_v11, %s4884_s20  ;;  %559 = vrot.lane.b32.xlu1 %v5205_v11, %s4885_s23  ;;  %v400_v59 = vadd.f32 %v4981_v13, %v399_v4  ;;  %v476_v35 = vpop.f32.mrf.mxu1 }
 0x12a   : > { %v2276_v37 = vpack.i.b16 %v2275_v62, %v2274_v29  ;;  %2551 = vst.msk [vmem:[%s5287_s27 + $0x80] sm:$0xf] %vm2518_vm2, %v2272_v52  ;;  %v1958_v19 = vsel %vm832_vm1, %v1262_v24, %v1255_v16  ;;  %v2739_v20 = vshrl.u32 %v2620_v8, 16  ;;  %2657 = vrot.lane.b32.xlu0 %v5201_v6, %s4884_s20  ;;  %v402_v15 = vadd.f32 %v4981_v13, %v401_v25 }
 0x12b   : > { %v1287_v60 = vsel %vm832_vm1, 0, %v1286_v18  ;;  %v1289_v41 = vsel %vm832_vm1, 0, %v1288_v7  ;;  %v1964_v46 = vsel %vm832_vm1, %v1963_v12, %v1261_v28  ;;  %v2737_v42 = vpack.i.b16 %v2620_v8, %v5055_v45  ;;  %v5325_v4 = vpop.permute.xlu2 %585  ;;  %v584_v62 = vpop.permute.xlu1 %583 }
 0x12c   : > { %2567 = vst.msk [vmem:[%s5287_s27 + $0xc0] sm:$0xf] %vm2518_vm2, %v2276_v37  ;;  %v1968_v16 = vperm.slane %v1964_v46, %v5157_v43  ;;  %v1977_v24 = vsel %vm832_vm1, %v1288_v7, %v1281_v39  ;;  %v1982_v50 = vrot.slane %v1289_v41, 4  ;;  %v2725_v53 = vpack.i.b16 %v5280_v55, %v5025_v33  ;;  %v536_v18 = vpop.permute.xlu0 %535 }
 0x12d   : > { %v747_v28 = vshrl.u32 %v5244_v14, 16  ;;  %v2727_v8 = vshrl.u32 %v5280_v55, 16  ;;  %v5336_v25 = vpack.c.bf16 %v400_v59, %v400_v59  ;;  %v1962_v52 = vperm.slane %v1958_v19, %v5157_v43 }
 0x12e   : > { %v1969_v29 = vrot.slane %v1968_v16, 4  ;;  %v1983_v12 = vsel %vm832_vm1, %v1982_v50, %v1287_v60  ;;  %v2740_v39 = vpack.i.b16 %v2739_v20, %v2738_v34  ;;  %v1981_v7 = vperm.slane %v1977_v24, %v5157_v43 }
 0x12f   : > { %v1987_v37 = vperm.slane %v1983_v12, %v5157_v43  ;;  %v5345_v41 = vperm.slane %v2737_v42, %v5157_v43  ;;  %v5347_v46 = vpack.c.bf16 %v402_v15, %v402_v15  ;;  %v2728_v59 = vpack.i.b16 %v2727_v8, %v2726_v21 }
 0x130   : > { %v1970_v55 = vsel %vm832_vm1, %v1969_v29, %v1962_v52  ;;  %v5353_v19 = vperm.slane %v2725_v53, %v5157_v43  ;;  %v745_v60 = vpack.i.b16 %v5244_v14, %v584_v62  ;;  %v746_v16 = vshrl.u32 %v584_v62, 16 }
 0x131   : > { %7181 = vst [vmem:[#allocation6_spill] sm:$0xff] %v5345_v41  ;;  %v1974_v34 = vperm.slane %v1970_v55, %v5172_v2  ;;  %v1988_v20 = vrot.slane %v1987_v37, 4  ;;  %v643_v24 = vpack.i.b16 %v536_v18, %v5023_v32  ;;  %2673 = vrot.lane.b32.xlu2 %v5222_v9, %s4884_s20  ;;  %2641 = vrot.lane.b32.xlu1 %v5222_v9, %s4885_s23  ;;  %v645_v42 = vshrl.u32 %v536_v18, 16 }
 0x132   : > { %7182 = vst [vmem:[#allocation7_spill] sm:$0xff] %v5353_v19  ;;  %v5363_v15 = vperm.slane %v2740_v39, %v5157_v43  ;;  %623 = vrot.lane.b32.xlu0 %v5205_v11, %s4883_s19  ;;  %v5379_v39 = vperm.slane %v2728_v59, %v5157_v43  ;;  %v5385_v21 = vperm.slane %v745_v60, %v5157_v43 }
 0x133   : > { %v1975_v62 = vrot.slane %v1974_v34, 4  ;;  %v1989_v50 = vsel %vm832_vm1, %v1988_v20, %v1981_v7  ;;  %v5372_v52 = vpop.permute.xlu2 %2667  ;;  %v5374_v29 = vpop.permute.xlu1 %2665  ;;  %v646_v37 = vpack.i.b16 %v645_v42, %v644_v22  ;;  %v748_v20 = vpack.i.b16 %v747_v28, %v746_v16 }
 0x134   : > { %7183 = vst [vmem:[#allocation8_spill] sm:$0xff] %v5363_v15  ;;  %v1993_v12 = vperm.slane %v1989_v50, %v5172_v2  ;;  %v600_v55 = vpop.permute.xlu0 %599  ;;  %v878_v53 = vperm.slane %v643_v24, %v5157_v43  ;;  %v2394_v18 = vshrl.u32 %v1974_v34, 16  ;;  %v477_v42 = vadd.f32 %v4990_v17, %v476_v35 }
 0x135   : > { %7184 = vst [vmem:[#allocation9_spill] sm:$0xff] %v5372_v52  ;;  %v1976_v7 = vsel %vm832_vm1, 0, %v1975_v62  ;;  %v649_v22 = vpack.i.b16 %v600_v55, %v5161_v49  ;;  %v904_v60 = vperm.slane %v646_v37, %v5157_v43  ;;  %v651_v24 = vshrl.u32 %v600_v55, 16 }
 0x136   : > { %7185 = vst [vmem:[#allocation10_spill] sm:$0xff] %v5374_v29  ;;  %v1994_v50 = vrot.slane %v1993_v12, 4  ;;  %v2392_v14 = vpack.i.b16 %v1993_v12, %v1974_v34  ;;  %v2395_v8 = vshrl.u32 %v1993_v12, 16  ;;  %v2402_v59 = vshrl.u32 %v1976_v7, 16 }
 0x137   : > { %7186 = vst [vmem:[#allocation11_spill] sm:$0xff] %v5379_v39  ;;  %v886_v12 = vrot.slane %v878_v53, 4  ;;  %v883_v47 = vperm.slane %v649_v22, %v5157_v43  ;;  %v7190_v29 = vshrl.u32 %v5091_v57, 16 }
 0x138   : > { %v1995_v28 = vsel %vm832_vm1, 0, %v1994_v50  ;;  %v2396_v16 = vpack.i.b16 %v2395_v8, %v2394_v18  ;;  %2527 = vst.msk [vmem:[%s5287_s27 + $0x20] sm:$0xf] %vm2518_vm2, %v2392_v14  ;;  %v1300_v14 = vrot.slane %v5385_v21, 4  ;;  %v5405_v8 = vperm.slane %v748_v20, %v5157_v43 }
 0x139   : > { %v2400_v62 = vpack.i.b16 %v1995_v28, %v1976_v7  ;;  %v2403_v34 = vshrl.u32 %v1995_v28, 16  ;;  %609 = vrot.lane.b32.xlu2 %v5336_v25, %s4883_s19  ;;  %577 = vrot.lane.b32.xlu1 %v5336_v25, %s4884_s20  ;;  %v7187_v18 = vshrl.u32 %v5161_v49, 16  ;;  %v884_v50 = vrot.slane %v883_v47, 4 }
 0x13a   : > { %2543 = vst.msk [vmem:[%s5287_s27 + $0x60] sm:$0xf] %vm2518_vm2, %v2396_v16  ;;  %545 = vrot.lane.b32.xlu0 %v5336_v25, %s4885_s23  ;;  %v887_v22 = vsel %vm832_vm1, %v883_v47, %v886_v12  ;;  %v912_v16 = vrot.slane %v904_v60, 4 }
 0x13b   : > { %v652_v37 = vpack.i.b16 %v651_v24, %v7187_v18  ;;  %v2404_v55 = vpack.i.b16 %v2403_v34, %v2402_v59  ;;  %2559 = vst.msk [vmem:[%s5287_s27 + $0xa0] sm:$0xf] %vm2518_vm2, %v2400_v62  ;;  %v5415_v28 = vpop.permute.xlu1 %537  ;;  %v895_v35 = vperm.slane %v887_v22, %v5172_v2  ;;  %v419_v18 = vpop.f32.mrf.mxu2  ;;  %v885_v59 = vsel %vm832_vm1, %v884_v50, %v878_v53 }
 0x13c   : > { %v552_v24 = vpop.permute.xlu0 %551  ;;  %v5423_v62 = vpack.c.bf16 %v477_v42, %v477_v42  ;;  %v5425_v34 = vpop.permute.xlu2 %603  ;;  %v891_v7 = vperm.slane %v885_v59, %v5172_v2  ;;  %v420_v53 = vadd.f32 %v4981_v13, %v419_v18  ;;  %v7188_v59 = vshrl.u32 %v5034_v36, 16 }
 0x13d   : > { %v909_v49 = vperm.slane %v652_v37, %v5157_v43  ;;  %2575 = vst.msk [vmem:[%s5287_s27 + $0xe0] sm:$0xf] %vm2518_vm2, %v2404_v55  ;;  %v739_v47 = vpack.i.b16 %v552_v24, %v5034_v36  ;;  %v741_v12 = vshrl.u32 %v552_v24, 16  ;;  %v898_v32 = vrot.slane %v895_v35, 4  ;;  %v478_v42 = vpop.f32.mrf.mxu1 }
 0x13e   : > { %v1326_v37 = vrot.slane %v5405_v8, 4  ;;  %v657_v55 = vshrl.u32 %v5415_v28, 16  ;;  %v896_v50 = vrot.slane %v891_v7, 4 }
 0x13f   : > { %v910_v20 = vrot.slane %v909_v49, 4  ;;  %v913_v22 = vsel %vm832_vm1, %v909_v49, %v912_v16  ;;  %v899_v26 = vsel %vm832_vm1, 0, %v898_v32  ;;  %v742_v35 = vpack.i.b16 %v741_v12, %v7188_v59 }
 0x140   : > { %v921_v52 = vperm.slane %v913_v22, %v5172_v2  ;;  %v1692_v49 = vsel %vm832_vm1, %v898_v32, %v891_v7  ;;  %v1697_v39 = vrot.slane %v899_v26, 4  ;;  %v897_v18 = vsel %vm832_vm1, 0, %v896_v50 }
 0x141   : > { %v911_v24 = vsel %vm832_vm1, %v910_v20, %v904_v60  ;;  %2659 = vrot.lane.b32.xlu1 %v5423_v62, %s4884_s20  ;;  %v655_v22 = vpack.i.b16 %v5415_v28, %v5053_v44  ;;  %v1294_v19 = vperm.slane %v739_v47, %v5157_v43  ;;  %v5447_v60 = vadd.f32 %v4990_v17, %v478_v42 }
 0x142   : > { %v917_v38 = vperm.slane %v911_v24, %v5172_v2  ;;  %v924_v16 = vrot.slane %v921_v52, 4  ;;  %2627 = vrot.lane.b32.xlu0 %v5423_v62, %s4885_s23  ;;  %v1698_v26 = vsel %vm832_vm1, %v1697_v39, %v897_v18  ;;  %v7189_v32 = vshrl.u32 %v5053_v44, 16 }
 0x143   : > { %v5455_v20 = vpop.permute.xlu1 %601  ;;  %v1696_v28 = vperm.slane %v1692_v49, %v5157_v43  ;;  %v1702_v47 = vperm.slane %v1698_v26, %v5157_v43  ;;  %v1301_v24 = vsel %vm832_vm1, %v1300_v14, %v1294_v19  ;;  %v1302_v59 = vrot.slane %v1294_v19, 4  ;;  %v421_v19 = vpop.f32.mrf.mxu2 }
 0x144   : > { %v922_v36 = vrot.slane %v917_v38, 4  ;;  %v925_v52 = vsel %vm832_vm1, 0, %v924_v16  ;;  %v658_v7 = vpack.i.b16 %v657_v55, %v7189_v32  ;;  %v1711_v12 = vsel %vm832_vm1, %v924_v16, %v917_v38 }
 0x145   : > { %v1716_v42 = vrot.slane %v925_v52, 4  ;;  %v1320_v1 = vperm.slane %v742_v35, %v5157_v43  ;;  %v1703_v39 = vrot.slane %v1702_v47, 4  ;;  %v1307_v55 = vperm.slane %v1301_v24, %v5172_v2  ;;  %v5471_v52 = vpop.permute.xlu2 %555 }
 0x146   : > { %v923_v50 = vsel %vm832_vm1, 0, %v922_v36  ;;  %v5465_v18 = vpack.c.bf16 %v420_v53, %v420_v53  ;;  %v1303_v38 = vsel %vm832_vm1, %v5385_v21, %v1302_v59  ;;  %v1715_v35 = vperm.slane %v1711_v12, %v5157_v43 }
 0x147   : > { %v1717_v44 = vsel %vm832_vm1, %v1716_v42, %v923_v50  ;;  %v1327_v16 = vsel %vm832_vm1, %v1326_v37, %v1320_v1  ;;  %v1328_v36 = vrot.slane %v1320_v1, 4  ;;  %v1704_v14 = vsel %vm832_vm1, %v1703_v39, %v1696_v28  ;;  %v2634_v42 = vpop.permute.xlu0 %2633 }
 0x148   : > { %v1721_v49 = vperm.slane %v1717_v44, %v5157_v43  ;;  %v1311_v26 = vperm.slane %v1303_v38, %v5172_v2  ;;  %v1312_v32 = vrot.slane %v1307_v55, 4  ;;  %561 = vrot.lane.b32.xlu2 %v5465_v18, %s4885_s23  ;;  %v1708_v53 = vperm.slane %v1704_v14, %v5172_v2 }
 0x149   : > { %v1329_v21 = vsel %vm832_vm1, %v5405_v8, %v1328_v36  ;;  %v1333_v1 = vperm.slane %v1327_v16, %v5172_v2  ;;  %625 = vrot.lane.b32.xlu1 %v5465_v18, %s4883_s19  ;;  %v5487_v50 = vadd.f32 %v4981_v13, %v421_v19  ;;  %v5493_v59 = vperm.slane %v655_v22, %v5157_v43 }
 0x14a   : > { %v1722_v47 = vrot.slane %v1721_v49, 4  ;;  %v1314_v28 = vrot.slane %v1311_v26, 4  ;;  %v1337_v12 = vperm.slane %v1329_v21, %v5172_v2  ;;  %593 = vrot.lane.b32.xlu0 %v5465_v18, %s4884_s20  ;;  %v1709_v24 = vrot.slane %v1708_v53, 4 }
 0x14b   : > { %v5496_v39 = vperm.slane %v658_v7, %v5157_v43  ;;  %v1313_v49 = vsel %vm832_vm1, 0, %v1312_v32  ;;  %v1338_v36 = vrot.slane %v1333_v1, 4  ;;  %v765_v14 = vshrl.u32 %v5471_v52, 16 }
 0x14c   : > { %v1723_v8 = vsel %vm832_vm1, %v1722_v47, %v1715_v35  ;;  %v1315_v38 = vsel %vm832_vm1, 0, %v1314_v28  ;;  %v1340_v13 = vrot.slane %v1337_v12, 4  ;;  %v1710_v16 = vsel %vm832_vm1, 0, %v1709_v24  ;;  %v5503_v35 = vpop.permute.xlu1 %553 }
 0x14d   : > { %v1727_v44 = vperm.slane %v1723_v8, %v5172_v2  ;;  %v2001_v19 = vrot.slane %v1315_v38, 4  ;;  %v2282_v7 = vshrl.u32 %v1708_v53, 16  ;;  %v1996_v32 = vsel %vm832_vm1, %v1314_v28, %v1307_v55  ;;  %v2638_v28 = vpop.permute.xlu2 %2637 }
 0x14e   : > { %v1341_v21 = vsel %vm832_vm1, 0, %v1340_v13  ;;  %v763_v24 = vpack.i.b16 %v5471_v52, %v5091_v57  ;;  %v2290_v37 = vshrl.u32 %v1710_v16, 16  ;;  %v766_v55 = vpack.i.b16 %v765_v14, %v7190_v29 }
 0x14f   : > { %v1728_v22 = vrot.slane %v1727_v44, 4  ;;  %v2280_v26 = vpack.i.b16 %v1727_v44, %v1708_v53  ;;  %v2283_v47 = vshrl.u32 %v1727_v44, 16  ;;  %v2002_v12 = vsel %vm832_vm1, %v2001_v19, %v1313_v49 }
 0x150   : > { %v2006_v53 = vperm.slane %v2002_v12, %v5157_v43  ;;  %v2020_v41 = vrot.slane %v1341_v21, 4  ;;  %v1339_v52 = vsel %vm832_vm1, 0, %v1338_v36  ;;  %v2000_v49 = vperm.slane %v1996_v32, %v5157_v43  ;;  %v570_v32 = vpop.permute.xlu0 %569 }
 0x151   : > { %v1729_v8 = vsel %vm832_vm1, 0, %v1728_v22  ;;  %v2284_v38 = vpack.i.b16 %v2283_v47, %v2282_v7  ;;  %2520 = vst.msk [vmem:[%s5287_s27 + $0x4] sm:$0xf] %vm2518_vm2, %v2280_v26  ;;  %547 = vrot.lane.b32.xlu1 %v5347_v46, %s4885_s23  ;;  %v2821_v22 = vpack.i.b16 %v2634_v42, %v5043_v40  ;;  %v2015_v57 = vsel %vm832_vm1, %v1340_v13, %v1333_v1  ;;  %v496_v26 = vpop.f32.mrf.mxu3 }
 0x152   : > { %v2288_v44 = vpack.i.b16 %v1729_v8, %v1710_v16  ;;  %v2291_v15 = vshrl.u32 %v1729_v8, 16  ;;  %v2007_v19 = vrot.slane %v2006_v53, 4  ;;  %611 = vrot.lane.b32.xlu0 %v5347_v46, %s4883_s19  ;;  %v2021_v29 = vsel %vm832_vm1, %v2020_v41, %v1339_v52 }
 0x153   : > { %2536 = vst.msk [vmem:[%s5287_s27 + $0x44] sm:$0xf] %vm2518_vm2, %v2284_v38  ;;  %v2823_v14 = vshrl.u32 %v2634_v42, 16  ;;  %v2025_v21 = vperm.slane %v2021_v29, %v5157_v43  ;;  %v5540_v41 = vperm.slane %v766_v55, %v5157_v43  ;;  %v5543_v1 = vperm.slane %v2821_v22, %v5157_v43 }
 0x154   : > { %v2292_v16 = vpack.i.b16 %v2291_v15, %v2290_v37  ;;  %2552 = vst.msk [vmem:[%s5287_s27 + $0x84] sm:$0xf] %vm2518_vm2, %v2288_v44  ;;  %v2008_v47 = vsel %vm832_vm1, %v2007_v19, %v2000_v49  ;;  %v5537_v37 = vperm.slane %v763_v24, %v5157_v43  ;;  %v2019_v42 = vperm.slane %v2015_v57, %v5157_v43  ;;  %v5555_v52 = vpop.permute.xlu1 %2635 }
 0x155   : > { %v2012_v15 = vperm.slane %v2008_v47, %v5172_v2  ;;  %7191 = vst [vmem:[#allocation12_spill] sm:$0xff] %v5543_v1  ;;  %v2026_v13 = vrot.slane %v2025_v21, 4  ;;  %v7192_v12 = vshrl.u32 %v5043_v40, 16  ;;  %v497_v38 = vadd.f32 %v4990_v17, %v496_v26 }
 0x156   : > { %2568 = vst.msk [vmem:[%s5287_s27 + $0xc4] sm:$0xf] %vm2518_vm2, %v2292_v16  ;;  %v5551_v44 = vpack.c.bf16 %v5447_v60, %v5447_v60  ;;  %v663_v24 = vshrl.u32 %v5455_v20, 16  ;;  %v2845_v55 = vpack.i.b16 %v2638_v28, %v5101_v63  ;;  %v5560_v19 = vpack.c.bf16 %v5487_v50, %v5487_v50 }
 0x157   : > { %v2824_v8 = vpack.i.b16 %v2823_v14, %v7192_v12  ;;  %v2013_v53 = vrot.slane %v2012_v15, 4  ;;  %v2027_v49 = vsel %vm832_vm1, %v2026_v13, %v2019_v42  ;;  %v5562_v22 = vpack.c.bf16 %v497_v38, %v497_v38  ;;  %v542_v12 = vpop.permute.xlu2 %541 }
 0x158   : > { %v2847_v17 = vshrl.u32 %v2638_v28, 16  ;;  %v2031_v16 = vperm.slane %v2027_v49, %v5172_v2  ;;  %v2410_v26 = vshrl.u32 %v2012_v15, 16  ;;  %v753_v28 = vshrl.u32 %v5503_v35, 16 }
 0x159   : > { %2629 = vrot.lane.b32.xlu1 %v5551_v44, %s4885_s23  ;;  %v2014_v14 = vsel %vm832_vm1, 0, %v2013_v53  ;;  %v5572_v50 = vperm.slane %v2824_v8, %v5157_v43  ;;  %2643 = vrot.lane.b32.xlu2 %v5562_v22, %s4885_s23  ;;  %v5580_v13 = vperm.slane %v2845_v55, %v5157_v43  ;;  %v7194_v8 = vshrl.u32 %v5101_v63, 16 }
 0x15a   : > { %563 = vrot.lane.b32.xlu0 %v5560_v19, %s4885_s23  ;;  %v2032_v47 = vrot.slane %v2031_v16, 4  ;;  %v2408_v21 = vpack.i.b16 %v2031_v16, %v2012_v15  ;;  %v2411_v42 = vshrl.u32 %v2031_v16, 16  ;;  %v751_v53 = vpack.i.b16 %v5503_v35, %v5064_v48 }
 0x15b   : > { %7193 = vst [vmem:[#allocation13_spill] sm:$0xff] %v5580_v13  ;;  %v2848_v38 = vpack.i.b16 %v2847_v17, %v7194_v8  ;;  %v661_v49 = vpack.i.b16 %v5455_v20, %v570_v32  ;;  %v662_v29 = vshrl.u32 %v570_v32, 16  ;;  %v2418_v15 = vshrl.u32 %v2014_v14, 16  ;;  %v5593_v8 = vpop.permute.xlu0 %2651 }
 0x15c   : > { %v2033_v57 = vsel %vm832_vm1, 0, %v2032_v47  ;;  %v2412_v60 = vpack.i.b16 %v2411_v42, %v2410_v26  ;;  %2528 = vst.msk [vmem:[%s5287_s27 + $0x24] sm:$0xf] %vm2518_vm2, %v2408_v21  ;;  %v7195_v55 = vshrl.u32 %v5064_v48, 16  ;;  %v679_v17 = vpack.i.b16 %v542_v12, %v5112_v3  ;;  %v540_v21 = vpop.permute.xlu1 %539 }
 0x15d   : > { %v2416_v7 = vpack.i.b16 %v2033_v57, %v2014_v14  ;;  %v2419_v36 = vshrl.u32 %v2033_v57, 16  ;;  %v664_v1 = vpack.i.b16 %v663_v24, %v662_v29  ;;  %v935_v32 = vperm.slane %v661_v49, %v5157_v43 }
 0x15e   : > { %v754_v16 = vpack.i.b16 %v753_v28, %v7195_v55  ;;  %2544 = vst.msk [vmem:[%s5287_s27 + $0x64] sm:$0xf] %vm2518_vm2, %v2412_v60  ;;  %v681_v26 = vshrl.u32 %v542_v12, 16  ;;  %v5603_v48 = vperm.slane %v751_v53, %v5157_v43  ;;  %v2835_v57 = vshrl.u32 %v5555_v52, 16 }
 0x15f   : > { %v2420_v47 = vpack.i.b16 %v2419_v36, %v2418_v15  ;;  %2560 = vst.msk [vmem:[%s5287_s27 + $0xa4] sm:$0xf] %vm2518_vm2, %v2416_v7  ;;  %v961_v24 = vperm.slane %v664_v1, %v5157_v43  ;;  %v5608_v60 = vperm.slane %v2848_v38, %v5157_v43  ;;  %v936_v14 = vrot.slane %v935_v32, 4 }
 0x160   : > { %v5611_v29 = vperm.slane %v754_v16, %v5157_v43  ;;  %v7197_v28 = vrot.slane %v5493_v59, 4  ;;  %v7198_v42 = vrot.slane %v5496_v39, 4  ;;  %v5627_v38 = vperm.slane %v679_v17, %v5157_v43 }
 0x161   : > { %7196 = vst [vmem:[#allocation14_spill] sm:$0xff] %v5608_v60  ;;  %595 = vrot.lane.b32.xlu1 %v5560_v19, %s4884_s20  ;;  %v962_v1 = vrot.slane %v961_v24, 4  ;;  %579 = vrot.lane.b32.xlu2 %v5347_v46, %s4884_s20  ;;  %v937_v53 = vsel %vm832_vm1, %v936_v14, %v5493_v59  ;;  %v7199_v15 = vshrl.u32 %v5112_v3, 16  ;;  %v2833_v16 = vpack.i.b16 %v5555_v52, %v5073_v51 }
 0x162   : > { %v939_v36 = vsel %vm832_vm1, %v935_v32, %v7197_v28  ;;  %2576 = vst.msk [vmem:[%s5287_s27 + $0xe4] sm:$0xf] %vm2518_vm2, %v2420_v47  ;;  %v965_v12 = vsel %vm832_vm1, %v961_v24, %v7198_v42  ;;  %v943_v32 = vperm.slane %v937_v53, %v5172_v2  ;;  %v7200_v17 = vshrl.u32 %v5073_v51, 16 }
 0x163   : > { %v947_v7 = vperm.slane %v939_v36, %v5172_v2  ;;  %v973_v49 = vperm.slane %v965_v12, %v5172_v2  ;;  %v682_v55 = vpack.i.b16 %v681_v26, %v7199_v15  ;;  %v963_v24 = vsel %vm832_vm1, %v962_v1, %v5496_v39  ;;  %v498_v12 = vpop.f32.mrf.mxu3  ;;  %v5658_v36 = vpop.permute.xlu2 %573 }
 0x164   : > { %v2836_v28 = vpack.i.b16 %v2835_v57, %v7200_v17  ;;  %v1354_v59 = vrot.slane %v5603_v48, 4  ;;  %v969_v14 = vperm.slane %v963_v24, %v5172_v2  ;;  %v948_v42 = vrot.slane %v943_v32, 4  ;;  %v618_v35 = vpop.permute.xlu0 %617  ;;  %v572_v26 = vpop.permute.xlu1 %571 }
 0x165   : > { %v950_v47 = vrot.slane %v947_v7, 4  ;;  %v976_v3 = vrot.slane %v973_v49, 4  ;;  %v5649_v57 = vperm.slane %v682_v55, %v5157_v43  ;;  %v5653_v49 = vperm.slane %v2833_v16, %v5157_v43  ;;  %v4874_v55 = vld [vmem:[%s7146_s4] ss:$0 sm:$0xff] }
 0x166   : > { %v974_v53 = vrot.slane %v969_v14, 4  ;;  %v949_v15 = vsel %vm832_vm1, 0, %v948_v42  ;;  %v5656_v24 = vperm.slane %v2836_v28, %v5157_v43  ;;  %v499_v42 = vadd.f32 %v4874_v55, %v498_v12 }
 0x167   : > { %v951_v52 = vsel %vm832_vm1, 0, %v950_v47  ;;  %v977_v39 = vsel %vm832_vm1, 0, %v976_v3  ;;  %v1730_v7 = vsel %vm832_vm1, %v950_v47, %v943_v32  ;;  %v7201_v55 = vshrl.u32 %v5082_v54, 16 }
 0x168   : > { %v1735_v1 = vrot.slane %v951_v52, 4  ;;  %v1754_v17 = vrot.slane %v977_v39, 4  ;;  %v975_v20 = vsel %vm832_vm1, 0, %v974_v53  ;;  %v1749_v39 = vsel %vm832_vm1, %v976_v3, %v969_v14 }
 0x169   : > { %2661 = vrot.lane.b32.xlu2 %v5551_v44, %s4884_s20  ;;  %v667_v53 = vpack.i.b16 %v540_v21, %v5082_v54  ;;  %v5673_v47 = vpack.c.bf16 %v499_v42, %v499_v42  ;;  %v1734_v12 = vperm.slane %v1730_v7, %v5157_v43  ;;  %v1753_v3 = vperm.slane %v1749_v39, %v5157_v43 }
 0x16a   : > { %v1736_v52 = vsel %vm832_vm1, %v1735_v1, %v949_v15  ;;  %v1755_v28 = vsel %vm832_vm1, %v1754_v17, %v975_v20  ;;  %v669_v1 = vshrl.u32 %v540_v21, 16  ;;  %v757_v15 = vpack.i.b16 %v618_v35, %v5325_v4 }
 0x16b   : > { %v1740_v16 = vperm.slane %v1736_v52, %v5157_v43  ;;  %v1759_v32 = vperm.slane %v1755_v28, %v5157_v43  ;;  %v5678_v14 = vperm.slane %v667_v53, %v5157_v43  ;;  %v759_v20 = vshrl.u32 %v618_v35, 16  ;;  %2645 = vrot.lane.b32.xlu0 %v5673_v47, %s4885_s23  ;;  %2677 = vrot.lane.b32.xlu1 %v5673_v47, %s4884_s20 }
 0x16c   : > { %v670_v60 = vpack.i.b16 %v669_v1, %v7201_v55  ;;  %v1351_v42 = vperm.slane %v757_v15, %v5157_v43  ;;  %v7202_v7 = vshrl.u32 %v5325_v4, 16  ;;  %v673_v35 = vpack.i.b16 %v5425_v34, %v572_v26 }
 0x16d   : > { %v1741_v52 = vrot.slane %v1740_v16, 4  ;;  %v1760_v17 = vrot.slane %v1759_v32, 4  ;;  %v674_v39 = vshrl.u32 %v572_v26, 16  ;;  %v990_v53 = vrot.slane %v5678_v14, 4 }
 0x16e   : > { %v760_v16 = vpack.i.b16 %v759_v20, %v7202_v7  ;;  %v1352_v32 = vrot.slane %v1351_v42, 4  ;;  %v1008_v15 = vperm.slane %v670_v60, %v5157_v43  ;;  %v1355_v55 = vsel %vm832_vm1, %v1351_v42, %v1354_v59  ;;  %v5706_v60 = vpop.permute.xlu2 %2655 }
 0x16f   : > { %v1742_v21 = vsel %vm832_vm1, %v1741_v52, %v1734_v12  ;;  %v1761_v54 = vsel %vm832_vm1, %v1760_v17, %v1753_v3  ;;  %v7203_v20 = vshrl.u32 %v5425_v34, 16  ;;  %v1363_v42 = vperm.slane %v1355_v55, %v5172_v2 }
 0x170   : > { %v1746_v28 = vperm.slane %v1742_v21, %v5172_v2  ;;  %v1765_v1 = vperm.slane %v1761_v54, %v5172_v2  ;;  %v1377_v12 = vperm.slane %v760_v16, %v5157_v43  ;;  %v1353_v26 = vsel %vm832_vm1, %v1352_v32, %v5603_v48 }
 0x171   : > { %v676_v3 = vpack.i.b16 %v7203_v20, %v674_v39  ;;  %v1359_v54 = vperm.slane %v1353_v26, %v5172_v2  ;;  %627 = vrot.lane.b32.xlu2 %v5560_v19, %s4883_s19  ;;  %v7204_v48 = vrot.slane %v5611_v29, 4  ;;  %v1366_v13 = vrot.slane %v1363_v42, 4 }
 0x172   : > { %v1747_v4 = vrot.slane %v1746_v28, 4  ;;  %v2298_v52 = vshrl.u32 %v1746_v28, 16  ;;  %v1766_v17 = vrot.slane %v1765_v1, 4  ;;  %v2296_v21 = vpack.i.b16 %v1765_v1, %v1746_v28 }
 0x173   : > { %v2299_v7 = vshrl.u32 %v1765_v1, 16  ;;  %v1378_v16 = vrot.slane %v1377_v12, 4  ;;  %v1381_v34 = vsel %vm832_vm1, %v1377_v12, %v7204_v48  ;;  %v1364_v1 = vrot.slane %v1359_v54, 4  ;;  %2675 = vrot.lane.b32.xlu0 %v5562_v22, %s4884_s20  ;;  %2683 = vrot.lane.b32.xlu1 %v5055_v45, %s4883_s19 }
 0x174   : > { %v1748_v59 = vsel %vm832_vm1, 0, %v1747_v4  ;;  %v1767_v39 = vsel %vm832_vm1, 0, %v1766_v17  ;;  %2521 = vst.msk [vmem:[%s5287_s27 + $0x8] sm:$0xf] %vm2518_vm2, %v2296_v21  ;;  %v1016_v55 = vrot.slane %v1008_v15, 4  ;;  %v987_v17 = vperm.slane %v673_v35, %v5157_v43 }
 0x175   : > { %v2300_v28 = vpack.i.b16 %v2299_v7, %v2298_v52  ;;  %v2306_v32 = vshrl.u32 %v1748_v59, 16  ;;  %v2304_v26 = vpack.i.b16 %v1767_v39, %v1748_v59  ;;  %v2307_v20 = vshrl.u32 %v1767_v39, 16  ;;  %v5733_v39 = vpop.permute.xlu0 %2621 }
 0x176   : > { %v1379_v4 = vsel %vm832_vm1, %v1378_v16, %v5611_v29  ;;  %v1389_v52 = vperm.slane %v1381_v34, %v5172_v2  ;;  %v1365_v29 = vsel %vm832_vm1, 0, %v1364_v1  ;;  %v1367_v7 = vsel %vm832_vm1, 0, %v1366_v13 }
 0x177   : > { %2537 = vst.msk [vmem:[%s5287_s27 + $0x48] sm:$0xf] %vm2518_vm2, %v2300_v28  ;;  %v1385_v12 = vperm.slane %v1379_v4, %v5172_v2  ;;  %v2308_v21 = vpack.i.b16 %v2307_v20, %v2306_v32  ;;  %v1013_v59 = vperm.slane %v676_v3, %v5157_v43  ;;  %v2039_v48 = vrot.slane %v1367_v7, 4 }
 0x178   : > { %2553 = vst.msk [vmem:[%s5287_s27 + $0x88] sm:$0xf] %vm2518_vm2, %v2304_v26  ;;  %v1392_v16 = vrot.slane %v1389_v52, 4  ;;  %v988_v34 = vrot.slane %v987_v17, 4  ;;  %v991_v35 = vsel %vm832_vm1, %v987_v17, %v990_v53  ;;  %v2034_v3 = vsel %vm832_vm1, %v1366_v13, %v1359_v54 }
 0x179   : > { %v1390_v42 = vrot.slane %v1385_v12, 4  ;;  %2569 = vst.msk [vmem:[%s5287_s27 + $0xc8] sm:$0xf] %vm2518_vm2, %v2308_v21  ;;  %v1014_v28 = vrot.slane %v1013_v59, 4  ;;  %v1017_v32 = vsel %vm832_vm1, %v1013_v59, %v1016_v55  ;;  %v2040_v20 = vsel %vm832_vm1, %v2039_v48, %v1365_v29  ;;  %2679 = vrot.lane.b32.xlu2 %v5002_v23, %s4883_s19  ;;  %v5749_v55 = vpop.permute.xlu1 %2653  ;;  %v5755_v29 = vpop.permute.xlu2 %621 }
 0x17a   : > { %v1393_v26 = vsel %vm832_vm1, 0, %v1392_v16  ;;  %v2044_v4 = vperm.slane %v2040_v20, %v5157_v43  ;;  %v2053_v52 = vsel %vm832_vm1, %v1392_v16, %v1385_v12  ;;  %v989_v53 = vsel %vm832_vm1, %v988_v34, %v5678_v14 }
 0x17b   : > { %v1391_v1 = vsel %vm832_vm1, 0, %v1390_v42  ;;  %v2058_v21 = vrot.slane %v1393_v26, 4  ;;  %v995_v17 = vperm.slane %v989_v53, %v5172_v2  ;;  %v999_v7 = vperm.slane %v991_v35, %v5172_v2  ;;  %2681 = vrot.lane.b32.xlu0 %v5025_v33, %s4883_s19  ;;  %2689 = vrot.lane.b32.xlu1 %v5201_v6, %s4883_s19 }
 0x17c   : > { %v1015_v13 = vsel %vm832_vm1, %v1014_v28, %v1008_v15  ;;  %v1025_v54 = vperm.slane %v1017_v32, %v5172_v2  ;;  %v2038_v23 = vperm.slane %v2034_v3, %v5157_v43  ;;  %v2045_v59 = vrot.slane %v2044_v4, 4 }
 0x17d   : > { %v2059_v12 = vsel %vm832_vm1, %v2058_v21, %v1391_v1  ;;  %v1021_v42 = vperm.slane %v1015_v13, %v5172_v2  ;;  %v1000_v15 = vrot.slane %v995_v17, 4  ;;  %v1002_v16 = vrot.slane %v999_v7, 4 }
 0x17e   : > { %v2063_v14 = vperm.slane %v2059_v12, %v5157_v43  ;;  %v1028_v48 = vrot.slane %v1025_v54, 4  ;;  %v2046_v35 = vsel %vm832_vm1, %v2045_v59, %v2038_v23  ;;  %v2057_v28 = vperm.slane %v2053_v52, %v5157_v43  ;;  %v588_v23 = vpop.permute.xlu0 %587 }
 0x17f   : > { %v1026_v32 = vrot.slane %v1021_v42, 4  ;;  %v2050_v1 = vperm.slane %v2046_v35, %v5172_v2  ;;  %v1001_v33 = vsel %vm832_vm1, 0, %v1000_v15  ;;  %v1003_v3 = vsel %vm832_vm1, 0, %v1002_v16 }
 0x180   : > { %v2064_v26 = vrot.slane %v2063_v14, 4  ;;  %v1029_v4 = vsel %vm832_vm1, 0, %v1028_v48  ;;  %v1773_v21 = vrot.slane %v1003_v3, 4  ;;  %v2751_v53 = vshrl.u32 %v5733_v39, 16 }
 0x181   : > { %v2051_v7 = vrot.slane %v2050_v1, 4  ;;  %v1027_v52 = vsel %vm832_vm1, 0, %v1026_v32  ;;  %v2749_v54 = vpack.i.b16 %v5733_v39, %v5103_v0  ;;  %2685 = vrot.lane.b32.xlu2 %v5103_v0, %s4883_s19  ;;  %v1768_v12 = vsel %vm832_vm1, %v1002_v16, %v995_v17 }
 0x182   : > { %v2065_v13 = vsel %vm832_vm1, %v2064_v26, %v2057_v28  ;;  %v1774_v14 = vsel %vm832_vm1, %v1773_v21, %v1001_v33  ;;  %v1792_v15 = vrot.slane %v1029_v4, 4  ;;  %v2426_v26 = vshrl.u32 %v2050_v1, 16 }
 0x183   : > { %v2069_v59 = vperm.slane %v2065_v13, %v5172_v2  ;;  %v2052_v28 = vsel %vm832_vm1, 0, %v2051_v7  ;;  %v1778_v32 = vperm.slane %v1774_v14, %v5157_v43  ;;  %v7205_v34 = vshrl.u32 %v5103_v0, 16  ;;  %v620_v13 = vpop.permute.xlu1 %619  ;;  %2687 = vrot.lane.b32.xlu0 %v5131_v10, %s4883_s19  ;;  %2695 = vrot.lane.b32.xlu1 %v5013_v27, %s4883_s19 }
 0x184   : > { %v1772_v17 = vperm.slane %v1768_v12, %v5157_v43  ;;  %v1787_v33 = vsel %vm832_vm1, %v1028_v48, %v1021_v42  ;;  %v1793_v4 = vsel %vm832_vm1, %v1792_v15, %v1027_v52  ;;  %v2434_v7 = vshrl.u32 %v2052_v28, 16 }
 0x185   : > { %v2070_v39 = vrot.slane %v2069_v59, 4  ;;  %v2424_v3 = vpack.i.b16 %v2069_v59, %v2050_v1  ;;  %v2427_v20 = vshrl.u32 %v2069_v59, 16  ;;  %v2752_v45 = vpack.i.b16 %v2751_v53, %v7205_v34  ;;  %v5795_v1 = vpop.permute.xlu2 %543 }
 0x186   : > { %v1779_v16 = vrot.slane %v1778_v32, 4  ;;  %v1797_v21 = vperm.slane %v1793_v4, %v5157_v43  ;;  %v5802_v53 = vperm.slane %v2749_v54, %v5157_v43  ;;  %v1791_v52 = vperm.slane %v1787_v33, %v5157_v43 }
 0x187   : > { %v2071_v0 = vsel %vm832_vm1, 0, %v2070_v39  ;;  %v2428_v34 = vpack.i.b16 %v2427_v20, %v2426_v26  ;;  %2529 = vst.msk [vmem:[%s5287_s27 + $0x28] sm:$0xf] %vm2518_vm2, %v2424_v3  ;;  %v5810_v12 = vperm.slane %v2752_v45, %v5157_v43  ;;  %v686_v14 = vshrl.u32 %v5658_v36, 16 }
 0x188   : > { %v2432_v27 = vpack.i.b16 %v2071_v0, %v2052_v28  ;;  %v2435_v59 = vshrl.u32 %v2071_v0, 16  ;;  %v1780_v42 = vsel %vm832_vm1, %v1779_v16, %v1772_v17  ;;  %v1798_v20 = vrot.slane %v1797_v21, 4 }
 0x189   : > { %2545 = vst.msk [vmem:[%s5287_s27 + $0x68] sm:$0xf] %vm2518_vm2, %v2428_v34  ;;  %v1784_v48 = vperm.slane %v1780_v42, %v5172_v2  ;;  %v770_v15 = vshrl.u32 %v588_v23, 16  ;;  %v769_v28 = vpack.i.b16 %v620_v13, %v588_v23  ;;  %2691 = vrot.lane.b32.xlu2 %v5423_v62, %s4883_s19  ;;  %v693_v39 = vshrl.u32 %v5795_v1, 16  ;;  %v5825_v23 = vpop.permute.xlu0 %2669 }
 0x18a   : > { %v2436_v54 = vpack.i.b16 %v2435_v59, %v2434_v7  ;;  %2561 = vst.msk [vmem:[%s5287_s27 + $0xa8] sm:$0xf] %vm2518_vm2, %v2432_v27  ;;  %v1799_v32 = vsel %vm832_vm1, %v1798_v20, %v1791_v52  ;;  %v771_v3 = vshrl.u32 %v620_v13, 16  ;;  %v783_v34 = vshrl.u32 %v5755_v29, 16 }
 0x18b   : > { %v1785_v26 = vrot.slane %v1784_v48, 4  ;;  %v1803_v17 = vperm.slane %v1799_v32, %v5172_v2  ;;  %v1403_v33 = vperm.slane %v769_v28, %v5157_v43  ;;  %v2314_v4 = vshrl.u32 %v1784_v48, 16  ;;  %2693 = vrot.lane.b32.xlu0 %v5551_v44, %s4883_s19  ;;  %2701 = vrot.lane.b32.xlu1 %v5101_v63, %s4883_s19  ;;  %v5841_v32 = vpop.permute.xlu1 %2623 }
 0x18c   : > { %2577 = vst.msk [vmem:[%s5287_s27 + $0xe8] sm:$0xf] %vm2518_vm2, %v2436_v54  ;;  %v772_v21 = vpack.i.b16 %v771_v3, %v770_v15  ;;  %v691_v42 = vpack.i.b16 %v5795_v1, %v5163_v56  ;;  %v7206_v52 = vshrl.u32 %v5163_v56, 16  ;;  %v7207_v15 = vrot.slane %v5537_v37, 4 }
 0x18d   : > { %v1786_v13 = vsel %vm832_vm1, 0, %v1785_v26  ;;  %v1804_v27 = vrot.slane %v1803_v17, 4  ;;  %v2312_v7 = vpack.i.b16 %v1803_v17, %v1784_v48  ;;  %v2315_v59 = vshrl.u32 %v1803_v17, 16  ;;  %v2626_v3 = vpop.permute.xlu2 %2625 }
 0x18e   : > { %v694_v20 = vpack.i.b16 %v693_v39, %v7206_v52  ;;  %v1404_v54 = vrot.slane %v1403_v33, 4  ;;  %v1407_v28 = vsel %vm832_vm1, %v1403_v33, %v7207_v15  ;;  %v1429_v1 = vperm.slane %v772_v21, %v5157_v43 }
 0x18f   : > { %v1805_v63 = vsel %vm832_vm1, 0, %v1804_v27  ;;  %v2316_v26 = vpack.i.b16 %v2315_v59, %v2314_v4  ;;  %2522 = vst.msk [vmem:[%s5287_s27 + $0xc] sm:$0xf] %vm2518_vm2, %v2312_v7  ;;  %v1415_v48 = vperm.slane %v1407_v28, %v5172_v2  ;;  %v2322_v39 = vshrl.u32 %v1786_v13, 16 }
 0x190   : > { %v2320_v56 = vpack.i.b16 %v1805_v63, %v1786_v13  ;;  %v2323_v17 = vshrl.u32 %v1805_v63, 16  ;;  %v1405_v52 = vsel %vm832_vm1, %v1404_v54, %v5537_v37  ;;  %v1430_v27 = vrot.slane %v1429_v1, 4 }
 0x191   : > { %2538 = vst.msk [vmem:[%s5287_s27 + $0x4c] sm:$0xf] %vm2518_vm2, %v2316_v26  ;;  %v1411_v33 = vperm.slane %v1405_v52, %v5172_v2  ;;  %v1418_v4 = vrot.slane %v1415_v48, 4  ;;  %v7208_v7 = vrot.slane %v5540_v41, 4  ;;  %2697 = vrot.lane.b32.xlu2 %v5043_v40, %s4883_s19  ;;  %v5861_v13 = vperm.slane %v691_v42, %v5157_v43 }
 0x192   : > { %v2324_v21 = vpack.i.b16 %v2323_v17, %v2322_v39  ;;  %2554 = vst.msk [vmem:[%s5287_s27 + $0x8c] sm:$0xf] %vm2518_vm2, %v2320_v56  ;;  %v2773_v54 = vpack.i.b16 %v2626_v3, %v5201_v6  ;;  %v5866_v15 = vperm.slane %v694_v20, %v5157_v43  ;;  %v1431_v26 = vsel %vm832_vm1, %v1430_v27, %v5540_v41  ;;  %v606_v17 = vpop.permute.xlu0 %605 }
 0x193   : > { %v1433_v59 = vsel %vm832_vm1, %v1429_v1, %v7208_v7  ;;  %v1416_v28 = vrot.slane %v1411_v33, 4  ;;  %v1419_v63 = vsel %vm832_vm1, 0, %v1418_v4  ;;  %v1437_v40 = vperm.slane %v1431_v26, %v5172_v2  ;;  %2699 = vrot.lane.b32.xlu0 %v5073_v51, %s4883_s19  ;;  %2707 = vrot.lane.b32.xlu1 %v5562_v22, %s4883_s19 }
 0x194   : > { %v1441_v37 = vperm.slane %v1433_v59, %v5172_v2  ;;  %2570 = vst.msk [vmem:[%s5287_s27 + $0xcc] sm:$0xf] %vm2518_vm2, %v2324_v21  ;;  %v2077_v42 = vrot.slane %v1419_v63, 4  ;;  %v2775_v1 = vshrl.u32 %v2626_v3, 16  ;;  %v2072_v39 = vsel %vm832_vm1, %v1418_v4, %v1411_v33 }
 0x195   : > { %v1417_v56 = vsel %vm832_vm1, 0, %v1416_v28  ;;  %v1442_v52 = vrot.slane %v1437_v40, 4  ;;  %v5885_v7 = vperm.slane %v2773_v54, %v5157_v43  ;;  %v1094_v51 = vrot.slane %v5861_v13, 4 }
 0x196   : > { %v1444_v48 = vrot.slane %v1441_v37, 4  ;;  %v2078_v3 = vsel %vm832_vm1, %v2077_v42, %v1417_v56  ;;  %v2076_v4 = vperm.slane %v2072_v39, %v5157_v43  ;;  %v7209_v28 = vshrl.u32 %v5201_v6, 16  ;;  %v590_v42 = vpop.permute.xlu1 %589 }
 0x197   : > { %v2082_v21 = vperm.slane %v2078_v3, %v5157_v43  ;;  %v1443_v33 = vsel %vm832_vm1, 0, %v1442_v52  ;;  %v685_v26 = vpack.i.b16 %v606_v17, %v5658_v36  ;;  %v687_v45 = vshrl.u32 %v606_v17, 16 }
 0x198   : > { %v1445_v27 = vsel %vm832_vm1, 0, %v1444_v48  ;;  %v2776_v63 = vpack.i.b16 %v2775_v1, %v7209_v28  ;;  %v2091_v54 = vsel %vm832_vm1, %v1444_v48, %v1437_v40  ;;  %v2763_v39 = vshrl.u32 %v5841_v32, 16 }
 0x199   : > { %v2096_v37 = vrot.slane %v1445_v27, 4  ;;  %v2083_v56 = vrot.slane %v2082_v21, 4  ;;  %2703 = vrot.lane.b32.xlu2 %v5214_v31, %s4883_s19  ;;  %v1039_v6 = vperm.slane %v685_v26, %v5157_v43  ;;  %v2761_v3 = vpack.i.b16 %v5841_v32, %v5131_v10 }
 0x19a   : > { %v688_v40 = vpack.i.b16 %v687_v45, %v686_v14  ;;  %v781_v48 = vpack.i.b16 %v5755_v29, %v590_v42  ;;  %v7210_v32 = vrot.slane %v5627_v38, 4  ;;  %v782_v45 = vshrl.u32 %v590_v42, 16 }
 0x19b   : > { %v2097_v41 = vsel %vm832_vm1, %v2096_v37, %v1443_v33  ;;  %v2084_v1 = vsel %vm832_vm1, %v2083_v56, %v2076_v4  ;;  %v1040_v37 = vrot.slane %v1039_v6, 4  ;;  %v5911_v33 = vpop.permute.xlu2 %591  ;;  %2705 = vrot.lane.b32.xlu0 %v5222_v9, %s4883_s19  ;;  %v5916_v4 = vperm.slane %v2776_v63, %v5157_v43 }
 0x19c   : > { %v2101_v27 = vperm.slane %v2097_v41, %v5157_v43  ;;  %v2088_v17 = vperm.slane %v2084_v1, %v5172_v2  ;;  %v2095_v41 = vperm.slane %v2091_v54, %v5157_v43  ;;  %v1043_v36 = vsel %vm832_vm1, %v1039_v6, %v7210_v32  ;;  %v558_v32 = vpop.permute.xlu0 %557 }
 0x19d   : > { %v1065_v14 = vperm.slane %v688_v40, %v5157_v43  ;;  %v7211_v56 = vshrl.u32 %v5131_v10, 16  ;;  %v1041_v63 = vsel %vm832_vm1, %v1040_v37, %v5627_v38  ;;  %v1051_v52 = vperm.slane %v1043_v36, %v5172_v2 }
 0x19e   : > { %v2102_v21 = vrot.slane %v2101_v27, 4  ;;  %v2089_v28 = vrot.slane %v2088_v17, 4  ;;  %v5926_v27 = vperm.slane %v781_v48, %v5157_v43  ;;  %v2442_v40 = vshrl.u32 %v2088_v17, 16 }
 0x19f   : > { %v2764_v54 = vpack.i.b16 %v2763_v39, %v7211_v56  ;;  %v1066_v6 = vrot.slane %v1065_v14, 4  ;;  %v7212_v10 = vrot.slane %v5649_v57, 4  ;;  %v784_v38 = vpack.i.b16 %v783_v34, %v782_v45 }
 0x1a0   : > { %v2103_v26 = vsel %vm832_vm1, %v2102_v21, %v2095_v41  ;;  %v2090_v42 = vsel %vm832_vm1, 0, %v2089_v28  ;;  %v1047_v41 = vperm.slane %v1041_v63, %v5172_v2  ;;  %v1054_v36 = vrot.slane %v1051_v52, 4 }
 0x1a1   : > { %v2107_v1 = vperm.slane %v2103_v26, %v5172_v2  ;;  %v1069_v39 = vsel %vm832_vm1, %v1065_v14, %v7212_v10  ;;  %2709 = vrot.lane.b32.xlu2 %v5673_v47, %s4883_s19  ;;  %v1067_v28 = vsel %vm832_vm1, %v1066_v6, %v5649_v57 }
 0x1a2   : > { %v1052_v37 = vrot.slane %v1047_v41, 4  ;;  %v1077_v56 = vperm.slane %v1069_v39, %v5172_v2  ;;  %v1073_v29 = vperm.slane %v1067_v28, %v5172_v2  ;;  %v1055_v52 = vsel %vm832_vm1, 0, %v1054_v36 }
 0x1a3   : > { %v2108_v48 = vrot.slane %v2107_v1, 4  ;;  %v2440_v21 = vpack.i.b16 %v2107_v1, %v2088_v17  ;;  %v2443_v26 = vshrl.u32 %v2107_v1, 16  ;;  %v2450_v17 = vshrl.u32 %v2090_v42, 16 }
 0x1a4   : > { %v1053_v1 = vsel %vm832_vm1, 0, %v1052_v37  ;;  %v1078_v57 = vrot.slane %v1073_v29, 4  ;;  %v1080_v6 = vrot.slane %v1077_v56, 4  ;;  %v1811_v10 = vrot.slane %v1055_v52, 4  ;;  %v2640_v52 = vpop.permute.xlu0 %2639 }
 0x1a5   : > { %v2109_v14 = vsel %vm832_vm1, 0, %v2108_v48  ;;  %v2444_v63 = vpack.i.b16 %v2443_v26, %v2442_v40  ;;  %2530 = vst.msk [vmem:[%s5287_s27 + $0x2c] sm:$0xf] %vm2518_vm2, %v2440_v21  ;;  %v1456_v39 = vrot.slane %v5926_v27, 4  ;;  %v1806_v48 = vsel %vm832_vm1, %v1054_v36, %v1047_v41  ;;  %v5958_v26 = vpop.permute.xlu2 %2673 }
 0x1a6   : > { %v2448_v34 = vpack.i.b16 %v2109_v14, %v2090_v42  ;;  %v2451_v45 = vshrl.u32 %v2109_v14, 16  ;;  %v1481_v42 = vperm.slane %v784_v38, %v5157_v43  ;;  %v775_v21 = vpack.i.b16 %v558_v32, %v5165_v61  ;;  %7213 = vst [vmem:[#allocation15_spill] sm:$0xff] %v5958_v26 }
 0x1a7   : > { %2546 = vst.msk [vmem:[%s5287_s27 + $0x6c] sm:$0xf] %vm2518_vm2, %v2444_v63  ;;  %v1079_v37 = vsel %vm832_vm1, 0, %v1078_v57  ;;  %v1081_v28 = vsel %vm832_vm1, 0, %v1080_v6  ;;  %v1812_v56 = vsel %vm832_vm1, %v1811_v10, %v1053_v1  ;;  %v1825_v14 = vsel %vm832_vm1, %v1080_v6, %v1073_v29  ;;  %v5964_v63 = vpop.permute.xlu1 %2671 }
 0x1a8   : > { %v2452_v40 = vpack.i.b16 %v2451_v45, %v2450_v17  ;;  %2562 = vst.msk [vmem:[%s5287_s27 + $0xac] sm:$0xf] %vm2518_vm2, %v2448_v34  ;;  %v5970_v38 = vperm.slane %v2761_v3, %v5157_v43  ;;  %v1816_v36 = vperm.slane %v1812_v56, %v5157_v43  ;;  %v1830_v17 = vrot.slane %v1081_v28, 4 }
 0x1a9   : > { %v5974_v34 = vperm.slane %v2764_v54, %v5157_v43  ;;  %v1810_v45 = vperm.slane %v1806_v48, %v5157_v43  ;;  %v777_v1 = vshrl.u32 %v558_v32, 16  ;;  %v1450_v29 = vperm.slane %v775_v21, %v5157_v43 }
 0x1aa   : > { %2578 = vst.msk [vmem:[%s5287_s27 + $0xec] sm:$0xf] %vm2518_vm2, %v2452_v40  ;;  %v1817_v57 = vrot.slane %v1816_v36, 4  ;;  %v1829_v6 = vperm.slane %v1825_v14, %v5157_v43  ;;  %v1831_v10 = vsel %vm832_vm1, %v1830_v17, %v1079_v37  ;;  %v1482_v40 = vrot.slane %v1481_v42, 4 }
 0x1ab   : > { %v1835_v3 = vperm.slane %v1831_v10, %v5157_v43  ;;  %v7214_v56 = vshrl.u32 %v5165_v61, 16  ;;  %v1457_v54 = vsel %vm832_vm1, %v1456_v39, %v1450_v29  ;;  %v1458_v41 = vrot.slane %v1450_v29, 4 }
 0x1ac   : > { %v1818_v48 = vsel %vm832_vm1, %v1817_v57, %v1810_v45  ;;  %v1463_v32 = vperm.slane %v1457_v54, %v5172_v2  ;;  %v2857_v21 = vpack.i.b16 %v2640_v52, %v5214_v31  ;;  %v2859_v36 = vshrl.u32 %v2640_v52, 16 }
 0x1ad   : > { %v778_v28 = vpack.i.b16 %v777_v1, %v7214_v56  ;;  %v1822_v14 = vperm.slane %v1818_v48, %v5172_v2  ;;  %v1836_v35 = vrot.slane %v1835_v3, 4  ;;  %v1459_v37 = vsel %vm832_vm1, %v5926_v27, %v1458_v41 }
 0x1ae   : > { %v1467_v45 = vperm.slane %v1459_v37, %v5172_v2  ;;  %v1468_v52 = vrot.slane %v1463_v32, 4  ;;  %v7215_v37 = vshrl.u32 %v5214_v31, 16 }
 0x1af   : > { %v1476_v17 = vperm.slane %v778_v28, %v5157_v43  ;;  %v1823_v29 = vrot.slane %v1822_v14, 4  ;;  %v1837_v57 = vsel %vm832_vm1, %v1836_v35, %v1829_v6  ;;  %v5999_v28 = vpop.permute.xlu2 %609  ;;  %v6006_v35 = vperm.slane %v2857_v21, %v5157_v43  ;;  %v608_v6 = vpop.permute.xlu1 %607 }
 0x1b0   : > { %v1841_v3 = vperm.slane %v1837_v57, %v5172_v2  ;;  %v1470_v56 = vrot.slane %v1467_v45, 4  ;;  %v2860_v39 = vpack.i.b16 %v2859_v36, %v7215_v37  ;;  %v2330_v45 = vshrl.u32 %v1822_v14, 16 }
 0x1b1   : > { %v1483_v10 = vsel %vm832_vm1, %v1482_v40, %v1476_v17  ;;  %v1484_v27 = vrot.slane %v1476_v17, 4  ;;  %v1824_v54 = vsel %vm832_vm1, 0, %v1823_v29  ;;  %v1469_v61 = vsel %vm832_vm1, 0, %v1468_v52 }
 0x1b2   : > { %v1489_v48 = vperm.slane %v1483_v10, %v5172_v2  ;;  %v1842_v40 = vrot.slane %v1841_v3, 4  ;;  %v2328_v57 = vpack.i.b16 %v1841_v3, %v1822_v14  ;;  %v2331_v17 = vshrl.u32 %v1841_v3, 16  ;;  %v576_v10 = vpop.permute.xlu0 %575 }
 0x1b3   : > { %v2338_v41 = vshrl.u32 %v1824_v54, 16  ;;  %v1471_v29 = vsel %vm832_vm1, 0, %v1470_v56  ;;  %v1485_v0 = vsel %vm832_vm1, %v1481_v42, %v1484_v27  ;;  %v2110_v3 = vsel %vm832_vm1, %v1470_v56, %v1463_v32 }
 0x1b4   : > { %v1843_v31 = vsel %vm832_vm1, 0, %v1842_v40  ;;  %v2332_v36 = vpack.i.b16 %v2331_v17, %v2330_v45  ;;  %2523 = vst.msk [vmem:[%s5287_s27 + $0x10] sm:$0xf] %vm2518_vm2, %v2328_v57  ;;  %v1493_v21 = vperm.slane %v1485_v0, %v5172_v2  ;;  %v1494_v37 = vrot.slane %v1489_v48, 4 }
 0x1b5   : > { %v2336_v14 = vpack.i.b16 %v1843_v31, %v1824_v54  ;;  %v2339_v16 = vshrl.u32 %v1843_v31, 16  ;;  %v2115_v52 = vrot.slane %v1471_v29, 4  ;;  %v699_v42 = vshrl.u32 %v608_v6, 16 }
 0x1b6   : > { %2539 = vst.msk [vmem:[%s5287_s27 + $0x50] sm:$0xf] %vm2518_vm2, %v2332_v36  ;;  %v1496_v20 = vrot.slane %v1493_v21, 4  ;;  %v697_v27 = vpack.i.b16 %v608_v6, %v576_v10  ;;  %v698_v1 = vshrl.u32 %v576_v10, 16  ;;  %v2114_v6 = vperm.slane %v2110_v3, %v5157_v43 }
 0x1b7   : > { %v2340_v59 = vpack.i.b16 %v2339_v16, %v2338_v41  ;;  %2555 = vst.msk [vmem:[%s5287_s27 + $0x90] sm:$0xf] %vm2518_vm2, %v2336_v14  ;;  %v2116_v40 = vsel %vm832_vm1, %v2115_v52, %v1469_v61  ;;  %v6030_v41 = vperm.slane %v2860_v39, %v5157_v43  ;;  %v1495_v17 = vsel %vm832_vm1, 0, %v1494_v37  ;;  %v562_v36 = vpop.permute.xlu2 %561 }
 0x1b8   : > { %v1497_v57 = vsel %vm832_vm1, 0, %v1496_v20  ;;  %v2120_v32 = vperm.slane %v2116_v40, %v5157_v43  ;;  %v2129_v56 = vsel %vm832_vm1, %v1496_v20, %v1489_v48  ;;  %v700_v45 = vpack.i.b16 %v699_v42, %v698_v1  ;;  %v6041_v48 = vpop.permute.xlu1 %559 }
 0x1b9   : > { %2571 = vst.msk [vmem:[%s5287_s27 + $0xd0] sm:$0xf] %vm2518_vm2, %v2340_v59  ;;  %v2134_v16 = vrot.slane %v1497_v57, 4  ;;  %v1091_v61 = vperm.slane %v697_v27, %v5157_v43  ;;  %v800_v31 = vshrl.u32 %v5465_v18, 16  ;;  %v2133_v20 = vperm.slane %v2129_v56, %v5157_v43 }
 0x1ba   : > { %v2121_v29 = vrot.slane %v2120_v32, 4  ;;  %v1117_v10 = vperm.slane %v700_v45, %v5157_v43  ;;  %v7216_v27 = vrot.slane %v5866_v15, 4 }
 0x1bb   : > { %v2135_v59 = vsel %vm832_vm1, %v2134_v16, %v1495_v17  ;;  %v1092_v1 = vrot.slane %v1091_v61, 4  ;;  %v1095_v39 = vsel %vm832_vm1, %v1091_v61, %v1094_v51  ;;  %v799_v51 = vpack.i.b16 %v562_v36, %v5465_v18  ;;  %v6059_v17 = vpop.permute.xlu0 %2657 }
 0x1bc   : > { %v2122_v21 = vsel %vm832_vm1, %v2121_v29, %v2114_v6  ;;  %v2139_v37 = vperm.slane %v2135_v59, %v5157_v43  ;;  %v1103_v14 = vperm.slane %v1095_v39, %v5172_v2  ;;  %v1118_v3 = vrot.slane %v1117_v10, 4 }
 0x1bd   : > { %v2126_v52 = vperm.slane %v2122_v21, %v5172_v2  ;;  %v1093_v42 = vsel %vm832_vm1, %v1092_v1, %v5861_v13  ;;  %v1121_v40 = vsel %vm832_vm1, %v1117_v10, %v7216_v27  ;;  %v788_v13 = vshrl.u32 %v5205_v11, 16 }
 0x1be   : > { %v2140_v57 = vrot.slane %v2139_v37, 4  ;;  %v1099_v32 = vperm.slane %v1093_v42, %v5172_v2  ;;  %v1106_v56 = vrot.slane %v1103_v14, 4  ;;  %v1119_v45 = vsel %vm832_vm1, %v1118_v3, %v5866_v15 }
 0x1bf   : > { %v2127_v6 = vrot.slane %v2126_v52, 4  ;;  %v1125_v16 = vperm.slane %v1119_v45, %v5172_v2  ;;  %v1129_v61 = vperm.slane %v1121_v40, %v5172_v2  ;;  %v801_v59 = vshrl.u32 %v562_v36, 16 }
 0x1c0   : > { %v2141_v29 = vsel %vm832_vm1, %v2140_v57, %v2133_v20  ;;  %v1104_v10 = vrot.slane %v1099_v32, 4  ;;  %v1107_v18 = vsel %vm832_vm1, 0, %v1106_v56  ;;  %v787_v15 = vpack.i.b16 %v6041_v48, %v5205_v11 }
 0x1c1   : > { %v2145_v1 = vperm.slane %v2141_v29, %v5172_v2  ;;  %v1130_v39 = vrot.slane %v1125_v16, 4  ;;  %v1132_v21 = vrot.slane %v1129_v61, 4  ;;  %v2458_v37 = vshrl.u32 %v2126_v52, 16 }
 0x1c2   : > { %v1105_v14 = vsel %vm832_vm1, 0, %v1104_v10  ;;  %v1849_v3 = vrot.slane %v1107_v18, 4  ;;  %v6068_v42 = vperm.slane %v799_v51, %v5157_v43  ;;  %v2128_v20 = vsel %vm832_vm1, 0, %v2127_v6  ;;  %v2642_v18 = vpop.permute.xlu1 %2641 }
 0x1c3   : > { %v2146_v27 = vrot.slane %v2145_v1, 4  ;;  %v2456_v40 = vpack.i.b16 %v2145_v1, %v2126_v52  ;;  %v2459_v36 = vshrl.u32 %v2145_v1, 16  ;;  %v1133_v57 = vsel %vm832_vm1, 0, %v1132_v21  ;;  %v2644_v52 = vpop.permute.xlu2 %2643 }
 0x1c4   : > { %v1844_v45 = vsel %vm832_vm1, %v1106_v56, %v1099_v32  ;;  %v1850_v61 = vsel %vm832_vm1, %v1849_v3, %v1105_v14  ;;  %v802_v11 = vpack.i.b16 %v801_v59, %v800_v31  ;;  %v1131_v51 = vsel %vm832_vm1, 0, %v1130_v39 }
 0x1c5   : > { %v2147_v29 = vsel %vm832_vm1, 0, %v2146_v27  ;;  %v2460_v10 = vpack.i.b16 %v2459_v36, %v2458_v37  ;;  %2531 = vst.msk [vmem:[%s5287_s27 + $0x30] sm:$0xf] %vm2518_vm2, %v2456_v40  ;;  %v1854_v6 = vperm.slane %v1850_v61, %v5157_v43  ;;  %v2466_v54 = vshrl.u32 %v2128_v20, 16 }
 0x1c6   : > { %v2464_v1 = vpack.i.b16 %v2147_v29, %v2128_v20  ;;  %v2467_v0 = vshrl.u32 %v2147_v29, 16  ;;  %v1868_v26 = vrot.slane %v1133_v57, 4  ;;  %v1848_v31 = vperm.slane %v1844_v45, %v5157_v43 }
 0x1c7   : > { %2547 = vst.msk [vmem:[%s5287_s27 + $0x70] sm:$0xf] %vm2518_vm2, %v2460_v10  ;;  %v1855_v32 = vrot.slane %v1854_v6, 4  ;;  %v1863_v56 = vsel %vm832_vm1, %v1132_v21, %v1125_v16  ;;  %v789_v59 = vshrl.u32 %v6041_v48, 16  ;;  %v6089_v3 = vperm.slane %v802_v11, %v5157_v43  ;;  %v624_v16 = vpop.permute.xlu0 %623 }
 0x1c8   : > { %v2468_v37 = vpack.i.b16 %v2467_v0, %v2466_v54  ;;  %2563 = vst.msk [vmem:[%s5287_s27 + $0xb0] sm:$0xf] %vm2518_vm2, %v2464_v1  ;;  %v1869_v14 = vsel %vm832_vm1, %v1868_v26, %v1131_v51  ;;  %v1502_v36 = vperm.slane %v787_v15, %v5157_v43  ;;  %v711_v0 = vshrl.u32 %v5999_v28, 16 }
 0x1c9   : > { %v1856_v20 = vsel %vm832_vm1, %v1855_v32, %v1848_v31  ;;  %v1873_v27 = vperm.slane %v1869_v14, %v5157_v43  ;;  %v790_v40 = vpack.i.b16 %v789_v59, %v788_v13  ;;  %v1867_v48 = vperm.slane %v1863_v56, %v5157_v43 }
 0x1ca   : > { %2579 = vst.msk [vmem:[%s5287_s27 + $0xf0] sm:$0xf] %vm2518_vm2, %v2468_v37  ;;  %v1860_v54 = vperm.slane %v1856_v20, %v5172_v2  ;;  %v1562_v26 = vrot.slane %v6068_v42, 4  ;;  %v2881_v45 = vpack.i.b16 %v2644_v52, %v5562_v22  ;;  %v2883_v13 = vshrl.u32 %v2644_v52, 16 }
 0x1cb   : > { %v1874_v21 = vrot.slane %v1873_v27, 4  ;;  %v6101_v57 = vperm.slane %v790_v40, %v5157_v43  ;;  %v2871_v29 = vshrl.u32 %v2642_v18, 16  ;;  %v1510_v51 = vrot.slane %v1502_v36, 4  ;;  %v6117_v27 = vpop.permute.xlu2 %579 }
 0x1cc   : > { %v1861_v61 = vrot.slane %v1860_v54, 4  ;;  %v2882_v6 = vshrl.u32 %v5562_v22, 16  ;;  %v2869_v1 = vpack.i.b16 %v2642_v18, %v5222_v9  ;;  %v2346_v56 = vshrl.u32 %v1860_v54, 16  ;;  %v578_v22 = vpop.permute.xlu1 %577 }
 0x1cd   : > { %v1875_v10 = vsel %vm832_vm1, %v1874_v21, %v1867_v48  ;;  %v2870_v52 = vshrl.u32 %v5222_v9, 16  ;;  %v1536_v59 = vrot.slane %v6101_v57, 4  ;;  %v6114_v14 = vperm.slane %v2881_v45, %v5157_v43 }
 0x1ce   : > { %v1862_v31 = vsel %vm832_vm1, 0, %v1861_v61  ;;  %v1879_v32 = vperm.slane %v1875_v10, %v5172_v2  ;;  %v2884_v37 = vpack.i.b16 %v2883_v13, %v2882_v6  ;;  %v793_v20 = vpack.i.b16 %v624_v16, %v5911_v33 }
 0x1cf   : > { %v6119_v21 = vpack.i.b16 %v2871_v29, %v2870_v52  ;;  %v2354_v61 = vshrl.u32 %v1862_v31, 16  ;;  %v6122_v9 = vperm.slane %v2869_v1, %v5157_v43  ;;  %v795_v10 = vshrl.u32 %v624_v16, 16  ;;  %v546_v1 = vpop.permute.xlu0 %545 }
 0x1d0   : > { %v1880_v18 = vrot.slane %v1879_v32, 4  ;;  %v2344_v40 = vpack.i.b16 %v1879_v32, %v1860_v54  ;;  %v2347_v48 = vshrl.u32 %v1879_v32, 16  ;;  %v1507_v13 = vperm.slane %v793_v20, %v5157_v43 }
 0x1d1   : > { %v709_v11 = vpack.i.b16 %v5999_v28, %v578_v22  ;;  %v710_v54 = vshrl.u32 %v578_v22, 16  ;;  %v7217_v29 = vshrl.u32 %v5911_v33, 16 }
 0x1d2   : > { %v1881_v45 = vsel %vm832_vm1, 0, %v1880_v18  ;;  %v2348_v6 = vpack.i.b16 %v2347_v48, %v2346_v56  ;;  %2524 = vst.msk [vmem:[%s5287_s27 + $0x14] sm:$0xf] %vm2518_vm2, %v2344_v40  ;;  %v1508_v15 = vrot.slane %v1507_v13, 4  ;;  %v1511_v16 = vsel %vm832_vm1, %v1507_v13, %v1510_v51 }
 0x1d3   : > { %v2352_v32 = vpack.i.b16 %v1881_v45, %v1862_v31  ;;  %v2355_v39 = vshrl.u32 %v1881_v45, 16  ;;  %v796_v52 = vpack.i.b16 %v795_v10, %v7217_v29  ;;  %v712_v20 = vpack.i.b16 %v711_v0, %v710_v54  ;;  %v6156_v29 = vpop.permute.xlu2 %2661 }
 0x1d4   : > { %2540 = vst.msk [vmem:[%s5287_s27 + $0x54] sm:$0xf] %vm2518_vm2, %v2348_v6  ;;  %v1143_v56 = vperm.slane %v709_v11, %v5157_v43  ;;  %v704_v18 = vshrl.u32 %v5336_v25, 16  ;;  %v1509_v28 = vsel %vm832_vm1, %v1508_v15, %v1502_v36  ;;  %v1519_v33 = vperm.slane %v1511_v16, %v5172_v2 }
 0x1d5   : > { %v2356_v40 = vpack.i.b16 %v2355_v39, %v2354_v61  ;;  %2556 = vst.msk [vmem:[%s5287_s27 + $0x94] sm:$0xf] %vm2518_vm2, %v2352_v32  ;;  %v1533_v31 = vperm.slane %v796_v52, %v5157_v43  ;;  %v1515_v22 = vperm.slane %v1509_v28, %v5172_v2  ;;  %v1169_v10 = vperm.slane %v712_v20, %v5157_v43 }
 0x1d6   : > { %v1144_v48 = vrot.slane %v1143_v56, 4  ;;  %v703_v0 = vpack.i.b16 %v546_v1, %v5336_v25  ;;  %v1522_v11 = vrot.slane %v1519_v33, 4  ;;  %v705_v61 = vshrl.u32 %v546_v1, 16 }
 0x1d7   : > { %2572 = vst.msk [vmem:[%s5287_s27 + $0xd4] sm:$0xf] %vm2518_vm2, %v2356_v40  ;;  %v1534_v51 = vrot.slane %v1533_v31, 4  ;;  %v1537_v39 = vsel %vm832_vm1, %v1533_v31, %v1536_v59  ;;  %v1520_v15 = vrot.slane %v1515_v22, 4  ;;  %v6151_v6 = vperm.slane %v2884_v37, %v5157_v43 }
 0x1d8   : > { %v1545_v13 = vperm.slane %v1537_v39, %v5172_v2  ;;  %v1138_v45 = vperm.slane %v703_v0, %v5157_v43  ;;  %v1523_v54 = vsel %vm832_vm1, 0, %v1522_v11  ;;  %v706_v32 = vpack.i.b16 %v705_v61, %v704_v18 }
 0x1d9   : > { %v1535_v25 = vsel %vm832_vm1, %v1534_v51, %v6101_v57  ;;  %v1521_v59 = vsel %vm832_vm1, 0, %v1520_v15  ;;  %v1170_v16 = vrot.slane %v1169_v10, 4  ;;  %v2153_v20 = vrot.slane %v1523_v54, 4 }
 0x1da   : > { %v1541_v52 = vperm.slane %v1535_v25, %v5172_v2  ;;  %v1548_v1 = vrot.slane %v1545_v13, 4  ;;  %v1145_v40 = vsel %vm832_vm1, %v1144_v48, %v1138_v45  ;;  %v1146_v28 = vrot.slane %v1138_v45, 4 }
 0x1db   : > { %v1164_v37 = vperm.slane %v706_v32, %v5157_v43  ;;  %v2148_v57 = vsel %vm832_vm1, %v1522_v11, %v1515_v22  ;;  %v1151_v18 = vperm.slane %v1145_v40, %v5172_v2  ;;  %v2154_v51 = vsel %vm832_vm1, %v2153_v20, %v1521_v59  ;;  %v6175_v32 = vpop.permute.xlu1 %2659  ;;  %v6177_v59 = vpop.permute.xlu0 %2627 }
 0x1dc   : > { %v1546_v33 = vrot.slane %v1541_v52, 4  ;;  %v1549_v31 = vsel %vm832_vm1, 0, %v1548_v1  ;;  %v1147_v61 = vsel %vm832_vm1, %v1143_v56, %v1146_v28  ;;  %v2158_v48 = vperm.slane %v2154_v51, %v5157_v43 }
 0x1dd   : > { %v2172_v39 = vrot.slane %v1549_v31, 4  ;;  %v2167_v13 = vsel %vm832_vm1, %v1548_v1, %v1541_v52  ;;  %v1155_v45 = vperm.slane %v1147_v61, %v5172_v2  ;;  %v2152_v54 = vperm.slane %v2148_v57, %v5157_v43  ;;  %v6184_v57 = vpop.permute.xlu2 %627 }
 0x1de   : > { %v1547_v15 = vsel %vm832_vm1, 0, %v1546_v33  ;;  %v1171_v11 = vsel %vm832_vm1, %v1170_v16, %v1164_v37  ;;  %v1172_v25 = vrot.slane %v1164_v37, 4  ;;  %v2159_v56 = vrot.slane %v2158_v48, 4 }
 0x1df   : > { %v2173_v22 = vsel %vm832_vm1, %v2172_v39, %v1547_v15  ;;  %v1156_v40 = vrot.slane %v1151_v18, 4  ;;  %v1158_v28 = vrot.slane %v1155_v45, 4  ;;  %v2171_v52 = vperm.slane %v2167_v13, %v5157_v43 }
 0x1e0   : > { %v2177_v20 = vperm.slane %v2173_v22, %v5157_v43  ;;  %v722_v1 = vshrl.u32 %v6117_v27, 16  ;;  %v1173_v33 = vsel %vm832_vm1, %v1169_v10, %v1172_v25  ;;  %v1177_v31 = vperm.slane %v1171_v11, %v5172_v2 }
 0x1e1   : > { %v2160_v16 = vsel %vm832_vm1, %v2159_v56, %v2152_v54  ;;  %v1159_v51 = vsel %vm832_vm1, 0, %v1158_v28  ;;  %v1181_v39 = vperm.slane %v1173_v33, %v5172_v2  ;;  %v1882_v48 = vsel %vm832_vm1, %v1158_v28, %v1151_v18 }
 0x1e2   : > { %v2178_v37 = vrot.slane %v2177_v20, 4  ;;  %v2164_v61 = vperm.slane %v2160_v16, %v5172_v2  ;;  %v1182_v15 = vrot.slane %v1177_v31, 4  ;;  %v1887_v13 = vrot.slane %v1159_v51, 4 }
 0x1e3   : > { %v1157_v10 = vsel %vm832_vm1, 0, %v1156_v40  ;;  %v1184_v22 = vrot.slane %v1181_v39, 4  ;;  %v1886_v56 = vperm.slane %v1882_v48, %v5157_v43  ;;  %v2785_v20 = vpack.i.b16 %v6177_v59, %v5423_v62 }
 0x1e4   : > { %v2179_v45 = vsel %vm832_vm1, %v2178_v37, %v2171_v52  ;;  %v2165_v25 = vrot.slane %v2164_v61, 4  ;;  %v2474_v33 = vshrl.u32 %v2164_v61, 16  ;;  %v1183_v18 = vsel %vm832_vm1, 0, %v1182_v15 }
 0x1e5   : > { %v2183_v54 = vperm.slane %v2179_v45, %v5172_v2  ;;  %v1185_v28 = vsel %vm832_vm1, 0, %v1184_v22  ;;  %v1888_v52 = vsel %vm832_vm1, %v1887_v13, %v1157_v10  ;;  %v1901_v48 = vsel %vm832_vm1, %v1184_v22, %v1177_v31  ;;  %v594_v10 = vpop.permute.xlu0 %593 }
 0x1e6   : > { %v2166_v40 = vsel %vm832_vm1, 0, %v2165_v25  ;;  %v1892_v39 = vperm.slane %v1888_v52, %v5157_v43  ;;  %v1906_v45 = vrot.slane %v1185_v28, 4  ;;  %v2787_v0 = vshrl.u32 %v6177_v59, 16 }
 0x1e7   : > { %v2184_v16 = vrot.slane %v2183_v54, 4  ;;  %v2472_v37 = vpack.i.b16 %v2183_v54, %v2164_v61  ;;  %v2475_v51 = vshrl.u32 %v2183_v54, 16  ;;  %v2482_v11 = vshrl.u32 %v2166_v40, 16  ;;  %v626_v61 = vpop.permute.xlu1 %625 }
 0x1e8   : > { %v6209_v13 = vperm.slane %v2785_v20, %v5157_v43  ;;  %v1893_v52 = vrot.slane %v1892_v39, 4  ;;  %v1907_v31 = vsel %vm832_vm1, %v1906_v45, %v1183_v18  ;;  %v1905_v59 = vperm.slane %v1901_v48, %v5157_v43  ;;  %v2680_v20 = vpop.permute.xlu2 %2679 }
 0x1e9   : > { %v2185_v36 = vsel %vm832_vm1, 0, %v2184_v16  ;;  %v2476_v15 = vpack.i.b16 %v2475_v51, %v2474_v33  ;;  %2532 = vst.msk [vmem:[%s5287_s27 + $0x34] sm:$0xf] %vm2518_vm2, %v2472_v37  ;;  %v1911_v22 = vperm.slane %v1907_v31, %v5157_v43  ;;  %v2792_v33 = vshrl.u32 %v6175_v32, 16 }
 0x1ea   : > { %v2480_v25 = vpack.i.b16 %v2185_v36, %v2166_v40  ;;  %v2483_v54 = vshrl.u32 %v2185_v36, 16  ;;  %v2786_v28 = vshrl.u32 %v5423_v62, 16  ;;  %v1894_v36 = vsel %vm832_vm1, %v1893_v52, %v1886_v56 }
 0x1eb   : > { %2548 = vst.msk [vmem:[%s5287_s27 + $0x74] sm:$0xf] %vm2518_vm2, %v2476_v15  ;;  %v807_v40 = vshrl.u32 %v626_v61, 16  ;;  %v805_v37 = vpack.i.b16 %v626_v61, %v594_v10  ;;  %v1898_v18 = vperm.slane %v1894_v36, %v5172_v2  ;;  %v1912_v51 = vrot.slane %v1911_v22, 4 }
 0x1ec   : > { %v2484_v16 = vpack.i.b16 %v2483_v54, %v2482_v11  ;;  %2564 = vst.msk [vmem:[%s5287_s27 + $0xb4] sm:$0xf] %vm2518_vm2, %v2480_v25  ;;  %v6222_v39 = vpack.i.b16 %v2787_v0, %v2786_v28  ;;  %v806_v48 = vshrl.u32 %v594_v10, 16  ;;  %v3227_v45 = vrot.slane %v6209_v13, 4 }
 0x1ed   : > { %v1559_v62 = vperm.slane %v805_v37, %v5157_v43  ;;  %v2719_v11 = vpack.i.b16 %v2680_v20, %v5199_v5  ;;  %v2721_v15 = vshrl.u32 %v2680_v20, 16  ;;  %v1899_v25 = vrot.slane %v1898_v18, 4 }
 0x1ee   : > { %2580 = vst.msk [vmem:[%s5287_s27 + $0xf4] sm:$0xf] %vm2518_vm2, %v2484_v16  ;;  %v1913_v56 = vsel %vm832_vm1, %v1912_v51, %v1905_v59  ;;  %v808_v54 = vpack.i.b16 %v807_v40, %v806_v48  ;;  %v716_v61 = vshrl.u32 %v5347_v46, 16  ;;  %v2362_v0 = vshrl.u32 %v1898_v18, 16 }
 0x1ef   : > { %v1917_v52 = vperm.slane %v1913_v56, %v5172_v2  ;;  %v1560_v31 = vrot.slane %v1559_v62, 4  ;;  %v1563_v10 = vsel %vm832_vm1, %v1559_v62, %v1562_v26  ;;  %v1900_v22 = vsel %vm832_vm1, 0, %v1899_v25 }
 0x1f0   : > { %v1571_v28 = vperm.slane %v1563_v10, %v5172_v2  ;;  %v1585_v20 = vperm.slane %v808_v54, %v5157_v43  ;;  %v2912_v59 = vperm.slane %v2719_v11, %v5157_v43  ;;  %v2370_v37 = vshrl.u32 %v1900_v22, 16 }
 0x1f1   : > { %v1918_v16 = vrot.slane %v1917_v52, 4  ;;  %v2360_v36 = vpack.i.b16 %v1917_v52, %v1898_v18  ;;  %v2363_v40 = vshrl.u32 %v1917_v52, 16  ;;  %v1561_v51 = vsel %vm832_vm1, %v1560_v31, %v6068_v42 }
 0x1f2   : > { %v1574_v48 = vrot.slane %v1571_v28, 4  ;;  %v1586_v56 = vrot.slane %v1585_v20, 4  ;;  %v7218_v26 = vrot.slane %v6089_v3, 4  ;;  %v1567_v18 = vperm.slane %v1561_v51, %v5172_v2 }
 0x1f3   : > { %v1919_v25 = vsel %vm832_vm1, 0, %v1918_v16  ;;  %v2364_v54 = vpack.i.b16 %v2363_v40, %v2362_v0  ;;  %2525 = vst.msk [vmem:[%s5287_s27 + $0x18] sm:$0xf] %vm2518_vm2, %v2360_v36 }
 0x1f4   : > { %v1589_v62 = vsel %vm832_vm1, %v1585_v20, %v7218_v26  ;;  %v2368_v52 = vpack.i.b16 %v1919_v25, %v1900_v22  ;;  %v2371_v10 = vshrl.u32 %v1919_v25, 16  ;;  %v1575_v42 = vsel %vm832_vm1, 0, %v1574_v48 }
 0x1f5   : > { %v1597_v11 = vperm.slane %v1589_v62, %v5172_v2  ;;  %v1587_v31 = vsel %vm832_vm1, %v1586_v56, %v6089_v3  ;;  %2541 = vst.msk [vmem:[%s5287_s27 + $0x58] sm:$0xf] %vm2518_vm2, %v2364_v54  ;;  %v1572_v28 = vrot.slane %v1567_v18, 4  ;;  %v2186_v16 = vsel %vm832_vm1, %v1574_v48, %v1567_v18  ;;  %v548_v54 = vpop.permute.xlu1 %547 }
 0x1f6   : > { %v1593_v20 = vperm.slane %v1587_v31, %v5172_v2  ;;  %v2372_v36 = vpack.i.b16 %v2371_v10, %v2370_v37  ;;  %2557 = vst.msk [vmem:[%s5287_s27 + $0x98] sm:$0xf] %vm2518_vm2, %v2368_v52  ;;  %v2191_v40 = vrot.slane %v1575_v42, 4  ;;  %v7219_v22 = vshrl.u32 %v5199_v5, 16 }
 0x1f7   : > { %v1600_v0 = vrot.slane %v1597_v11, 4  ;;  %v2913_v26 = vrot.slane %v2912_v59, 4  ;;  %v1573_v62 = vsel %vm832_vm1, 0, %v1572_v28  ;;  %v2190_v25 = vperm.slane %v2186_v16, %v5157_v43 }
 0x1f8   : > { %v2722_v51 = vpack.i.b16 %v2721_v15, %v7219_v22  ;;  %v1598_v3 = vrot.slane %v1593_v20, 4  ;;  %2573 = vst.msk [vmem:[%s5287_s27 + $0xd8] sm:$0xf] %vm2518_vm2, %v2372_v36  ;;  %v2192_v48 = vsel %vm832_vm1, %v2191_v40, %v1573_v62  ;;  %v7220_v52 = vrot.slane %v5254_v58, 4 }
 0x1f9   : > { %v1601_v56 = vsel %vm832_vm1, 0, %v1600_v0  ;;  %v2205_v37 = vsel %vm832_vm1, %v1600_v0, %v1593_v20  ;;  %v2914_v5 = vsel %vm832_vm1, %v2913_v26, %v5254_v58  ;;  %v2196_v11 = vperm.slane %v2192_v48, %v5157_v43 }
 0x1fa   : > { %v2210_v18 = vrot.slane %v1601_v56, 4  ;;  %v1599_v15 = vsel %vm832_vm1, 0, %v1598_v3  ;;  %v2916_v10 = vsel %vm832_vm1, %v2912_v59, %v7220_v52  ;;  %v2920_v42 = vperm.slane %v2914_v5, %v5172_v2 }
 0x1fb   : > { %v2924_v28 = vperm.slane %v2916_v10, %v5172_v2  ;;  %v2938_v20 = vperm.slane %v2722_v51, %v5157_v43  ;;  %v715_v0 = vpack.i.b16 %v548_v54, %v5347_v46  ;;  %v2197_v16 = vrot.slane %v2196_v11, 4 }
 0x1fc   : > { %v2211_v31 = vsel %vm832_vm1, %v2210_v18, %v1599_v15  ;;  %v2209_v36 = vperm.slane %v2205_v37, %v5157_v43  ;;  %v2925_v22 = vrot.slane %v2920_v42, 4  ;;  %v7221_v59 = vrot.slane %v5297_v30, 4 }
 0x1fd   : > { %v2215_v40 = vperm.slane %v2211_v31, %v5157_v43  ;;  %v2927_v26 = vrot.slane %v2924_v28, 4  ;;  %v2939_v58 = vrot.slane %v2938_v20, 4  ;;  %v717_v3 = vshrl.u32 %v548_v54, 16 }
 0x1fe   : > { %v2942_v62 = vsel %vm832_vm1, %v2938_v20, %v7221_v59  ;;  %v2198_v56 = vsel %vm832_vm1, %v2197_v16, %v2190_v25  ;;  %v6287_v18 = vperm.slane %v715_v0, %v5157_v43  ;;  %v2926_v54 = vsel %vm832_vm1, 0, %v2925_v22 }
 0x1ff   : > { %v2216_v48 = vrot.slane %v2215_v40, 4  ;;  %v2950_v51 = vperm.slane %v2942_v62, %v5172_v2  ;;  %v2202_v37 = vperm.slane %v2198_v56, %v5172_v2  ;;  %v2928_v5 = vsel %vm832_vm1, 0, %v2927_v26 }
 0x200   : > { %v2940_v15 = vsel %vm832_vm1, %v2939_v58, %v5297_v30  ;;  %v3735_v11 = vsel %vm832_vm1, %v2927_v26, %v2920_v42  ;;  %v3740_v0 = vrot.slane %v2928_v5, 4  ;;  %v718_v42 = vpack.i.b16 %v717_v3, %v716_v61  ;;  %v2686_v3 = vpop.permute.xlu2 %2685 }
 0x201   : > { %v2217_v52 = vsel %vm832_vm1, %v2216_v48, %v2209_v36  ;;  %v2946_v25 = vperm.slane %v2940_v15, %v5172_v2  ;;  %v2953_v10 = vrot.slane %v2950_v51, 4  ;;  %v2203_v31 = vrot.slane %v2202_v37, 4  ;;  %v612_v51 = vpop.permute.xlu0 %611 }
 0x202   : > { %v2221_v28 = vperm.slane %v2217_v52, %v5172_v2  ;;  %v3739_v20 = vperm.slane %v3735_v11, %v5157_v43  ;;  %v2490_v16 = vshrl.u32 %v2202_v37, 16  ;;  %v3741_v56 = vsel %vm832_vm1, %v3740_v0, %v2926_v54 }
 0x203   : > { %v2951_v40 = vrot.slane %v2946_v25, 4  ;;  %v2954_v30 = vsel %vm832_vm1, 0, %v2953_v10  ;;  %v2204_v36 = vsel %vm832_vm1, 0, %v2203_v31  ;;  %v3754_v48 = vsel %vm832_vm1, %v2953_v10, %v2946_v25 }
 0x204   : > { %v2222_v22 = vrot.slane %v2221_v28, 4  ;;  %v2488_v26 = vpack.i.b16 %v2221_v28, %v2202_v37  ;;  %v2491_v58 = vshrl.u32 %v2221_v28, 16  ;;  %v2498_v59 = vshrl.u32 %v2204_v36, 16 }
 0x205   : > { %v2952_v62 = vsel %vm832_vm1, 0, %v2951_v40  ;;  %v3745_v46 = vperm.slane %v3741_v56, %v5157_v43  ;;  %v3759_v61 = vrot.slane %v2954_v30, 4  ;;  %v1198_v52 = vrot.slane %v6287_v18, 4 }
 0x206   : > { %v2223_v5 = vsel %vm832_vm1, 0, %v2222_v22  ;;  %v2492_v15 = vpack.i.b16 %v2491_v58, %v2490_v16  ;;  %2533 = vst.msk [vmem:[%s5287_s27 + $0x38] sm:$0xf] %vm2518_vm2, %v2488_v26  ;;  %v1216_v54 = vperm.slane %v718_v42, %v5157_v43  ;;  %v721_v31 = vpack.i.b16 %v612_v51, %v6117_v27 }
 0x207   : > { %v2496_v37 = vpack.i.b16 %v2223_v5, %v2204_v36  ;;  %v2499_v11 = vshrl.u32 %v2223_v5, 16  ;;  %v3746_v25 = vrot.slane %v3745_v46, 4  ;;  %v3760_v10 = vsel %vm832_vm1, %v3759_v61, %v2952_v62 }
 0x208   : > { %2549 = vst.msk [vmem:[%s5287_s27 + $0x78] sm:$0xf] %vm2518_vm2, %v2492_v15  ;;  %v723_v28 = vshrl.u32 %v612_v51, 16  ;;  %v6318_v0 = vperm.slane %v6222_v39, %v5157_v43  ;;  %v3764_v40 = vperm.slane %v3760_v10, %v5157_v43  ;;  %v2755_v30 = vpack.i.b16 %v2686_v3, %v5749_v55 }
 0x209   : > { %v2500_v16 = vpack.i.b16 %v2499_v11, %v2498_v59  ;;  %2565 = vst.msk [vmem:[%s5287_s27 + $0xb8] sm:$0xf] %vm2518_vm2, %v2496_v37  ;;  %v3747_v42 = vsel %vm832_vm1, %v3746_v25, %v3739_v20  ;;  %v1224_v36 = vrot.slane %v1216_v54, 4  ;;  %v1195_v26 = vperm.slane %v721_v31, %v5157_v43 }
 0x20a   : > { %v724_v22 = vpack.i.b16 %v723_v28, %v722_v1  ;;  %v3751_v39 = vperm.slane %v3747_v42, %v5172_v2  ;;  %v3758_v58 = vperm.slane %v3754_v48, %v5157_v43  ;;  %v3765_v59 = vrot.slane %v3764_v40, 4 }
 0x20b   : > { %2581 = vst.msk [vmem:[%s5287_s27 + $0xf8] sm:$0xf] %vm2518_vm2, %v2500_v16  ;;  %v2757_v62 = vshrl.u32 %v2686_v3, 16  ;;  %v1196_v56 = vrot.slane %v1195_v26, 4  ;;  %v1199_v51 = vsel %vm832_vm1, %v1195_v26, %v1198_v52  ;;  %v3068_v5 = vperm.slane %v2755_v30, %v5157_v43 }
 0x20c   : > { %v1221_v20 = vperm.slane %v724_v22, %v5157_v43  ;;  %v3752_v27 = vrot.slane %v3751_v39, 4  ;;  %v3766_v1 = vsel %vm832_vm1, %v3765_v59, %v3758_v58  ;;  %v1207_v15 = vperm.slane %v1199_v51, %v5172_v2 }
 0x20d   : > { %v2798_v46 = vshrl.u32 %v5551_v44, 16  ;;  %v3770_v61 = vperm.slane %v3766_v1, %v5172_v2  ;;  %v1197_v48 = vsel %vm832_vm1, %v1196_v56, %v6287_v18  ;;  %v4347_v11 = vshrl.u32 %v3751_v39, 16 }
 0x20e   : > { %v1222_v3 = vrot.slane %v1221_v20, 4  ;;  %v1225_v37 = vsel %vm832_vm1, %v1221_v20, %v1224_v36  ;;  %v1203_v52 = vperm.slane %v1197_v48, %v5172_v2  ;;  %v1210_v25 = vrot.slane %v1207_v15, 4 }
 0x20f   : > { %v1233_v10 = vperm.slane %v1225_v37, %v5172_v2  ;;  %v3753_v31 = vsel %vm832_vm1, 0, %v3752_v27  ;;  %v3771_v28 = vrot.slane %v3770_v61, 4  ;;  %v4345_v18 = vpack.i.b16 %v3770_v61, %v3751_v39 }
 0x210   : > { %v4348_v16 = vshrl.u32 %v3770_v61, 16  ;;  %v1208_v40 = vrot.slane %v1203_v52, 4  ;;  %v1211_v30 = vsel %vm832_vm1, 0, %v1210_v25  ;;  %v1223_v42 = vsel %vm832_vm1, %v1222_v3, %v1216_v54 }
 0x211   : > { %v1236_v36 = vrot.slane %v1233_v10, 4  ;;  %v3772_v22 = vsel %vm832_vm1, 0, %v3771_v28  ;;  %4599 = vst.msk [vmem:[%s6347_s8] sm:$0xf] %vm2518_vm2, %v4345_v18  ;;  %v1229_v58 = vperm.slane %v1223_v42, %v5172_v2  ;;  %v7222_v59 = vshrl.u32 %v5749_v55, 16 }
 0x212   : > { %v4349_v26 = vpack.i.b16 %v4348_v16, %v4347_v11  ;;  %v4353_v51 = vpack.i.b16 %v3772_v22, %v3753_v31  ;;  %v4355_v39 = vshrl.u32 %v3753_v31, 16  ;;  %v4356_v20 = vshrl.u32 %v3772_v22, 16 }
 0x213   : > { %v2758_v56 = vpack.i.b16 %v2757_v62, %v7222_v59  ;;  %v1237_v27 = vsel %vm832_vm1, 0, %v1236_v36  ;;  %v1209_v54 = vsel %vm832_vm1, 0, %v1208_v40  ;;  %v1234_v1 = vrot.slane %v1229_v58, 4 }
 0x214   : > { %4615 = vst.msk [vmem:[%s6347_s8 + $0x40] sm:$0xf] %vm2518_vm2, %v4349_v26  ;;  %v1920_v15 = vsel %vm832_vm1, %v1210_v25, %v1203_v52  ;;  %v1925_v61 = vrot.slane %v1211_v30, 4  ;;  %v4357_v48 = vpack.i.b16 %v4356_v20, %v4355_v39  ;;  %v1939_v55 = vsel %vm832_vm1, %v1236_v36, %v1229_v58 }
 0x215   : > { %4631 = vst.msk [vmem:[%s6347_s8 + $0x80] sm:$0xf] %vm2518_vm2, %v4353_v51  ;;  %v1944_v62 = vrot.slane %v1237_v27, 4  ;;  %v3069_v3 = vrot.slane %v3068_v5, 4  ;;  %v1235_v37 = vsel %vm832_vm1, 0, %v1234_v1  ;;  %v7223_v10 = vrot.slane %v5802_v53, 4 }
 0x216   : > { %v1926_v11 = vsel %vm832_vm1, %v1925_v61, %v1209_v54  ;;  %v3094_v28 = vperm.slane %v2758_v56, %v5157_v43  ;;  %4647 = vst.msk [vmem:[%s6347_s8 + $0xc0] sm:$0xf] %vm2518_vm2, %v4357_v48  ;;  %v1924_v22 = vperm.slane %v1920_v15, %v5157_v43  ;;  %v2630_v56 = vpop.permute.xlu1 %2629 }
 0x217   : > { %v3072_v31 = vsel %vm832_vm1, %v3068_v5, %v7223_v10  ;;  %v1930_v52 = vperm.slane %v1926_v11, %v5157_v43  ;;  %v1945_v25 = vsel %vm832_vm1, %v1944_v62, %v1235_v37  ;;  %v3070_v18 = vsel %vm832_vm1, %v3069_v3, %v5802_v53 }
 0x218   : > { %v3080_v16 = vperm.slane %v3072_v31, %v5172_v2  ;;  %v1949_v40 = vperm.slane %v1945_v25, %v5157_v43  ;;  %v3076_v30 = vperm.slane %v3070_v18, %v5172_v2  ;;  %v3095_v42 = vrot.slane %v3094_v28, 4 }
 0x219   : > { %v7224_v5 = vrot.slane %v5810_v12, 4  ;;  %v1931_v26 = vrot.slane %v1930_v52, 4  ;;  %v1943_v53 = vperm.slane %v1939_v55, %v5157_v43  ;;  %v2797_v62 = vpack.i.b16 %v2630_v56, %v5551_v44 }
 0x21a   : > { %v3083_v58 = vrot.slane %v3080_v16, 4  ;;  %v1950_v51 = vrot.slane %v1949_v40, 4  ;;  %v3081_v39 = vrot.slane %v3076_v30, 4  ;;  %v3096_v20 = vsel %vm832_vm1, %v3095_v42, %v5810_v12 }
 0x21b   : > { %v3098_v36 = vsel %vm832_vm1, %v3094_v28, %v7224_v5  ;;  %v1932_v27 = vsel %vm832_vm1, %v1931_v26, %v1924_v22  ;;  %v3102_v1 = vperm.slane %v3096_v20, %v5172_v2  ;;  %v2799_v3 = vshrl.u32 %v2630_v56, 16 }
 0x21c   : > { %v3106_v59 = vperm.slane %v3098_v36, %v5172_v2  ;;  %v3084_v54 = vsel %vm832_vm1, 0, %v3083_v58  ;;  %v1936_v15 = vperm.slane %v1932_v27, %v5172_v2  ;;  %v1951_v48 = vsel %vm832_vm1, %v1950_v51, %v1943_v53  ;;  %v2692_v27 = vpop.permute.xlu2 %2691 }
 0x21d   : > { %v1955_v55 = vperm.slane %v1951_v48, %v5172_v2  ;;  %v3082_v37 = vsel %vm832_vm1, 0, %v3081_v39  ;;  %v3107_v11 = vrot.slane %v3102_v1, 4  ;;  %v3849_v28 = vsel %vm832_vm1, %v3083_v58, %v3076_v30  ;;  %v564_v58 = vpop.permute.xlu0 %563 }
 0x21e   : > { %v3109_v61 = vrot.slane %v3106_v59, 4  ;;  %v1937_v10 = vrot.slane %v1936_v15, 4  ;;  %v2378_v31 = vshrl.u32 %v1936_v15, 16  ;;  %v3854_v52 = vrot.slane %v3084_v54, 4 }
 0x21f   : > { %v1956_v25 = vrot.slane %v1955_v55, 4  ;;  %v2376_v18 = vpack.i.b16 %v1955_v55, %v1936_v15  ;;  %v2379_v16 = vshrl.u32 %v1955_v55, 16  ;;  %v3108_v40 = vsel %vm832_vm1, 0, %v3107_v11 }
 0x220   : > { %v3110_v12 = vsel %vm832_vm1, 0, %v3109_v61  ;;  %v1938_v42 = vsel %vm832_vm1, 0, %v1937_v10  ;;  %v3855_v5 = vsel %vm832_vm1, %v3854_v52, %v3082_v37  ;;  %v3868_v36 = vsel %vm832_vm1, %v3109_v61, %v3102_v1  ;;  %v596_v10 = vpop.permute.xlu1 %595 }
 0x221   : > { %v3873_v22 = vrot.slane %v3110_v12, 4  ;;  %v1957_v26 = vsel %vm832_vm1, 0, %v1956_v25  ;;  %v2380_v59 = vpack.i.b16 %v2379_v16, %v2378_v31  ;;  %v2386_v56 = vshrl.u32 %v1938_v42, 16  ;;  %2526 = vst.msk [vmem:[%s5287_s27 + $0x1c] sm:$0xf] %vm2518_vm2, %v2376_v18 }
 0x222   : > { %v3859_v30 = vperm.slane %v3855_v5, %v5157_v43  ;;  %v2384_v53 = vpack.i.b16 %v1957_v26, %v1938_v42  ;;  %v2387_v51 = vshrl.u32 %v1957_v26, 16  ;;  %v2800_v20 = vpack.i.b16 %v2799_v3, %v2798_v46 }
 0x223   : > { %v3874_v39 = vsel %vm832_vm1, %v3873_v22, %v3108_v40  ;;  %2542 = vst.msk [vmem:[%s5287_s27 + $0x5c] sm:$0xf] %vm2518_vm2, %v2380_v59  ;;  %v3853_v54 = vperm.slane %v3849_v28, %v5157_v43  ;;  %v6417_v15 = vperm.slane %v2797_v62, %v5157_v43  ;;  %v3253_v48 = vrot.slane %v6318_v0, 4 }
 0x224   : > { %v3860_v1 = vrot.slane %v3859_v30, 4  ;;  %v3878_v61 = vperm.slane %v3874_v39, %v5157_v43  ;;  %v819_v55 = vshrl.u32 %v6184_v57, 16  ;;  %v2388_v37 = vpack.i.b16 %v2387_v51, %v2386_v56  ;;  %2558 = vst.msk [vmem:[%s5287_s27 + $0x9c] sm:$0xf] %vm2518_vm2, %v2384_v53 }
 0x225   : > { %v813_v44 = vshrl.u32 %v564_v58, 16  ;;  %v3872_v3 = vperm.slane %v3868_v36, %v5157_v43  ;;  %v2791_v12 = vpack.i.b16 %v2692_v27, %v6175_v32  ;;  %v6430_v31 = vperm.slane %v2800_v20, %v5157_v43 }
 0x226   : > { %v3861_v46 = vsel %vm832_vm1, %v3860_v1, %v3853_v54  ;;  %v3879_v11 = vrot.slane %v3878_v61, 4  ;;  %2574 = vst.msk [vmem:[%s5287_s27 + $0xdc] sm:$0xf] %vm2518_vm2, %v2388_v37  ;;  %v812_v28 = vshrl.u32 %v5560_v19, 16  ;;  %v811_v52 = vpack.i.b16 %v564_v58, %v5560_v19 }
 0x227   : > { %v3865_v62 = vperm.slane %v3861_v46, %v5172_v2  ;;  %v3279_v18 = vrot.slane %v6417_v15, 4  ;;  %v2793_v16 = vshrl.u32 %v2692_v27, 16  ;;  %v3224_v40 = vperm.slane %v2791_v12, %v5157_v43 }
 0x228   : > { %v3880_v25 = vsel %vm832_vm1, %v3879_v11, %v3872_v3  ;;  %v814_v36 = vpack.i.b16 %v813_v44, %v812_v28  ;;  %v817_v22 = vpack.i.b16 %v6184_v57, %v596_v10  ;;  %v1606_v20 = vperm.slane %v811_v52, %v5157_v43 }
 0x229   : > { %v3866_v42 = vrot.slane %v3865_v62, 4  ;;  %v3884_v5 = vperm.slane %v3880_v25, %v5172_v2  ;;  %v4395_v26 = vshrl.u32 %v3865_v62, 16  ;;  %v2794_v59 = vpack.i.b16 %v2793_v16, %v2792_v33 }
 0x22a   : > { %v3225_v56 = vrot.slane %v3224_v40, 4  ;;  %v3228_v19 = vsel %vm832_vm1, %v3224_v40, %v3227_v45  ;;  %v818_v44 = vshrl.u32 %v596_v10, 16  ;;  %v1611_v11 = vperm.slane %v817_v22, %v5157_v43 }
 0x22b   : > { %v3867_v30 = vsel %vm832_vm1, 0, %v3866_v42  ;;  %v3885_v58 = vrot.slane %v3884_v5, 4  ;;  %v4393_v53 = vpack.i.b16 %v3884_v5, %v3865_v62  ;;  %v4396_v51 = vshrl.u32 %v3884_v5, 16 }
 0x22c   : > { %v4403_v39 = vshrl.u32 %v3867_v30, 16  ;;  %v3226_v57 = vsel %vm832_vm1, %v3225_v56, %v6209_v13  ;;  %v3236_v32 = vperm.slane %v3228_v19, %v5172_v2  ;;  %v3250_v54 = vperm.slane %v2794_v59, %v5157_v43 }
 0x22d   : > { %v3886_v33 = vsel %vm832_vm1, 0, %v3885_v58  ;;  %v4397_v27 = vpack.i.b16 %v4396_v51, %v4395_v26  ;;  %4602 = vst.msk [vmem:[%s6347_s8 + $0xc] sm:$0xf] %vm2518_vm2, %v4393_v53  ;;  %v3232_v45 = vperm.slane %v3226_v57, %v5172_v2  ;;  %v1614_v25 = vrot.slane %v1606_v20, 4 }
 0x22e   : > { %v4401_v1 = vpack.i.b16 %v3886_v33, %v3867_v30  ;;  %v4404_v61 = vshrl.u32 %v3886_v33, 16  ;;  %v3239_v37 = vrot.slane %v3236_v32, 4  ;;  %v3251_v46 = vrot.slane %v3250_v54, 4 }
 0x22f   : > { %4618 = vst.msk [vmem:[%s6347_s8 + $0x4c] sm:$0xf] %vm2518_vm2, %v4397_v27  ;;  %v3237_v13 = vrot.slane %v3232_v45, 4  ;;  %v3254_v3 = vsel %vm832_vm1, %v3250_v54, %v3253_v48  ;;  %v820_v5 = vpack.i.b16 %v819_v55, %v818_v44  ;;  %v1612_v22 = vrot.slane %v1611_v11, 4 }
 0x230   : > { %v4405_v12 = vpack.i.b16 %v4404_v61, %v4403_v39  ;;  %4634 = vst.msk [vmem:[%s6347_s8 + $0x8c] sm:$0xf] %vm2518_vm2, %v4401_v1  ;;  %v3240_v62 = vsel %vm832_vm1, 0, %v3239_v37  ;;  %v3262_v28 = vperm.slane %v3254_v3, %v5172_v2  ;;  %v3963_v52 = vsel %vm832_vm1, %v3239_v37, %v3232_v45  ;;  %v2646_v45 = vpop.permute.xlu0 %2645 }
 0x231   : > { %v3238_v10 = vsel %vm832_vm1, 0, %v3237_v13  ;;  %v3252_v16 = vsel %vm832_vm1, %v3251_v46, %v6318_v0  ;;  %v3968_v40 = vrot.slane %v3240_v62, 4  ;;  %v3305_v26 = vrot.slane %v6430_v31, 4 }
 0x232   : > { %4650 = vst.msk [vmem:[%s6347_s8 + $0xcc] sm:$0xf] %vm2518_vm2, %v4405_v12  ;;  %v3258_v48 = vperm.slane %v3252_v16, %v5172_v2  ;;  %v3265_v42 = vrot.slane %v3262_v28, 4  ;;  %v1632_v59 = vperm.slane %v814_v36, %v5157_v43  ;;  %v1615_v19 = vsel %vm832_vm1, %v1611_v11, %v1614_v25  ;;  %v2698_v28 = vpop.permute.xlu2 %2697 }
 0x233   : > { %v3969_v56 = vsel %vm832_vm1, %v3968_v40, %v3238_v10  ;;  %v3967_v51 = vperm.slane %v3963_v52, %v5157_v43  ;;  %v1613_v55 = vsel %vm832_vm1, %v1612_v22, %v1606_v20  ;;  %v1623_v57 = vperm.slane %v1615_v19, %v5172_v2 }
 0x234   : > { %v3263_v30 = vrot.slane %v3258_v48, 4  ;;  %v3266_v58 = vsel %vm832_vm1, 0, %v3265_v42  ;;  %v3973_v0 = vperm.slane %v3969_v56, %v5157_v43  ;;  %v3982_v53 = vsel %vm832_vm1, %v3265_v42, %v3258_v48 }
 0x235   : > { %v3987_v39 = vrot.slane %v3266_v58, 4  ;;  %v1619_v33 = vperm.slane %v1613_v55, %v5172_v2  ;;  %v1637_v27 = vperm.slane %v820_v5, %v5157_v43  ;;  %v1640_v54 = vrot.slane %v1632_v59, 4 }
 0x236   : > { %v3264_v36 = vsel %vm832_vm1, 0, %v3263_v30  ;;  %v3974_v32 = vrot.slane %v3973_v0, 4  ;;  %v1626_v61 = vrot.slane %v1623_v57, 4  ;;  %v2894_v37 = vshrl.u32 %v5673_v47, 16 }
 0x237   : > { %v3988_v1 = vsel %vm832_vm1, %v3987_v39, %v3264_v36  ;;  %v1624_v13 = vrot.slane %v1619_v33, 4  ;;  %v1638_v46 = vrot.slane %v1637_v27, 4  ;;  %v1641_v12 = vsel %vm832_vm1, %v1637_v27, %v1640_v54 }
 0x238   : > { %v3975_v44 = vsel %vm832_vm1, %v3974_v32, %v3967_v51  ;;  %v3992_v20 = vperm.slane %v3988_v1, %v5157_v43  ;;  %v1627_v11 = vsel %vm832_vm1, 0, %v1626_v61  ;;  %v2893_v62 = vpack.i.b16 %v2646_v45, %v5673_v47 }
 0x239   : > { %v3979_v3 = vperm.slane %v3975_v44, %v5172_v2  ;;  %v3986_v52 = vperm.slane %v3982_v53, %v5157_v43  ;;  %v1639_v10 = vsel %vm832_vm1, %v1638_v46, %v1632_v59  ;;  %v1649_v16 = vperm.slane %v1641_v12, %v5172_v2 }
 0x23a   : > { %v3993_v25 = vrot.slane %v3992_v20, 4  ;;  %v1625_v48 = vsel %vm832_vm1, 0, %v1624_v13  ;;  %v1645_v42 = vperm.slane %v1639_v10, %v5172_v2  ;;  %v2224_v5 = vsel %vm832_vm1, %v1626_v61, %v1619_v33  ;;  %v7225_v20 = vld [vmem:[#allocation10_spill] sm:$0xff] }
 0x23b   : > { %v3980_v40 = vrot.slane %v3979_v3, 4  ;;  %v1652_v56 = vrot.slane %v1649_v16, 4  ;;  %v2229_v19 = vrot.slane %v1627_v11, 4  ;;  %v2895_v47 = vshrl.u32 %v2646_v45, 16 }
 0x23c   : > { %v3994_v22 = vsel %vm832_vm1, %v3993_v25, %v3986_v52  ;;  %v1650_v0 = vrot.slane %v1645_v42, 4  ;;  %v6500_v59 = vperm.slane %v2893_v62, %v5157_v43  ;;  %v4443_v53 = vshrl.u32 %v3979_v3, 16 }
 0x23d   : > { %v3981_v30 = vsel %vm832_vm1, 0, %v3980_v40  ;;  %v3998_v58 = vperm.slane %v3994_v22, %v5172_v2  ;;  %v1653_v51 = vsel %vm832_vm1, 0, %v1652_v56  ;;  %v2228_v39 = vperm.slane %v2224_v5, %v5157_v43 }
 0x23e   : > { %v2230_v55 = vsel %vm832_vm1, %v2229_v19, %v1625_v48  ;;  %v1651_v33 = vsel %vm832_vm1, 0, %v1650_v0  ;;  %v4451_v27 = vshrl.u32 %v3981_v30, 16  ;;  %v2243_v54 = vsel %vm832_vm1, %v1652_v56, %v1645_v42  ;;  %v2704_v48 = vpop.permute.xlu2 %2703  ;;  %v6530_v0 = vpop.permute.xlu1 %2677 }
 0x23f   : > { %v3999_v57 = vrot.slane %v3998_v58, 4  ;;  %v4441_v36 = vpack.i.b16 %v3998_v58, %v3979_v3  ;;  %v4444_v32 = vshrl.u32 %v3998_v58, 16  ;;  %v2234_v45 = vperm.slane %v2230_v55, %v5157_v43 }
 0x240   : > { %v2248_v1 = vrot.slane %v1653_v51, 4  ;;  %v2827_v13 = vpack.i.b16 %v2698_v28, %v7225_v20  ;;  %v2829_v46 = vshrl.u32 %v2698_v28, 16  ;;  %v6516_v25 = vpack.i.b16 %v2895_v47, %v2894_v37  ;;  %v7227_v47 = vld [vmem:[#allocation12_spill] sm:$0xff] }
 0x241   : > { %v4000_v61 = vsel %vm832_vm1, 0, %v3999_v57  ;;  %v4445_v44 = vpack.i.b16 %v4444_v32, %v4443_v53  ;;  %4605 = vst.msk [vmem:[%s6347_s8 + $0x18] sm:$0xf] %vm2518_vm2, %v4441_v36  ;;  %v2235_v12 = vrot.slane %v2234_v45, 4  ;;  %v7226_v10 = vshrl.u32 %v7225_v20, 16 }
 0x242   : > { %v4449_v3 = vpack.i.b16 %v4000_v61, %v3981_v30  ;;  %v4452_v11 = vshrl.u32 %v4000_v61, 16  ;;  %v2249_v62 = vsel %vm832_vm1, %v2248_v1, %v1651_v33  ;;  %v3380_v40 = vperm.slane %v2827_v13, %v5157_v43 }
 0x243   : > { %4621 = vst.msk [vmem:[%s6347_s8 + $0x58] sm:$0xf] %vm2518_vm2, %v4445_v44  ;;  %v2253_v52 = vperm.slane %v2249_v62, %v5157_v43  ;;  %v2830_v16 = vpack.i.b16 %v2829_v46, %v7226_v10  ;;  %v2236_v28 = vsel %vm832_vm1, %v2235_v12, %v2228_v39  ;;  %v2247_v5 = vperm.slane %v2243_v54, %v5157_v43 }
 0x244   : > { %v4453_v42 = vpack.i.b16 %v4452_v11, %v4451_v27  ;;  %4637 = vst.msk [vmem:[%s6347_s8 + $0x98] sm:$0xf] %vm2518_vm2, %v4449_v3  ;;  %v3695_v22 = vrot.slane %v6500_v59, 4  ;;  %v2240_v56 = vperm.slane %v2236_v28, %v5172_v2  ;;  %v3381_v37 = vrot.slane %v3380_v40, 4 }
 0x245   : > { %v2254_v19 = vrot.slane %v2253_v52, 4  ;;  %v7228_v30 = vrot.slane %v7227_v47, 4  ;;  %v3406_v51 = vperm.slane %v2830_v16, %v5157_v43  ;;  %v2863_v39 = vpack.i.b16 %v2704_v48, %v5964_v63 }
 0x246   : > { %4653 = vst.msk [vmem:[%s6347_s8 + $0xd8] sm:$0xf] %vm2518_vm2, %v4453_v42  ;;  %v2865_v55 = vshrl.u32 %v2704_v48, 16  ;;  %v2241_v57 = vrot.slane %v2240_v56, 4  ;;  %v2506_v32 = vshrl.u32 %v2240_v56, 16  ;;  %v3382_v33 = vsel %vm832_vm1, %v3381_v37, %v7227_v47 }
 0x247   : > { %v3384_v58 = vsel %vm832_vm1, %v3380_v40, %v7228_v30  ;;  %v2255_v36 = vsel %vm832_vm1, %v2254_v19, %v2247_v5  ;;  %v3388_v45 = vperm.slane %v3382_v33, %v5172_v2  ;;  %v3407_v1 = vrot.slane %v3406_v51, 4 }
 0x248   : > { %v3392_v53 = vperm.slane %v3384_v58, %v5172_v2  ;;  %v2259_v27 = vperm.slane %v2255_v36, %v5172_v2  ;;  %v2242_v61 = vsel %vm832_vm1, 0, %v2241_v57  ;;  %v7229_v44 = vrot.slane %v5572_v50, 4 }
 0x249   : > { %v7230_v13 = vshrl.u32 %v5964_v63, 16  ;;  %v3536_v3 = vperm.slane %v2863_v39, %v5157_v43  ;;  %v2514_v52 = vshrl.u32 %v2242_v61, 16  ;;  %v3393_v10 = vrot.slane %v3388_v45, 4 }
 0x24a   : > { %v3395_v54 = vrot.slane %v3392_v53, 4  ;;  %v3410_v20 = vsel %vm832_vm1, %v3406_v51, %v7229_v44  ;;  %v2260_v11 = vrot.slane %v2259_v27, 4  ;;  %v2504_v12 = vpack.i.b16 %v2259_v27, %v2240_v56 }
 0x24b   : > { %v2866_v46 = vpack.i.b16 %v2865_v55, %v7230_v13  ;;  %v2507_v62 = vshrl.u32 %v2259_v27, 16  ;;  %v3408_v40 = vsel %vm832_vm1, %v3407_v1, %v5572_v50  ;;  %v3418_v48 = vperm.slane %v3410_v20, %v5172_v2 }
 0x24c   : > { %v3396_v16 = vsel %vm832_vm1, 0, %v3395_v54  ;;  %v2261_v42 = vsel %vm832_vm1, 0, %v2260_v11  ;;  %2534 = vst.msk [vmem:[%s5287_s27 + $0x3c] sm:$0xf] %vm2518_vm2, %v2504_v12  ;;  %v3414_v28 = vperm.slane %v3408_v40, %v5172_v2  ;;  %v4077_v5 = vsel %vm832_vm1, %v3395_v54, %v3388_v45 }
 0x24d   : > { %v2508_v63 = vpack.i.b16 %v2507_v62, %v2506_v32  ;;  %v2512_v56 = vpack.i.b16 %v2261_v42, %v2242_v61  ;;  %v2515_v19 = vshrl.u32 %v2261_v42, 16  ;;  %v3394_v37 = vsel %vm832_vm1, 0, %v3393_v10  ;;  %v2684_v32 = vpop.permute.xlu1 %2683 }
 0x24e   : > { %v3421_v47 = vrot.slane %v3418_v48, 4  ;;  %v3419_v50 = vrot.slane %v3414_v28, 4  ;;  %v4082_v30 = vrot.slane %v3396_v16, 4  ;;  %v2900_v58 = vshrl.u32 %v6530_v0, 16 }
 0x24f   : > { %2550 = vst.msk [vmem:[%s5287_s27 + $0x7c] sm:$0xf] %vm2518_vm2, %v2508_v63  ;;  %v3537_v53 = vrot.slane %v3536_v3, 4  ;;  %v2516_v51 = vpack.i.b16 %v2515_v19, %v2514_v52  ;;  %v7231_v57 = vrot.slane %v6006_v35, 4  ;;  %v4081_v27 = vperm.slane %v4077_v5, %v5157_v43  ;;  %v6589_v5 = vpop.permute.xlu0 %2675 }
 0x250   : > { %2566 = vst.msk [vmem:[%s5287_s27 + $0xbc] sm:$0xf] %vm2518_vm2, %v2512_v56  ;;  %v3422_v39 = vsel %vm832_vm1, 0, %v3421_v47  ;;  %v4096_v55 = vsel %vm832_vm1, %v3421_v47, %v3414_v28  ;;  %v3420_v33 = vsel %vm832_vm1, 0, %v3419_v50  ;;  %v4083_v45 = vsel %vm832_vm1, %v4082_v30, %v3394_v37 }
 0x251   : > { %v3540_v36 = vsel %vm832_vm1, %v3536_v3, %v7231_v57  ;;  %v4101_v54 = vrot.slane %v3422_v39, 4  ;;  %2582 = vst.msk [vmem:[%s5287_s27 + $0xfc] sm:$0xf] %vm2518_vm2, %v2516_v51  ;;  %v4087_v1 = vperm.slane %v4083_v45, %v5157_v43  ;;  %v3538_v61 = vsel %vm832_vm1, %v3537_v53, %v6006_v35 }
 0x252   : > { %v3548_v44 = vperm.slane %v3540_v36, %v5172_v2  ;;  %v3562_v20 = vperm.slane %v2866_v46, %v5157_v43  ;;  %v4100_v13 = vperm.slane %v4096_v55, %v5157_v43  ;;  %v3544_v11 = vperm.slane %v3538_v61, %v5172_v2 }
 0x253   : > { %v4102_v3 = vsel %vm832_vm1, %v4101_v54, %v3420_v33  ;;  %v2743_v12 = vpack.i.b16 %v2684_v32, %v5593_v8  ;;  %v4088_v62 = vrot.slane %v4087_v1, 4  ;;  %v7232_v35 = vrot.slane %v6030_v41, 4 }
 0x254   : > { %v4106_v52 = vperm.slane %v4102_v3, %v5157_v43  ;;  %v3551_v10 = vrot.slane %v3548_v44, 4  ;;  %v3563_v16 = vrot.slane %v3562_v20, 4  ;;  %v3549_v40 = vrot.slane %v3544_v11, 4 }
 0x255   : > { %v3566_v48 = vsel %vm832_vm1, %v3562_v20, %v7232_v35  ;;  %v2745_v42 = vshrl.u32 %v2684_v32, 16  ;;  %v3016_v46 = vperm.slane %v2743_v12, %v5157_v43  ;;  %v4089_v63 = vsel %vm832_vm1, %v4088_v62, %v4081_v27  ;;  %v7234_v12 = vld [vmem:[#allocation6_spill] sm:$0xff] }
 0x256   : > { %v4107_v28 = vrot.slane %v4106_v52, 4  ;;  %v3552_v56 = vsel %vm832_vm1, 0, %v3551_v10  ;;  %v3564_v19 = vsel %vm832_vm1, %v3563_v16, %v6030_v41  ;;  %v4093_v37 = vperm.slane %v4089_v63, %v5172_v2 }
 0x257   : > { %v3550_v47 = vsel %vm832_vm1, 0, %v3549_v40  ;;  %v3570_v50 = vperm.slane %v3564_v19, %v5172_v2  ;;  %v3574_v30 = vperm.slane %v3566_v48, %v5172_v2  ;;  %v4191_v51 = vsel %vm832_vm1, %v3551_v10, %v3544_v11 }
 0x258   : > { %v4108_v53 = vsel %vm832_vm1, %v4107_v28, %v4100_v13  ;;  %v4196_v39 = vrot.slane %v3552_v56, 4  ;;  %v3017_v55 = vrot.slane %v3016_v46, 4  ;;  %v4094_v57 = vrot.slane %v4093_v37, 4 }
 0x259   : > { %v4112_v36 = vperm.slane %v4108_v53, %v5172_v2  ;;  %v3575_v32 = vrot.slane %v3570_v50, 4  ;;  %v7233_v41 = vshrl.u32 %v5593_v8, 16  ;;  %v4491_v27 = vshrl.u32 %v4093_v37, 16 }
 0x25a   : > { %v3577_v45 = vrot.slane %v3574_v30, 4  ;;  %v4195_v54 = vperm.slane %v4191_v51, %v5157_v43  ;;  %v4197_v1 = vsel %vm832_vm1, %v4196_v39, %v3550_v47  ;;  %v4095_v61 = vsel %vm832_vm1, 0, %v4094_v57  ;;  %v2682_v39 = vpop.permute.xlu0 %2681 }
 0x25b   : > { %v2746_v33 = vpack.i.b16 %v2745_v42, %v7233_v41  ;;  %v4113_v44 = vrot.slane %v4112_v36, 4  ;;  %v4489_v20 = vpack.i.b16 %v4112_v36, %v4093_v37  ;;  %v4492_v13 = vshrl.u32 %v4112_v36, 16 }
 0x25c   : > { %v3576_v3 = vsel %vm832_vm1, 0, %v3575_v32  ;;  %v3578_v11 = vsel %vm832_vm1, 0, %v3577_v45  ;;  %v4201_v8 = vperm.slane %v4197_v1, %v5157_v43  ;;  %v3018_v62 = vsel %vm832_vm1, %v3017_v55, %v7234_v12  ;;  %v7236_v32 = vld [vmem:[#allocation8_spill] sm:$0xff] }
 0x25d   : > { %v4114_v52 = vsel %vm832_vm1, 0, %v4113_v44  ;;  %v4493_v10 = vpack.i.b16 %v4492_v13, %v4491_v27  ;;  %v4499_v16 = vshrl.u32 %v4095_v61, 16  ;;  %4608 = vst.msk [vmem:[%s6347_s8 + $0x24] sm:$0xf] %vm2518_vm2, %v4489_v20  ;;  %v4215_v40 = vrot.slane %v3578_v11, 4  ;;  %v7238_v20 = vld [vmem:[#allocation2_spill] sm:$0xff] }
 0x25e   : > { %v4497_v35 = vpack.i.b16 %v4114_v52, %v4095_v61  ;;  %v4500_v48 = vshrl.u32 %v4114_v52, 16  ;;  %v4202_v42 = vrot.slane %v4201_v8, 4  ;;  %v4210_v63 = vsel %vm832_vm1, %v3577_v45, %v3570_v50 }
 0x25f   : > { %4624 = vst.msk [vmem:[%s6347_s8 + $0x64] sm:$0xf] %vm2518_vm2, %v4493_v10  ;;  %v4216_v28 = vsel %vm832_vm1, %v4215_v40, %v3576_v3  ;;  %v7235_v56 = vrot.slane %v7234_v12, 4  ;;  %v3024_v37 = vperm.slane %v3018_v62, %v5172_v2  ;;  %v3042_v47 = vperm.slane %v2746_v33, %v5157_v43 }
 0x260   : > { %v4501_v30 = vpack.i.b16 %v4500_v48, %v4499_v16  ;;  %4640 = vst.msk [vmem:[%s6347_s8 + $0xa4] sm:$0xf] %vm2518_vm2, %v4497_v35  ;;  %v4203_v53 = vsel %vm832_vm1, %v4202_v42, %v4195_v54  ;;  %v4220_v50 = vperm.slane %v4216_v28, %v5157_v43  ;;  %v4214_v33 = vperm.slane %v4210_v63, %v5157_v43 }
 0x261   : > { %v3020_v19 = vsel %vm832_vm1, %v3016_v46, %v7235_v56  ;;  %v4207_v55 = vperm.slane %v4203_v53, %v5172_v2  ;;  %v3029_v57 = vrot.slane %v3024_v37, 4  ;;  %v3043_v36 = vrot.slane %v3042_v47, 4 }
 0x262   : > { %v3028_v51 = vperm.slane %v3020_v19, %v5172_v2  ;;  %v7237_v46 = vrot.slane %v7236_v32, 4  ;;  %4656 = vst.msk [vmem:[%s6347_s8 + $0xe4] sm:$0xf] %vm2518_vm2, %v4501_v30  ;;  %v4221_v27 = vrot.slane %v4220_v50, 4  ;;  %v2731_v13 = vpack.i.b16 %v2682_v39, %v7238_v20 }
 0x263   : > { %v4208_v1 = vrot.slane %v4207_v55, 4  ;;  %v3030_v61 = vsel %vm832_vm1, 0, %v3029_v57  ;;  %v3044_v44 = vsel %vm832_vm1, %v3043_v36, %v7236_v32  ;;  %v4539_v40 = vshrl.u32 %v4207_v55, 16  ;;  %v2710_v36 = vpop.permute.xlu2 %2709 }
 0x264   : > { %v3046_v41 = vsel %vm832_vm1, %v3042_v47, %v7237_v46  ;;  %v3031_v45 = vrot.slane %v3028_v51, 4  ;;  %v4222_v3 = vsel %vm832_vm1, %v4221_v27, %v4214_v33  ;;  %v3050_v8 = vperm.slane %v3044_v44, %v5172_v2 }
 0x265   : > { %v3054_v54 = vperm.slane %v3046_v41, %v5172_v2  ;;  %v4209_v62 = vsel %vm832_vm1, 0, %v4208_v1  ;;  %v4226_v52 = vperm.slane %v4222_v3, %v5172_v2  ;;  %v2964_v1 = vperm.slane %v2731_v13, %v5157_v43 }
 0x266   : > { %v3032_v11 = vsel %vm832_vm1, 0, %v3031_v45  ;;  %v3811_v10 = vsel %vm832_vm1, %v3031_v45, %v3024_v37  ;;  %v4547_v35 = vshrl.u32 %v4209_v62, 16  ;;  %v3055_v48 = vrot.slane %v3050_v8, 4 }
 0x267   : > { %v3057_v12 = vrot.slane %v3054_v54, 4  ;;  %v3816_v16 = vrot.slane %v3032_v11, 4  ;;  %v4227_v63 = vrot.slane %v4226_v52, 4  ;;  %v4537_v28 = vpack.i.b16 %v4226_v52, %v4207_v55 }
 0x268   : > { %v4540_v56 = vshrl.u32 %v4226_v52, 16  ;;  %v3056_v47 = vsel %vm832_vm1, 0, %v3055_v48  ;;  %v3815_v30 = vperm.slane %v3811_v10, %v5157_v43  ;;  %v2733_v55 = vshrl.u32 %v2682_v39, 16  ;;  %v7240_v52 = vld [vmem:[#allocation7_spill] sm:$0xff] }
 0x269   : > { %v3058_v42 = vsel %vm832_vm1, 0, %v3057_v12  ;;  %v3817_v19 = vsel %vm832_vm1, %v3816_v16, %v3030_v61  ;;  %v4228_v50 = vsel %vm832_vm1, 0, %v4227_v63  ;;  %4611 = vst.msk [vmem:[%s6347_s8 + $0x30] sm:$0xf] %vm2518_vm2, %v4537_v28  ;;  %v3830_v57 = vsel %vm832_vm1, %v3057_v12, %v3050_v8 }
 0x26a   : > { %v3821_v53 = vperm.slane %v3817_v19, %v5157_v43  ;;  %v3835_v37 = vrot.slane %v3058_v42, 4  ;;  %v4541_v51 = vpack.i.b16 %v4540_v56, %v4539_v40  ;;  %v4545_v32 = vpack.i.b16 %v4228_v50, %v4209_v62 }
 0x26b   : > { %v4548_v46 = vshrl.u32 %v4228_v50, 16  ;;  %v7239_v45 = vshrl.u32 %v7238_v20, 16  ;;  %v2899_v61 = vpack.i.b16 %v2710_v36, %v6530_v0  ;;  %v3834_v3 = vperm.slane %v3830_v57, %v5157_v43 }
 0x26c   : > { %v3822_v41 = vrot.slane %v3821_v53, 4  ;;  %v3836_v33 = vsel %vm832_vm1, %v3835_v37, %v3056_v47  ;;  %4627 = vst.msk [vmem:[%s6347_s8 + $0x70] sm:$0xf] %vm2518_vm2, %v4541_v51  ;;  %v2901_v11 = vshrl.u32 %v2710_v36, 16  ;;  %v2965_v62 = vrot.slane %v2964_v1, 4  ;;  %v7242_v37 = vld [vmem:[#allocation11_spill] sm:$0xff] }
 0x26d   : > { %v3840_v27 = vperm.slane %v3836_v33, %v5157_v43  ;;  %v2734_v54 = vpack.i.b16 %v2733_v55, %v7239_v45  ;;  %v4549_v44 = vpack.i.b16 %v4548_v46, %v4547_v35  ;;  %4643 = vst.msk [vmem:[%s6347_s8 + $0xb0] sm:$0xf] %vm2518_vm2, %v4545_v32  ;;  %v7241_v10 = vrot.slane %v7240_v52, 4 }
 0x26e   : > { %v3823_v39 = vsel %vm832_vm1, %v3822_v41, %v3815_v30  ;;  %v6673_v13 = vperm.slane %v6516_v25, %v5157_v43  ;;  %v3692_v35 = vperm.slane %v2899_v61, %v5157_v43  ;;  %v2966_v63 = vsel %vm832_vm1, %v2965_v62, %v7240_v52 }
 0x26f   : > { %v3827_v8 = vperm.slane %v3823_v39, %v5172_v2  ;;  %v3841_v12 = vrot.slane %v3840_v27, 4  ;;  %v2968_v20 = vsel %vm832_vm1, %v2964_v1, %v7241_v10  ;;  %4659 = vst.msk [vmem:[%s6347_s8 + $0xf0] sm:$0xf] %vm2518_vm2, %v4549_v44  ;;  %v2990_v40 = vperm.slane %v2734_v54, %v5157_v43 }
 0x270   : > { %v2976_v16 = vperm.slane %v2968_v20, %v5172_v2  ;;  %v2902_v28 = vpack.i.b16 %v2901_v11, %v2900_v58  ;;  %v2972_v56 = vperm.slane %v2966_v63, %v5172_v2  ;;  %v7243_v50 = vrot.slane %v7242_v37, 4 }
 0x271   : > { %v3828_v48 = vrot.slane %v3827_v8, 4  ;;  %v3842_v42 = vsel %vm832_vm1, %v3841_v12, %v3834_v3  ;;  %v2991_v47 = vrot.slane %v2990_v40, 4  ;;  %v4379_v53 = vshrl.u32 %v3827_v8, 16 }
 0x272   : > { %v3846_v25 = vperm.slane %v3842_v42, %v5172_v2  ;;  %v2979_v19 = vrot.slane %v2976_v16, 4  ;;  %v2994_v51 = vsel %vm832_vm1, %v2990_v40, %v7243_v50  ;;  %v3693_v57 = vrot.slane %v3692_v35, 4  ;;  %v2690_v16 = vpop.permute.xlu1 %2689 }
 0x273   : > { %v3829_v30 = vsel %vm832_vm1, 0, %v3828_v48  ;;  %v3696_v58 = vsel %vm832_vm1, %v3692_v35, %v3695_v22  ;;  %v2977_v32 = vrot.slane %v2972_v56, 4  ;;  %v2992_v41 = vsel %vm832_vm1, %v2991_v47, %v7242_v37 }
 0x274   : > { %v3847_v55 = vrot.slane %v3846_v25, 4  ;;  %v4377_v36 = vpack.i.b16 %v3846_v25, %v3827_v8  ;;  %v4380_v0 = vshrl.u32 %v3846_v25, 16  ;;  %v2980_v46 = vsel %vm832_vm1, 0, %v2979_v19 }
 0x275   : > { %v3002_v33 = vperm.slane %v2994_v51, %v5172_v2  ;;  %v4387_v54 = vshrl.u32 %v3829_v30, 16  ;;  %v2998_v1 = vperm.slane %v2992_v41, %v5172_v2  ;;  %v2978_v22 = vsel %vm832_vm1, 0, %v2977_v32 }
 0x276   : > { %v3848_v27 = vsel %vm832_vm1, 0, %v3847_v55  ;;  %v4381_v45 = vpack.i.b16 %v4380_v0, %v4379_v53  ;;  %4601 = vst.msk [vmem:[%s6347_s8 + $0x8] sm:$0xf] %vm2518_vm2, %v4377_v36  ;;  %v3773_v11 = vsel %vm832_vm1, %v2979_v19, %v2972_v56  ;;  %v3778_v8 = vrot.slane %v2980_v46, 4 }
 0x277   : > { %v4385_v61 = vpack.i.b16 %v3848_v27, %v3829_v30  ;;  %v4388_v44 = vshrl.u32 %v3848_v27, 16  ;;  %v3005_v39 = vrot.slane %v3002_v33, 4  ;;  %v3003_v3 = vrot.slane %v2998_v1, 4 }
 0x278   : > { %4617 = vst.msk [vmem:[%s6347_s8 + $0x48] sm:$0xf] %vm2518_vm2, %v4381_v45  ;;  %v3694_v12 = vsel %vm832_vm1, %v3693_v57, %v6500_v59  ;;  %v3721_v40 = vrot.slane %v6673_v13, 4  ;;  %v3779_v48 = vsel %vm832_vm1, %v3778_v8, %v2978_v22  ;;  %v3704_v63 = vperm.slane %v3696_v58, %v5172_v2 }
 0x279   : > { %v4389_v62 = vpack.i.b16 %v4388_v44, %v4387_v54  ;;  %4633 = vst.msk [vmem:[%s6347_s8 + $0x88] sm:$0xf] %vm2518_vm2, %v4385_v61  ;;  %v3006_v52 = vsel %vm832_vm1, 0, %v3005_v39  ;;  %v3792_v10 = vsel %vm832_vm1, %v3005_v39, %v2998_v1  ;;  %v3700_v20 = vperm.slane %v3694_v12, %v5172_v2 }
 0x27a   : > { %v3004_v35 = vsel %vm832_vm1, 0, %v3003_v3  ;;  %v3797_v42 = vrot.slane %v3006_v52, 4  ;;  %v3783_v59 = vperm.slane %v3779_v48, %v5157_v43  ;;  %v3718_v56 = vperm.slane %v2902_v28, %v5157_v43 }
 0x27b   : > { %4649 = vst.msk [vmem:[%s6347_s8 + $0xc8] sm:$0xf] %vm2518_vm2, %v4389_v62  ;;  %v3705_v25 = vrot.slane %v3700_v20, 4  ;;  %v3777_v19 = vperm.slane %v3773_v11, %v5157_v43  ;;  %v3796_v47 = vperm.slane %v3792_v10, %v5157_v43  ;;  %v2781_v53 = vshrl.u32 %v2690_v16, 16 }
 0x27c   : > { %v3798_v30 = vsel %vm832_vm1, %v3797_v42, %v3004_v35  ;;  %v3784_v37 = vrot.slane %v3783_v59, 4  ;;  %v3707_v51 = vrot.slane %v3704_v63, 4  ;;  %v2779_v57 = vpack.i.b16 %v2690_v16, %v6059_v17 }
 0x27d   : > { %v3802_v50 = vperm.slane %v3798_v30, %v5157_v43  ;;  %v3706_v55 = vsel %vm832_vm1, 0, %v3705_v25  ;;  %v3719_v36 = vrot.slane %v3718_v56, 4  ;;  %v3722_v0 = vsel %vm832_vm1, %v3718_v56, %v3721_v40 }
 0x27e   : > { %v7244_v28 = vshrl.u32 %v6059_v17, 16  ;;  %v3785_v32 = vsel %vm832_vm1, %v3784_v37, %v3777_v19  ;;  %v3708_v41 = vsel %vm832_vm1, 0, %v3707_v51  ;;  %v3730_v33 = vperm.slane %v3722_v0, %v5172_v2 }
 0x27f   : > { %v3803_v46 = vrot.slane %v3802_v50, 4  ;;  %v3789_v27 = vperm.slane %v3785_v32, %v5172_v2  ;;  %v3720_v45 = vsel %vm832_vm1, %v3719_v36, %v6673_v13  ;;  %v4305_v54 = vsel %vm832_vm1, %v3707_v51, %v3700_v20  ;;  %v2688_v51 = vpop.permute.xlu0 %2687 }
 0x280   : > { %v2782_v58 = vpack.i.b16 %v2781_v53, %v7244_v28  ;;  %v4310_v1 = vrot.slane %v3708_v41, 4  ;;  %v3726_v17 = vperm.slane %v3720_v45, %v5172_v2  ;;  %v3733_v44 = vrot.slane %v3730_v33, 4 }
 0x281   : > { %v3804_v61 = vsel %vm832_vm1, %v3803_v46, %v3796_v47  ;;  %v3172_v22 = vperm.slane %v2779_v57, %v5157_v43  ;;  %v3790_v39 = vrot.slane %v3789_v27, 4  ;;  %v4309_v11 = vperm.slane %v4305_v54, %v5157_v43 }
 0x282   : > { %v3808_v3 = vperm.slane %v3804_v61, %v5172_v2  ;;  %v4311_v8 = vsel %vm832_vm1, %v4310_v1, %v3706_v55  ;;  %v4363_v12 = vshrl.u32 %v3789_v27, 16  ;;  %v3731_v13 = vrot.slane %v3726_v17, 4 }
 0x283   : > { %v3734_v62 = vsel %vm832_vm1, 0, %v3733_v44  ;;  %v4315_v52 = vperm.slane %v4311_v8, %v5157_v43  ;;  %v3791_v10 = vsel %vm832_vm1, 0, %v3790_v39  ;;  %v4324_v59 = vsel %vm832_vm1, %v3733_v44, %v3726_v17 }
 0x284   : > { %v3809_v20 = vrot.slane %v3808_v3, 4  ;;  %v4361_v16 = vpack.i.b16 %v3808_v3, %v3789_v27  ;;  %v4364_v40 = vshrl.u32 %v3808_v3, 16  ;;  %v4371_v35 = vshrl.u32 %v3791_v10, 16 }
 0x285   : > { %v3732_v48 = vsel %vm832_vm1, 0, %v3731_v13  ;;  %v4316_v42 = vrot.slane %v4315_v52, 4  ;;  %v4329_v56 = vrot.slane %v3734_v62, 4  ;;  %v3173_v19 = vrot.slane %v3172_v22, 4 }
 0x286   : > { %v3810_v63 = vsel %vm832_vm1, 0, %v3809_v20  ;;  %v4365_v25 = vpack.i.b16 %v4364_v40, %v4363_v12  ;;  %4600 = vst.msk [vmem:[%s6347_s8 + $0x4] sm:$0xf] %vm2518_vm2, %v4361_v16  ;;  %v7245_v37 = vrot.slane %v5885_v7, 4  ;;  %v3198_v41 = vperm.slane %v2782_v58, %v5157_v43 }
 0x287   : > { %v4369_v47 = vpack.i.b16 %v3810_v63, %v3791_v10  ;;  %v4372_v30 = vshrl.u32 %v3810_v63, 16  ;;  %v4317_v53 = vsel %vm832_vm1, %v4316_v42, %v4309_v11  ;;  %v4330_v55 = vsel %vm832_vm1, %v4329_v56, %v3732_v48 }
 0x288   : > { %v3176_v50 = vsel %vm832_vm1, %v3172_v22, %v7245_v37  ;;  %4616 = vst.msk [vmem:[%s6347_s8 + $0x44] sm:$0xf] %vm2518_vm2, %v4365_v25  ;;  %v4321_v57 = vperm.slane %v4317_v53, %v5172_v2  ;;  %v3174_v36 = vsel %vm832_vm1, %v3173_v19, %v5885_v7  ;;  %v4334_v32 = vperm.slane %v4330_v55, %v5157_v43 }
 0x289   : > { %v3184_v0 = vperm.slane %v3176_v50, %v5172_v2  ;;  %v4373_v28 = vpack.i.b16 %v4372_v30, %v4371_v35  ;;  %4632 = vst.msk [vmem:[%s6347_s8 + $0x84] sm:$0xf] %vm2518_vm2, %v4369_v47  ;;  %v3180_v46 = vperm.slane %v3174_v36, %v5172_v2  ;;  %v4328_v27 = vperm.slane %v4324_v59, %v5157_v43 }
 0x28a   : > { %v4322_v33 = vrot.slane %v4321_v57, 4  ;;  %v2767_v54 = vpack.i.b16 %v2688_v51, %v5706_v60  ;;  %v4335_v7 = vrot.slane %v4334_v32, 4  ;;  %v3199_v61 = vrot.slane %v3198_v41, 4 }
 0x28b   : > { %v3187_v45 = vrot.slane %v3184_v0, 4  ;;  %4648 = vst.msk [vmem:[%s6347_s8 + $0xc4] sm:$0xf] %vm2518_vm2, %v4373_v28  ;;  %v3185_v1 = vrot.slane %v3180_v46, 4  ;;  %v7246_v17 = vrot.slane %v5916_v4, 4  ;;  %v4587_v8 = vshrl.u32 %v4321_v57, 16 }
 0x28c   : > { %v4323_v22 = vsel %vm832_vm1, 0, %v4322_v33  ;;  %v4336_v11 = vsel %vm832_vm1, %v4335_v7, %v4328_v27  ;;  %v3200_v13 = vsel %vm832_vm1, %v3199_v61, %v5916_v4  ;;  %v2769_v35 = vshrl.u32 %v2688_v51, 16  ;;  %v7249_v7 = vld [vmem:[#allocation5_spill] sm:$0xff] }
 0x28d   : > { %v3202_v44 = vsel %vm832_vm1, %v3198_v41, %v7246_v17  ;;  %v3188_v39 = vsel %vm832_vm1, 0, %v3187_v45  ;;  %v3925_v3 = vsel %vm832_vm1, %v3187_v45, %v3180_v46  ;;  %v4595_v12 = vshrl.u32 %v4323_v22, 16 }
 0x28e   : > { %v3210_v58 = vperm.slane %v3202_v44, %v5172_v2  ;;  %v4340_v62 = vperm.slane %v4336_v11, %v5172_v2  ;;  %v3186_v52 = vsel %vm832_vm1, 0, %v3185_v1  ;;  %v3206_v10 = vperm.slane %v3200_v13, %v5172_v2 }
 0x28f   : > { %v3929_v16 = vperm.slane %v3925_v3, %v5157_v43  ;;  %v3930_v40 = vrot.slane %v3188_v39, 4  ;;  %v3120_v48 = vperm.slane %v2767_v54, %v5157_v43  ;;  %v7247_v47 = vshrl.u32 %v5706_v60, 16 }
 0x290   : > { %v3213_v20 = vrot.slane %v3210_v58, 4  ;;  %v4341_v42 = vrot.slane %v4340_v62, 4  ;;  %v4585_v59 = vpack.i.b16 %v4340_v62, %v4321_v57  ;;  %v4588_v63 = vshrl.u32 %v4340_v62, 16  ;;  %v2696_v57 = vpop.permute.xlu1 %2695 }
 0x291   : > { %v3211_v25 = vrot.slane %v3206_v10, 4  ;;  %v3931_v56 = vsel %vm832_vm1, %v3930_v40, %v3186_v52  ;;  %v2770_v30 = vpack.i.b16 %v2769_v35, %v7247_v47  ;;  %v3121_v32 = vrot.slane %v3120_v48, 4 }
 0x292   : > { %v3214_v4 = vsel %vm832_vm1, 0, %v3213_v20  ;;  %v3944_v19 = vsel %vm832_vm1, %v3213_v20, %v3206_v10  ;;  %v4342_v53 = vsel %vm832_vm1, 0, %v4341_v42  ;;  %v4589_v37 = vpack.i.b16 %v4588_v63, %v4587_v8  ;;  %4614 = vst.msk [vmem:[%s6347_s8 + $0x3c] sm:$0xf] %vm2518_vm2, %v4585_v59 }
 0x293   : > { %v3212_v50 = vsel %vm832_vm1, 0, %v3211_v25  ;;  %v3935_v51 = vperm.slane %v3931_v56, %v5157_v43  ;;  %v4593_v55 = vpack.i.b16 %v4342_v53, %v4323_v22  ;;  %v4596_v36 = vshrl.u32 %v4342_v53, 16 }
 0x294   : > { %v3948_v0 = vperm.slane %v3944_v19, %v5157_v43  ;;  %v3949_v28 = vrot.slane %v3214_v4, 4  ;;  %4630 = vst.msk [vmem:[%s6347_s8 + $0x7c] sm:$0xf] %vm2518_vm2, %v4589_v37  ;;  %v7248_v46 = vrot.slane %v5970_v38, 4  ;;  %v3146_v33 = vperm.slane %v2770_v30, %v5157_v43 }
 0x295   : > { %v3936_v60 = vrot.slane %v3935_v51, 4  ;;  %v4597_v27 = vpack.i.b16 %v4596_v36, %v4595_v12  ;;  %4646 = vst.msk [vmem:[%s6347_s8 + $0xbc] sm:$0xf] %vm2518_vm2, %v4593_v55  ;;  %v2815_v1 = vpack.i.b16 %v2696_v57, %v7249_v7  ;;  %v3122_v44 = vsel %vm832_vm1, %v3121_v32, %v5970_v38 }
 0x296   : > { %v3124_v41 = vsel %vm832_vm1, %v3120_v48, %v7248_v46  ;;  %v3950_v45 = vsel %vm832_vm1, %v3949_v28, %v3212_v50  ;;  %v3147_v22 = vrot.slane %v3146_v33, 4  ;;  %v3128_v58 = vperm.slane %v3122_v44, %v5172_v2 }
 0x297   : > { %v3132_v54 = vperm.slane %v3124_v41, %v5172_v2  ;;  %v3937_v61 = vsel %vm832_vm1, %v3936_v60, %v3929_v16  ;;  %v3954_v17 = vperm.slane %v3950_v45, %v5157_v43  ;;  %4662 = vst.msk [vmem:[%s6347_s8 + $0xfc] sm:$0xf] %vm2518_vm2, %v4597_v27  ;;  %v7250_v11 = vrot.slane %v5974_v34, 4 }
 0x298   : > { %v3941_v39 = vperm.slane %v3937_v61, %v5172_v2  ;;  %v3148_v13 = vsel %vm832_vm1, %v3147_v22, %v5974_v34  ;;  %v2817_v52 = vshrl.u32 %v2696_v57, 16  ;;  %v3133_v20 = vrot.slane %v3128_v58, 4 }
 0x299   : > { %v3135_v3 = vrot.slane %v3132_v54, 4  ;;  %v3150_v8 = vsel %vm832_vm1, %v3146_v33, %v7250_v11  ;;  %v3955_v12 = vrot.slane %v3954_v17, 4  ;;  %v3154_v35 = vperm.slane %v3148_v13, %v5172_v2 }
 0x29a   : > { %v3158_v62 = vperm.slane %v3150_v8, %v5172_v2  ;;  %v3942_v38 = vrot.slane %v3941_v39, 4  ;;  %v4427_v10 = vshrl.u32 %v3941_v39, 16  ;;  %v3134_v34 = vsel %vm832_vm1, 0, %v3133_v20 }
 0x29b   : > { %v3136_v16 = vsel %vm832_vm1, 0, %v3135_v3  ;;  %v3956_v40 = vsel %vm832_vm1, %v3955_v12, %v3948_v0  ;;  %v3887_v42 = vsel %vm832_vm1, %v3135_v3, %v3128_v58  ;;  %v3159_v56 = vrot.slane %v3154_v35, 4  ;;  %v6835_v0 = vpop.permute.xlu0 %2693  ;;  %v7252_v58 = vld [vmem:[#allocation3_spill] sm:$0xff] }
 0x29c   : > { %v3161_v48 = vrot.slane %v3158_v62, 4  ;;  %v3943_v59 = vsel %vm832_vm1, 0, %v3942_v38  ;;  %v3960_v63 = vperm.slane %v3956_v40, %v5172_v2  ;;  %v3891_v25 = vperm.slane %v3887_v42, %v5157_v43 }
 0x29d   : > { %v4435_v4 = vshrl.u32 %v3943_v59, 16  ;;  %v3892_v47 = vrot.slane %v3136_v16, 4  ;;  %v3160_v51 = vsel %vm832_vm1, 0, %v3159_v56  ;;  %v7251_v46 = vshrl.u32 %v7249_v7, 16 }
 0x29e   : > { %v3162_v19 = vsel %vm832_vm1, 0, %v3161_v48  ;;  %v3961_v30 = vrot.slane %v3960_v63, 4  ;;  %v4425_v53 = vpack.i.b16 %v3960_v63, %v3941_v39  ;;  %v4428_v37 = vshrl.u32 %v3960_v63, 16 }
 0x29f   : > { %v3906_v50 = vsel %vm832_vm1, %v3161_v48, %v3154_v35  ;;  %v3893_v57 = vsel %vm832_vm1, %v3892_v47, %v3134_v34  ;;  %v3911_v36 = vrot.slane %v3162_v19, 4  ;;  %v2818_v41 = vpack.i.b16 %v2817_v52, %v7251_v46 }
 0x2a0   : > { %v3910_v55 = vperm.slane %v3906_v50, %v5157_v43  ;;  %v3962_v28 = vsel %vm832_vm1, 0, %v3961_v30  ;;  %v4429_v60 = vpack.i.b16 %v4428_v37, %v4427_v10  ;;  %4604 = vst.msk [vmem:[%s6347_s8 + $0x14] sm:$0xf] %vm2518_vm2, %v4425_v53  ;;  %v3897_v32 = vperm.slane %v3893_v57, %v5157_v43  ;;  %v7254_v10 = vld [vmem:[#allocation4_spill] sm:$0xff] }
 0x2a1   : > { %v4433_v33 = vpack.i.b16 %v3962_v28, %v3943_v59  ;;  %v4436_v27 = vshrl.u32 %v3962_v28, 16  ;;  %v3912_v45 = vsel %vm832_vm1, %v3911_v36, %v3160_v51  ;;  %v3328_v54 = vperm.slane %v2815_v1, %v5157_v43 }
 0x2a2   : > { %4620 = vst.msk [vmem:[%s6347_s8 + $0x54] sm:$0xf] %vm2518_vm2, %v4429_v60  ;;  %v3898_v61 = vrot.slane %v3897_v32, 4  ;;  %v3916_v17 = vperm.slane %v3912_v45, %v5157_v43  ;;  %v3354_v44 = vperm.slane %v2818_v41, %v5157_v43  ;;  %v2803_v22 = vpack.i.b16 %v6835_v0, %v6156_v29 }
 0x2a3   : > { %v4437_v39 = vpack.i.b16 %v4436_v27, %v4435_v4  ;;  %4636 = vst.msk [vmem:[%s6347_s8 + $0x94] sm:$0xf] %vm2518_vm2, %v4433_v33  ;;  %v3329_v7 = vrot.slane %v3328_v54, 4  ;;  %v7253_v3 = vrot.slane %v7252_v58, 4  ;;  %v2805_v1 = vshrl.u32 %v6835_v0, 16 }
 0x2a4   : > { %v3899_v8 = vsel %vm832_vm1, %v3898_v61, %v3891_v25  ;;  %v3917_v12 = vrot.slane %v3916_v17, 4  ;;  %v3355_v62 = vrot.slane %v3354_v44, 4  ;;  %v7255_v20 = vrot.slane %v7254_v10, 4 }
 0x2a5   : > { %v3332_v11 = vsel %vm832_vm1, %v3328_v54, %v7253_v3  ;;  %4652 = vst.msk [vmem:[%s6347_s8 + $0xd4] sm:$0xf] %vm2518_vm2, %v4437_v39  ;;  %v3903_v52 = vperm.slane %v3899_v8, %v5172_v2  ;;  %v3330_v38 = vsel %vm832_vm1, %v3329_v7, %v7252_v58  ;;  %v7256_v40 = vshrl.u32 %v6156_v29, 16  ;;  %v2702_v54 = vpop.permute.xlu1 %2701 }
 0x2a6   : > { %v3340_v13 = vperm.slane %v3332_v11, %v5172_v2  ;;  %v3358_v16 = vsel %vm832_vm1, %v3354_v44, %v7255_v20  ;;  %v3918_v48 = vsel %vm832_vm1, %v3917_v12, %v3910_v55  ;;  %v3336_v42 = vperm.slane %v3330_v38, %v5172_v2 }
 0x2a7   : > { %v2806_v35 = vpack.i.b16 %v2805_v1, %v7256_v40  ;;  %v3356_v63 = vsel %vm832_vm1, %v3355_v62, %v7254_v10  ;;  %v3904_v34 = vrot.slane %v3903_v52, 4  ;;  %v3922_v25 = vperm.slane %v3918_v48, %v5172_v2 }
 0x2a8   : > { %v3343_v59 = vrot.slane %v3340_v13, 4  ;;  %v4411_v4 = vshrl.u32 %v3903_v52, 16  ;;  %v3362_v56 = vperm.slane %v3356_v63, %v5172_v2  ;;  %v3341_v19 = vrot.slane %v3336_v42, 4 }
 0x2a9   : > { %v3366_v29 = vperm.slane %v3358_v16, %v5172_v2  ;;  %v3905_v53 = vsel %vm832_vm1, 0, %v3904_v34  ;;  %v3923_v37 = vrot.slane %v3922_v25, 4  ;;  %v4409_v50 = vpack.i.b16 %v3922_v25, %v3903_v52 }
 0x2aa   : > { %v3344_v47 = vsel %vm832_vm1, 0, %v3343_v59  ;;  %v4039_v30 = vsel %vm832_vm1, %v3343_v59, %v3336_v42  ;;  %v4412_v51 = vshrl.u32 %v3922_v25, 16  ;;  %v4419_v57 = vshrl.u32 %v3905_v53, 16 }
 0x2ab   : > { %v3342_v55 = vsel %vm832_vm1, 0, %v3341_v19  ;;  %v3367_v36 = vrot.slane %v3362_v56, 4  ;;  %v3369_v0 = vrot.slane %v3366_v29, 4  ;;  %v3924_v28 = vsel %vm832_vm1, 0, %v3923_v37  ;;  %4603 = vst.msk [vmem:[%s6347_s8 + $0x10] sm:$0xf] %vm2518_vm2, %v4409_v50 }
 0x2ac   : > { %v4413_v60 = vpack.i.b16 %v4412_v51, %v4411_v4  ;;  %v4043_v32 = vperm.slane %v4039_v30, %v5157_v43  ;;  %v4044_v46 = vrot.slane %v3344_v47, 4  ;;  %v4417_v41 = vpack.i.b16 %v3924_v28, %v3905_v53 }
 0x2ad   : > { %v4420_v33 = vshrl.u32 %v3924_v28, 16  ;;  %v3368_v27 = vsel %vm832_vm1, 0, %v3367_v36  ;;  %v3370_v45 = vsel %vm832_vm1, 0, %v3369_v0  ;;  %v4058_v17 = vsel %vm832_vm1, %v3369_v0, %v3362_v56 }
 0x2ae   : > { %4619 = vst.msk [vmem:[%s6347_s8 + $0x50] sm:$0xf] %vm2518_vm2, %v4413_v60  ;;  %v4045_v61 = vsel %vm832_vm1, %v4044_v46, %v3342_v55  ;;  %v4063_v44 = vrot.slane %v3370_v45, 4  ;;  %v3276_v39 = vperm.slane %v2803_v22, %v5157_v43  ;;  %v4062_v3 = vperm.slane %v4058_v17, %v5157_v43  ;;  %v2700_v45 = vpop.permute.xlu0 %2699 }
 0x2af   : > { %v4421_v7 = vpack.i.b16 %v4420_v33, %v4419_v57  ;;  %4635 = vst.msk [vmem:[%s6347_s8 + $0x90] sm:$0xf] %vm2518_vm2, %v4417_v41  ;;  %v4049_v58 = vperm.slane %v4045_v61, %v5157_v43  ;;  %v3302_v11 = vperm.slane %v2806_v35, %v5157_v43  ;;  %v2851_v13 = vpack.i.b16 %v2702_v54, %v5825_v23 }
 0x2b0   : > { %v4064_v1 = vsel %vm832_vm1, %v4063_v44, %v3368_v27  ;;  %v3277_v8 = vrot.slane %v3276_v39, 4  ;;  %v3280_v12 = vsel %vm832_vm1, %v3276_v39, %v3279_v18  ;;  %v2853_v16 = vshrl.u32 %v2702_v54, 16 }
 0x2b1   : > { %4651 = vst.msk [vmem:[%s6347_s8 + $0xd0] sm:$0xf] %vm2518_vm2, %v4421_v7  ;;  %v4050_v22 = vrot.slane %v4049_v58, 4  ;;  %v4068_v62 = vperm.slane %v4064_v1, %v5157_v43  ;;  %v3288_v52 = vperm.slane %v3280_v12, %v5172_v2  ;;  %v3303_v38 = vrot.slane %v3302_v11, 4  ;;  %v7258_v58 = vld [vmem:[#allocation13_spill] sm:$0xff] }
 0x2b2   : > { %v3278_v10 = vsel %vm832_vm1, %v3277_v8, %v6417_v15  ;;  %v3306_v20 = vsel %vm832_vm1, %v3302_v11, %v3305_v26  ;;  %v3484_v18 = vperm.slane %v2851_v13, %v5157_v43  ;;  %v7257_v34 = vshrl.u32 %v5825_v23, 16 }
 0x2b3   : > { %v4051_v40 = vsel %vm832_vm1, %v4050_v22, %v4043_v32  ;;  %v4069_v35 = vrot.slane %v4068_v62, 4  ;;  %v3284_v48 = vperm.slane %v3278_v10, %v5172_v2  ;;  %v3291_v42 = vrot.slane %v3288_v52, 4  ;;  %v7260_v22 = vld [vmem:[#allocation9_spill] sm:$0xff] }
 0x2b4   : > { %v4055_v59 = vperm.slane %v4051_v40, %v5172_v2  ;;  %v3304_v63 = vsel %vm832_vm1, %v3303_v38, %v6430_v31  ;;  %v3314_v15 = vperm.slane %v3306_v20, %v5172_v2  ;;  %v2854_v25 = vpack.i.b16 %v2853_v16, %v7257_v34  ;;  %v7261_v20 = vld [vmem:[#allocation14_spill] sm:$0xff] }
 0x2b5   : > { %v4070_v26 = vsel %vm832_vm1, %v4069_v35, %v4062_v3  ;;  %v3289_v4 = vrot.slane %v3284_v48, 4  ;;  %v3292_v56 = vsel %vm832_vm1, 0, %v3291_v42  ;;  %v3310_v19 = vperm.slane %v3304_v63, %v5172_v2 }
 0x2b6   : > { %v4056_v47 = vrot.slane %v4055_v59, 4  ;;  %v4074_v29 = vperm.slane %v4070_v26, %v5172_v2  ;;  %v4475_v30 = vshrl.u32 %v4055_v59, 16  ;;  %v3317_v53 = vrot.slane %v3314_v15, 4 }
 0x2b7   : > { %v3290_v31 = vsel %vm832_vm1, 0, %v3289_v4  ;;  %v3315_v37 = vrot.slane %v3310_v19, 4  ;;  %v4001_v50 = vsel %vm832_vm1, %v3291_v42, %v3284_v48  ;;  %v4006_v23 = vrot.slane %v3292_v56, 4 }
 0x2b8   : > { %v4057_v51 = vsel %vm832_vm1, 0, %v4056_v47  ;;  %v4075_v57 = vrot.slane %v4074_v29, 4  ;;  %v4473_v55 = vpack.i.b16 %v4074_v29, %v4055_v59  ;;  %v4476_v36 = vshrl.u32 %v4074_v29, 16 }
 0x2b9   : > { %v4483_v0 = vshrl.u32 %v4057_v51, 16  ;;  %v3316_v28 = vsel %vm832_vm1, 0, %v3315_v37  ;;  %v3318_v60 = vsel %vm832_vm1, 0, %v3317_v53  ;;  %v4005_v32 = vperm.slane %v4001_v50, %v5157_v43 }
 0x2ba   : > { %v4076_v46 = vsel %vm832_vm1, 0, %v4075_v57  ;;  %v4477_v41 = vpack.i.b16 %v4476_v36, %v4475_v30  ;;  %4607 = vst.msk [vmem:[%s6347_s8 + $0x20] sm:$0xf] %vm2518_vm2, %v4473_v55  ;;  %v4007_v33 = vsel %vm832_vm1, %v4006_v23, %v3290_v31  ;;  %v4020_v27 = vsel %vm832_vm1, %v3317_v53, %v3310_v19 }
 0x2bb   : > { %v4481_v54 = vpack.i.b16 %v4076_v46, %v4057_v51  ;;  %v4484_v61 = vshrl.u32 %v4076_v46, 16  ;;  %v4011_v17 = vperm.slane %v4007_v33, %v5157_v43  ;;  %v4024_v44 = vperm.slane %v4020_v27, %v5157_v43 }
 0x2bc   : > { %4623 = vst.msk [vmem:[%s6347_s8 + $0x60] sm:$0xf] %vm2518_vm2, %v4477_v41  ;;  %v4025_v39 = vrot.slane %v3318_v60, 4  ;;  %v3485_v7 = vrot.slane %v3484_v18, 4  ;;  %v7259_v3 = vrot.slane %v7258_v58, 4  ;;  %v3510_v1 = vperm.slane %v2854_v25, %v5157_v43 }
 0x2bd   : > { %v4485_v8 = vpack.i.b16 %v4484_v61, %v4483_v0  ;;  %4639 = vst.msk [vmem:[%s6347_s8 + $0xa0] sm:$0xf] %vm2518_vm2, %v4481_v54  ;;  %v4012_v12 = vrot.slane %v4011_v17, 4  ;;  %v2839_v62 = vpack.i.b16 %v2700_v45, %v7260_v22  ;;  %v7262_v16 = vrot.slane %v7261_v20, 4 }
 0x2be   : > { %v3488_v11 = vsel %vm832_vm1, %v3484_v18, %v7259_v3  ;;  %v4026_v52 = vsel %vm832_vm1, %v4025_v39, %v3316_v28  ;;  %v3486_v38 = vsel %vm832_vm1, %v3485_v7, %v7258_v58  ;;  %v3511_v10 = vrot.slane %v3510_v1, 4 }
 0x2bf   : > { %v3496_v13 = vperm.slane %v3488_v11, %v5172_v2  ;;  %v3514_v18 = vsel %vm832_vm1, %v3510_v1, %v7262_v16  ;;  %4655 = vst.msk [vmem:[%s6347_s8 + $0xe0] sm:$0xf] %vm2518_vm2, %v4485_v8  ;;  %v4013_v40 = vsel %vm832_vm1, %v4012_v12, %v4005_v32  ;;  %v4030_v35 = vperm.slane %v4026_v52, %v5157_v43 }
 0x2c0   : > { %v3492_v48 = vperm.slane %v3486_v38, %v5172_v2  ;;  %v4017_v59 = vperm.slane %v4013_v40, %v5172_v2  ;;  %v3512_v63 = vsel %vm832_vm1, %v3511_v10, %v7261_v20  ;;  %v3522_v15 = vperm.slane %v3514_v18, %v5172_v2 }
 0x2c1   : > { %v3499_v42 = vrot.slane %v3496_v13, 4  ;;  %v2841_v34 = vshrl.u32 %v2700_v45, 16  ;;  %v4031_v25 = vrot.slane %v4030_v35, 4  ;;  %v3518_v56 = vperm.slane %v3512_v63, %v5172_v2 }
 0x2c2   : > { %v3497_v26 = vrot.slane %v3492_v48, 4  ;;  %v4018_v19 = vrot.slane %v4017_v59, 4  ;;  %v4459_v47 = vshrl.u32 %v4017_v59, 16  ;;  %v3525_v29 = vrot.slane %v3522_v15, 4 }
 0x2c3   : > { %v3500_v4 = vsel %vm832_vm1, 0, %v3499_v42  ;;  %v4153_v30 = vsel %vm832_vm1, %v3499_v42, %v3492_v48  ;;  %v4032_v53 = vsel %vm832_vm1, %v4031_v25, %v4024_v44  ;;  %v3523_v37 = vrot.slane %v3518_v56, 4  ;;  %v6978_v44 = vpop.permute.xlu1 %2707 }
 0x2c4   : > { %v3498_v31 = vsel %vm832_vm1, 0, %v3497_v26  ;;  %v4157_v50 = vperm.slane %v4153_v30, %v5157_v43  ;;  %v4019_v23 = vsel %vm832_vm1, 0, %v4018_v19  ;;  %v4036_v51 = vperm.slane %v4032_v53, %v5172_v2 }
 0x2c5   : > { %v3526_v57 = vsel %vm832_vm1, 0, %v3525_v29  ;;  %v4158_v55 = vrot.slane %v3500_v4, 4  ;;  %v4467_v36 = vshrl.u32 %v4019_v23, 16  ;;  %v3524_v0 = vsel %vm832_vm1, 0, %v3523_v37 }
 0x2c6   : > { %v4172_v28 = vsel %vm832_vm1, %v3525_v29, %v3518_v56  ;;  %v4177_v60 = vrot.slane %v3526_v57, 4  ;;  %v4037_v32 = vrot.slane %v4036_v51, 4  ;;  %v4457_v46 = vpack.i.b16 %v4036_v51, %v4017_v59 }
 0x2c7   : > { %v4460_v41 = vshrl.u32 %v4036_v51, 16  ;;  %v4159_v33 = vsel %vm832_vm1, %v4158_v55, %v3498_v31  ;;  %v4176_v45 = vperm.slane %v4172_v28, %v5157_v43  ;;  %v7263_v61 = vshrl.u32 %v7260_v22, 16 }
 0x2c8   : > { %v4163_v27 = vperm.slane %v4159_v33, %v5157_v43  ;;  %v4178_v54 = vsel %vm832_vm1, %v4177_v60, %v3524_v0  ;;  %v4038_v39 = vsel %vm832_vm1, 0, %v4037_v32  ;;  %4606 = vst.msk [vmem:[%s6347_s8 + $0x1c] sm:$0xf] %vm2518_vm2, %v4457_v46  ;;  %v3432_v3 = vperm.slane %v2839_v62, %v5157_v43  ;;  %v2706_v60 = vpop.permute.xlu0 %2705 }
 0x2c9   : > { %v2842_v17 = vpack.i.b16 %v2841_v34, %v7263_v61  ;;  %v4461_v7 = vpack.i.b16 %v4460_v41, %v4459_v47  ;;  %v4182_v58 = vperm.slane %v4178_v54, %v5157_v43  ;;  %v4465_v11 = vpack.i.b16 %v4038_v39, %v4019_v23 }
 0x2ca   : > { %v4468_v1 = vshrl.u32 %v4038_v39, 16  ;;  %v4164_v8 = vrot.slane %v4163_v27, 4  ;;  %v3433_v22 = vrot.slane %v3432_v3, 4  ;;  %v7264_v52 = vrot.slane %v5653_v49, 4 }
 0x2cb   : > { %v3458_v12 = vperm.slane %v2842_v17, %v5157_v43  ;;  %4622 = vst.msk [vmem:[%s6347_s8 + $0x5c] sm:$0xf] %vm2518_vm2, %v4461_v7  ;;  %v4183_v13 = vrot.slane %v4182_v58, 4  ;;  %v2887_v10 = vpack.i.b16 %v6978_v44, %v6589_v5  ;;  %v7265_v42 = vrot.slane %v5656_v24, 4  ;;  %v7266_v7 = vld [vmem:[#allocation15_spill] sm:$0xff] }
 0x2cc   : > { %v3436_v38 = vsel %vm832_vm1, %v3432_v3, %v7264_v52  ;;  %v4469_v20 = vpack.i.b16 %v4468_v1, %v4467_v36  ;;  %4638 = vst.msk [vmem:[%s6347_s8 + $0x9c] sm:$0xf] %vm2518_vm2, %v4465_v11  ;;  %v4165_v62 = vsel %vm832_vm1, %v4164_v8, %v4157_v50  ;;  %v3434_v48 = vsel %vm832_vm1, %v3433_v22, %v5653_v49 }
 0x2cd   : > { %v3444_v16 = vperm.slane %v3436_v38, %v5172_v2  ;;  %v3459_v18 = vrot.slane %v3458_v12, 4  ;;  %v4169_v40 = vperm.slane %v4165_v62, %v5172_v2  ;;  %v4184_v35 = vsel %vm832_vm1, %v4183_v13, %v4176_v45 }
 0x2ce   : > { %v3462_v59 = vsel %vm832_vm1, %v3458_v12, %v7265_v42  ;;  %4654 = vst.msk [vmem:[%s6347_s8 + $0xdc] sm:$0xf] %vm2518_vm2, %v4469_v20  ;;  %v4188_v63 = vperm.slane %v4184_v35, %v5172_v2  ;;  %v3440_v15 = vperm.slane %v3434_v48, %v5172_v2  ;;  %v2888_v32 = vshrl.u32 %v6589_v5, 16 }
 0x2cf   : > { %v3447_v34 = vrot.slane %v3444_v16, 4  ;;  %v3460_v25 = vsel %vm832_vm1, %v3459_v18, %v5656_v24  ;;  %v4170_v26 = vrot.slane %v4169_v40, 4  ;;  %v4523_v4 = vshrl.u32 %v4169_v40, 16 }
 0x2d0   : > { %v3466_v56 = vperm.slane %v3460_v25, %v5172_v2  ;;  %v3470_v49 = vperm.slane %v3462_v59, %v5172_v2  ;;  %v4189_v19 = vrot.slane %v4188_v63, 4  ;;  %v4521_v47 = vpack.i.b16 %v4188_v63, %v4169_v40 }
 0x2d1   : > { %v4524_v29 = vshrl.u32 %v4188_v63, 16  ;;  %v3445_v30 = vrot.slane %v3440_v15, 4  ;;  %v4171_v53 = vsel %vm832_vm1, 0, %v4170_v26  ;;  %v3448_v31 = vsel %vm832_vm1, 0, %v3447_v34 }
 0x2d2   : > { %v3471_v37 = vrot.slane %v3466_v56, 4  ;;  %v3473_v50 = vrot.slane %v3470_v49, 4  ;;  %v4190_v24 = vsel %vm832_vm1, 0, %v4189_v19  ;;  %v4531_v51 = vshrl.u32 %v4171_v53, 16  ;;  %4610 = vst.msk [vmem:[%s6347_s8 + $0x2c] sm:$0xf] %vm2518_vm2, %v4521_v47 }
 0x2d3   : > { %v4525_v23 = vpack.i.b16 %v4524_v29, %v4523_v4  ;;  %v3446_v57 = vsel %vm832_vm1, 0, %v3445_v30  ;;  %v4529_v55 = vpack.i.b16 %v4190_v24, %v4171_v53  ;;  %v4532_v36 = vshrl.u32 %v4190_v24, 16 }
 0x2d4   : > { %v3472_v0 = vsel %vm832_vm1, 0, %v3471_v37  ;;  %v3474_v28 = vsel %vm832_vm1, 0, %v3473_v50  ;;  %v4115_v46 = vsel %vm832_vm1, %v3447_v34, %v3440_v15  ;;  %v4120_v41 = vrot.slane %v3448_v31, 4 }
 0x2d5   : > { %4626 = vst.msk [vmem:[%s6347_s8 + $0x6c] sm:$0xf] %vm2518_vm2, %v4525_v23  ;;  %v4139_v33 = vrot.slane %v3474_v28, 4  ;;  %v4533_v27 = vpack.i.b16 %v4532_v36, %v4531_v51  ;;  %v4119_v45 = vperm.slane %v4115_v46, %v5157_v43  ;;  %v4134_v54 = vsel %vm832_vm1, %v3473_v50, %v3466_v56 }
 0x2d6   : > { %4642 = vst.msk [vmem:[%s6347_s8 + $0xac] sm:$0xf] %vm2518_vm2, %v4529_v55  ;;  %v2889_v61 = vshrl.u32 %v6978_v44, 16  ;;  %v4121_v17 = vsel %vm832_vm1, %v4120_v41, %v3446_v57  ;;  %v3640_v5 = vperm.slane %v2887_v10, %v5157_v43  ;;  %v2875_v58 = vpack.i.b16 %v2706_v60, %v7266_v7 }
 0x2d7   : > { %v4140_v39 = vsel %vm832_vm1, %v4139_v33, %v3472_v0  ;;  %4658 = vst.msk [vmem:[%s6347_s8 + $0xec] sm:$0xf] %vm2518_vm2, %v4533_v27  ;;  %v4125_v3 = vperm.slane %v4121_v17, %v5157_v43  ;;  %v2877_v8 = vshrl.u32 %v2706_v60, 16  ;;  %v4138_v12 = vperm.slane %v4134_v54, %v5157_v43 }
 0x2d8   : > { %v4144_v11 = vperm.slane %v4140_v39, %v5157_v43  ;;  %v2890_v1 = vpack.i.b16 %v2889_v61, %v2888_v32  ;;  %v3641_v13 = vrot.slane %v3640_v5, 4  ;;  %v7267_v44 = vrot.slane %v6114_v14, 4 }
 0x2d9   : > { %v3588_v52 = vperm.slane %v2875_v58, %v5157_v43  ;;  %v4126_v38 = vrot.slane %v4125_v3, 4  ;;  %v3669_v16 = vrot.slane %v6151_v6, 4  ;;  %v7047_v18 = vperm.slane %v6119_v21, %v5157_v43 }
 0x2da   : > { %v3644_v22 = vsel %vm832_vm1, %v3640_v5, %v7267_v44  ;;  %v4145_v10 = vrot.slane %v4144_v11, 4  ;;  %v3666_v62 = vperm.slane %v2890_v1, %v5157_v43  ;;  %v3642_v40 = vsel %vm832_vm1, %v3641_v13, %v6114_v14 }
 0x2db   : > { %v3652_v20 = vperm.slane %v3644_v22, %v5172_v2  ;;  %v7268_v35 = vshrl.u32 %v7266_v7, 16  ;;  %v4127_v42 = vsel %vm832_vm1, %v4126_v38, %v4119_v45  ;;  %v3648_v63 = vperm.slane %v3642_v40, %v5172_v2 }
 0x2dc   : > { %v4146_v59 = vsel %vm832_vm1, %v4145_v10, %v4138_v12  ;;  %v4131_v34 = vperm.slane %v4127_v42, %v5172_v2  ;;  %v3667_v26 = vrot.slane %v3666_v62, 4  ;;  %v3670_v21 = vsel %vm832_vm1, %v3666_v62, %v3669_v16 }
 0x2dd   : > { %v2878_v48 = vpack.i.b16 %v2877_v8, %v7268_v35  ;;  %v3655_v15 = vrot.slane %v3652_v20, 4  ;;  %v4150_v25 = vperm.slane %v4146_v59, %v5172_v2  ;;  %v3653_v4 = vrot.slane %v3648_v63, 4 }
 0x2de   : > { %v3678_v14 = vperm.slane %v3670_v21, %v5172_v2  ;;  %v3589_v56 = vrot.slane %v3588_v52, 4  ;;  %v7269_v49 = vrot.slane %v6122_v9, 4  ;;  %v4132_v47 = vrot.slane %v4131_v34, 4 }
 0x2df   : > { %v4151_v29 = vrot.slane %v4150_v25, 4  ;;  %v4505_v30 = vpack.i.b16 %v4150_v25, %v4131_v34  ;;  %v3656_v53 = vsel %vm832_vm1, 0, %v3655_v15  ;;  %v4507_v31 = vshrl.u32 %v4131_v34, 16 }
 0x2e0   : > { %v3592_v19 = vsel %vm832_vm1, %v3588_v52, %v7269_v49  ;;  %v4508_v37 = vshrl.u32 %v4150_v25, 16  ;;  %v3668_v50 = vsel %vm832_vm1, %v3667_v26, %v6151_v6  ;;  %v3681_v24 = vrot.slane %v3678_v14, 4 }
 0x2e1   : > { %v4133_v23 = vsel %vm832_vm1, 0, %v4132_v47  ;;  %v4152_v51 = vsel %vm832_vm1, 0, %v4151_v29  ;;  %4609 = vst.msk [vmem:[%s6347_s8 + $0x28] sm:$0xf] %vm2518_vm2, %v4505_v30  ;;  %v3654_v57 = vsel %vm832_vm1, 0, %v3653_v4  ;;  %v3674_v55 = vperm.slane %v3668_v50, %v5172_v2 }
 0x2e2   : > { %v4509_v36 = vpack.i.b16 %v4508_v37, %v4507_v31  ;;  %v4513_v0 = vpack.i.b16 %v4152_v51, %v4133_v23  ;;  %v4515_v28 = vshrl.u32 %v4133_v23, 16  ;;  %v4516_v60 = vshrl.u32 %v4152_v51, 16 }
 0x2e3   : > { %v3679_v32 = vrot.slane %v3674_v55, 4  ;;  %v3682_v6 = vsel %vm832_vm1, 0, %v3681_v24  ;;  %v4267_v46 = vsel %vm832_vm1, %v3655_v15, %v3648_v63  ;;  %v4272_v41 = vrot.slane %v3656_v53, 4 }
 0x2e4   : > { %v4517_v33 = vpack.i.b16 %v4516_v60, %v4515_v28  ;;  %4625 = vst.msk [vmem:[%s6347_s8 + $0x68] sm:$0xf] %vm2518_vm2, %v4509_v36  ;;  %v4286_v27 = vsel %vm832_vm1, %v3681_v24, %v3674_v55  ;;  %v4291_v45 = vrot.slane %v3682_v6, 4  ;;  %v3590_v54 = vsel %vm832_vm1, %v3589_v56, %v6122_v9 }
 0x2e5   : > { %4641 = vst.msk [vmem:[%s6347_s8 + $0xa8] sm:$0xf] %vm2518_vm2, %v4513_v0  ;;  %v3680_v61 = vsel %vm832_vm1, 0, %v3679_v32  ;;  %v4273_v17 = vsel %vm832_vm1, %v4272_v41, %v3654_v57  ;;  %v3596_v39 = vperm.slane %v3590_v54, %v5172_v2  ;;  %v3600_v5 = vperm.slane %v3592_v19, %v5172_v2 }
 0x2e6   : > { %v3617_v7 = vrot.slane %v7047_v18, 4  ;;  %4657 = vst.msk [vmem:[%s6347_s8 + $0xe8] sm:$0xf] %vm2518_vm2, %v4517_v33  ;;  %v4277_v58 = vperm.slane %v4273_v17, %v5157_v43  ;;  %v4292_v3 = vsel %vm832_vm1, %v4291_v45, %v3680_v61  ;;  %v3614_v9 = vperm.slane %v2878_v48, %v5157_v43 }
 0x2e7   : > { %v4271_v11 = vperm.slane %v4267_v46, %v5157_v43  ;;  %v4296_v1 = vperm.slane %v4292_v3, %v5157_v43  ;;  %v3601_v8 = vrot.slane %v3596_v39, 4  ;;  %v3603_v12 = vrot.slane %v3600_v5, 4 }
 0x2e8   : > { %v4278_v13 = vrot.slane %v4277_v58, 4  ;;  %v4290_v44 = vperm.slane %v4286_v27, %v5157_v43  ;;  %v3615_v22 = vrot.slane %v3614_v9, 4  ;;  %v3618_v52 = vsel %vm832_vm1, %v3614_v9, %v3617_v7 }
 0x2e9   : > { %v4297_v38 = vrot.slane %v4296_v1, 4  ;;  %v3602_v10 = vsel %vm832_vm1, 0, %v3601_v8  ;;  %v3604_v20 = vsel %vm832_vm1, 0, %v3603_v12  ;;  %v3626_v62 = vperm.slane %v3618_v52, %v5172_v2 }
 0x2ea   : > { %v4279_v16 = vsel %vm832_vm1, %v4278_v13, %v4271_v11  ;;  %v3616_v40 = vsel %vm832_vm1, %v3615_v22, %v7047_v18  ;;  %v4234_v35 = vrot.slane %v3604_v20, 4  ;;  %v4229_v34 = vsel %vm832_vm1, %v3603_v12, %v3596_v39 }
 0x2eb   : > { %v4283_v48 = vperm.slane %v4279_v16, %v5172_v2  ;;  %v4298_v42 = vsel %vm832_vm1, %v4297_v38, %v4290_v44  ;;  %v3622_v59 = vperm.slane %v3616_v40, %v5172_v2  ;;  %v3629_v63 = vrot.slane %v3626_v62, 4 }
 0x2ec   : > { %v4302_v15 = vperm.slane %v4298_v42, %v5172_v2  ;;  %v4235_v25 = vsel %vm832_vm1, %v4234_v35, %v3602_v10  ;;  %v4233_v30 = vperm.slane %v4229_v34, %v5157_v43 }
 0x2ed   : > { %v4284_v26 = vrot.slane %v4283_v48, 4  ;;  %v4571_v21 = vshrl.u32 %v4283_v48, 16  ;;  %v3627_v4 = vrot.slane %v3622_v59, 4  ;;  %v3630_v18 = vsel %vm832_vm1, 0, %v3629_v63 }
 0x2ee   : > { %v4303_v14 = vrot.slane %v4302_v15, 4  ;;  %v4569_v56 = vpack.i.b16 %v4302_v15, %v4283_v48  ;;  %v4572_v49 = vshrl.u32 %v4302_v15, 16  ;;  %v4239_v19 = vperm.slane %v4235_v25, %v5157_v43 }
 0x2ef   : > { %v4285_v47 = vsel %vm832_vm1, 0, %v4284_v26  ;;  %v3628_v29 = vsel %vm832_vm1, 0, %v3627_v4  ;;  %v4253_v53 = vrot.slane %v3630_v18, 4  ;;  %v4248_v24 = vsel %vm832_vm1, %v3629_v63, %v3622_v59 }
 0x2f0   : > { %v4304_v31 = vsel %vm832_vm1, 0, %v4303_v14  ;;  %v4573_v37 = vpack.i.b16 %v4572_v49, %v4571_v21  ;;  %4613 = vst.msk [vmem:[%s6347_s8 + $0x38] sm:$0xf] %vm2518_vm2, %v4569_v56  ;;  %v4240_v50 = vrot.slane %v4239_v19, 4  ;;  %v4579_v51 = vshrl.u32 %v4285_v47, 16 }
 0x2f1   : > { %v4577_v23 = vpack.i.b16 %v4304_v31, %v4285_v47  ;;  %v4580_v57 = vshrl.u32 %v4304_v31, 16  ;;  %v4254_v55 = vsel %vm832_vm1, %v4253_v53, %v3628_v29  ;;  %v4252_v32 = vperm.slane %v4248_v24, %v5157_v43 }
 0x2f2   : > { %4629 = vst.msk [vmem:[%s6347_s8 + $0x78] sm:$0xf] %vm2518_vm2, %v4573_v37  ;;  %v4241_v36 = vsel %vm832_vm1, %v4240_v50, %v4233_v30  ;;  %v4258_v0 = vperm.slane %v4254_v55, %v5157_v43 }
 0x2f3   : > { %v4581_v28 = vpack.i.b16 %v4580_v57, %v4579_v51  ;;  %4645 = vst.msk [vmem:[%s6347_s8 + $0xb8] sm:$0xf] %vm2518_vm2, %v4577_v23  ;;  %v4245_v60 = vperm.slane %v4241_v36, %v5172_v2 }
 0x2f4   : > { %v4259_v6 = vrot.slane %v4258_v0, 4 }
 0x2f5   : > { %4661 = vst.msk [vmem:[%s6347_s8 + $0xf8] sm:$0xf] %vm2518_vm2, %v4581_v28  ;;  %v4246_v46 = vrot.slane %v4245_v60, 4  ;;  %v4555_v27 = vshrl.u32 %v4245_v60, 16 }
 0x2f6   : > { %v4260_v41 = vsel %vm832_vm1, %v4259_v6, %v4252_v32 }
 0x2f7   : > { %v4264_v33 = vperm.slane %v4260_v41, %v5172_v2  ;;  %v4247_v45 = vsel %vm832_vm1, 0, %v4246_v46 }
 0x2f8   : > { %v4563_v7 = vshrl.u32 %v4247_v45, 16 }
 0x2f9   : > { %v4265_v54 = vrot.slane %v4264_v33, 4  ;;  %v4553_v61 = vpack.i.b16 %v4264_v33, %v4245_v60  ;;  %v4556_v17 = vshrl.u32 %v4264_v33, 16 }
 0x2fb   : > { %v4266_v39 = vsel %vm832_vm1, 0, %v4265_v54  ;;  %v4557_v43 = vpack.i.b16 %v4556_v17, %v4555_v27  ;;  %4612 = vst.msk [vmem:[%s6347_s8 + $0x34] sm:$0xf] %vm2518_vm2, %v4553_v61 }
 0x2fc   : > { %v4561_v5 = vpack.i.b16 %v4266_v39, %v4247_v45  ;;  %v4564_v58 = vshrl.u32 %v4266_v39, 16 }
 0x2fd   : > { %4628 = vst.msk [vmem:[%s6347_s8 + $0x74] sm:$0xf] %vm2518_vm2, %v4557_v43 }
 0x2fe   : > { %v4565_v3 = vpack.i.b16 %v4564_v58, %v4563_v7  ;;  %4644 = vst.msk [vmem:[%s6347_s8 + $0xb4] sm:$0xf] %vm2518_vm2, %v4561_v5 }
 0x300   : > { %4660 = vst.msk [vmem:[%s6347_s8 + $0xf4] sm:$0xf] %vm2518_vm2, %v4565_v3 }
 0x301 PF: > { %s17_s21 = sadd.s32 1, %s4881_s21  }
 0x302   : > { %p14_p4 = scmp.ge.s32.totalorder %s17_s21, 4  }
 0x304   :  { %16 = sbr.rel (!%p14_p4) target bundleno = 1 (0x1), region = 82 }

</bundles_post_ra>
